<compile_context>
chip_gen: v6e
topology: v6e:2x2x1
jax: 0.10.0
libtpu: 0.0.40
codegen_flags: <defaults>
</compile_context>

<pallas_src>
import functools

import jax
import jax.numpy as jnp
from jax.experimental import pallas as pl
from jax.experimental.pallas import tpu as pltpu


_VMEM_LIMIT = 32 * 1024 * 1024  # safe on v5e/v6e/v7x; tiles below use ~6 MiB max


def _round_up(x, m):
    return (x + m - 1) // m * m


def _cdiv(a, b):
    return -(-a // b)


def _choose_tile_m(M):
    # Largest M tile that still leaves >= 2 blocks on the parallel axis
    # (v7x has 2 TensorCores sharding the "parallel" grid dim); fallback 128.
    for tm in (512, 256, 128):
        if _cdiv(M, tm) >= 2:
            return tm
    return 128


def _choose_tile_k(K):
    k128 = _round_up(K, 128)
    for tk in (512, 256, 128):
        if k128 % tk == 0:
            return tk
    return 128


def _choose_tile_bn(M_pad):
    for tm in (1024, 512, 256, 128):
        if M_pad % tm == 0 and M_pad // tm >= 2:
            return tm
    return 128


# --------------------------------------------------------------------------
# Pallas kernels
# --------------------------------------------------------------------------

def _conv_mm_kernel(x_ref, w_ref, b_ref, o_ref, stats_ref, acc_ref, *,
                    n_out, apply_lrelu, alpha):
    """Tiled bf16 matmul (im2col conv) with fused bias (+LeakyReLU) epilogue.

    Also emits per-M-tile per-channel (sum, sum-of-squares) partials so BatchNorm
    statistics never require an extra pass over the activation.
    """
    k = pl.program_id(1)

    @pl.when(k == 0)
    def _():
        acc_ref[...] = jnp.zeros_like(acc_ref)

    acc_ref[...] += jnp.dot(x_ref[...], w_ref[...],
                            preferred_element_type=jnp.float32)

    @pl.when(k == pl.num_programs(1) - 1)
    def _():
        y = acc_ref[...] + b_ref[...]
        if apply_lrelu:
            y = jnp.where(y > 0, y, alpha * y)
        # Only the true output channels are written back (masked store, but up to
        # 128x fewer bytes for narrow layers, e.g. the final 1-channel conv).
        o_ref[...] = y[:, :n_out].astype(o_ref.dtype)
        # Per-tile BN statistic partials (negligible VPU work on the last k step).
        s = jnp.sum(y, axis=0, keepdims=True)
        ss = jnp.sum(y * y, axis=0, keepdims=True)
        stats_ref[...] = jnp.concatenate([s, ss], axis=0)[None]


def conv_matmul(patches, w, b, *, n_out, apply_lrelu, alpha=0.2, tm, tk):
    """patches: [M_pad, K_pad] bf16, w: [K_pad, C_pad] bf16, b: [1, C_pad] f32.

    Returns (out [M_pad, n_out] f32, stats [n_m, 2, C_pad] f32).
    """
    M_pad, K_pad = patches.shape
    C_pad = w.shape[1]
    n_m, n_k = M_pad // tm, K_pad // tk
    kern = functools.partial(_conv_mm_kernel, n_out=n_out,
                             apply_lrelu=apply_lrelu, alpha=alpha)
    return pl.pallas_call(
        kern,
        out_shape=(
            jax.ShapeDtypeStruct((M_pad, n_out), jnp.float32),
            jax.ShapeDtypeStruct((n_m, 2, C_pad), jnp.float32),
        ),
        grid_spec=pltpu.PrefetchScalarGridSpec(
            num_scalar_prefetch=0,
            grid=(n_m, n_k),
            in_specs=[
                pl.BlockSpec((tm, tk), lambda i, k: (i, k)),
                pl.BlockSpec((tk, C_pad), lambda i, k: (k, 0)),
                pl.BlockSpec((1, C_pad), lambda i, k: (0, 0)),
            ],
            out_specs=[
                pl.BlockSpec((tm, n_out), lambda i, k: (i, 0)),
                pl.BlockSpec((1, 2, C_pad), lambda i, k: (i, 0, 0)),
            ],
            scratch_shapes=[pltpu.VMEM((tm, C_pad), jnp.float32)],
        ),
        compiler_params=pltpu.CompilerParams(
            dimension_semantics=("parallel", "arbitrary"),
            vmem_limit_bytes=_VMEM_LIMIT),
    )(patches, w, b)


def _bn_lrelu_kernel(x_ref, scale_ref, shift_ref, o_ref, *, alpha):
    """Fused (pre-folded) batch-norm affine + LeakyReLU: y = x*scale + shift."""
    y = x_ref[...] * scale_ref[...] + shift_ref[...]
    o_ref[...] = jnp.where(y > 0, y, alpha * y)


def bn_lrelu(x, scale, shift, *, alpha=0.2):
    M_pad, C = x.shape
    tm = _choose_tile_bn(M_pad)
    kern = functools.partial(_bn_lrelu_kernel, alpha=alpha)
    param_spec = pl.BlockSpec((1, C), lambda i: (0, 0))
    return pl.pallas_call(
        kern,
        out_shape=jax.ShapeDtypeStruct((M_pad, C), jnp.float32),
        grid_spec=pltpu.PrefetchScalarGridSpec(
            num_scalar_prefetch=0,
            grid=(M_pad // tm,),
            in_specs=[pl.BlockSpec((tm, C), lambda i: (i, 0)),
                      param_spec, param_spec],
            out_specs=pl.BlockSpec((tm, C), lambda i: (i, 0)),
        ),
        compiler_params=pltpu.CompilerParams(
            dimension_semantics=("parallel",),
            vmem_limit_bytes=_VMEM_LIMIT),
    )(x, scale, shift)


# --------------------------------------------------------------------------
# JAX glue: im2col for Conv3d(kernel=4, padding=2, stride s)
# --------------------------------------------------------------------------

def im2col3d(x, kw, stride, pad):
    """x: [N, D, H, W, C] -> ([N*OD*OH*OW, kw^3*C], (N, OD, OH, OW)).

    Patch flattening order is (kd, kh, kw, cin), matching a PyTorch weight
    [Cout, Cin, kD, kH, kW] transposed to (kD, kH, kW, Cin, Cout).
    """
    N, D, H, W, C = x.shape
    xp = jnp.pad(x, ((0, 0), (pad, pad), (pad, pad), (pad, pad), (0, 0)))
    Dp, Hp, Wp = D + 2 * pad, H + 2 * pad, W + 2 * pad
    OD = (Dp - kw) // stride + 1
    OH = (Hp - kw) // stride + 1
    OW = (Wp - kw) // stride + 1
    cols = []
    for kd in range(kw):
        for kh in range(kw):
            for kx in range(kw):
                sl = xp[:,
                        kd:kd + (OD - 1) * stride + 1:stride,
                        kh:kh + (OH - 1) * stride + 1:stride,
                        kx:kx + (OW - 1) * stride + 1:stride, :]
                cols.append(sl)
    patches = jnp.concatenate(cols, axis=-1)          # [N, OD, OH, OW, kw^3*C]
    return patches.reshape(N * OD * OH * OW, kw * kw * kw * C), (N, OD, OH, OW)


def conv3d_layer(x_ndhwc, w_pt, b, stride, pad=2, apply_lrelu=False):
    """One Conv3d (PyTorch semantics) via bf16 im2col + Pallas MXU matmul."""
    Cout, Cin, kD, _, _ = w_pt.shape
    # bf16 operands for the MXU; accumulation is f32 inside the kernel.
    patches, out4 = im2col3d(x_ndhwc.astype(jnp.bfloat16), kD, stride, pad)
    M, K = patches.shape
    tm = _choose_tile_m(M)
    tk = _choose_tile_k(K)
    M_pad = _round_up(M, tm)
    K_pad = _round_up(K, tk)
    C_pad = _round_up(Cout, 128)
    patches_p = jnp.pad(patches, ((0, M_pad - M), (0, K_pad - K)))
    w_mat = jnp.transpose(w_pt, (2, 3, 4, 1, 0)).reshape(K, Cout)
    w_p = jnp.pad(w_mat, ((0, K_pad - K), (0, C_pad - Cout))).astype(jnp.bfloat16)
    b_p = jnp.pad(b.reshape(1, Cout), ((0, 0), (0, C_pad - Cout))).astype(jnp.float32)
    out, stats = conv_matmul(patches_p, w_p, b_p, n_out=Cout,
                             apply_lrelu=apply_lrelu, tm=tm, tk=tk)
    return out, stats, M, M_pad, out4


# --------------------------------------------------------------------------
# Parameter init (deterministic, synthetic)
# --------------------------------------------------------------------------

def layer_channel_plan(input_nc, ndf, n_layers):
    plan = [(input_nc, ndf)]
    nf = ndf
    for _ in range(1, n_layers):
        nf_prev, nf = nf, min(nf * 2, 512)
        plan.append((nf_prev, nf))
    nf_prev, nf = nf, min(nf * 2, 512)
    plan.append((nf_prev, nf))     # stride-1 layer
    plan.append((nf, 1))           # final 1-channel conv
    return plan


def init_params(key, input_nc, ndf, n_layers):
    params = []
    for (cin, cout) in layer_channel_plan(input_nc, ndf, n_layers):
        key, k1, k2, k3, k4 = jax.random.split(key, 5)
        params.append(dict(
            w=0.02 * jax.random.normal(k1, (cout, cin, 4, 4, 4), jnp.float32),
            b=0.01 * jax.random.normal(k2, (cout,), jnp.float32),
            gamma=1.0 + 0.1 * jax.random.normal(k3, (cout,), jnp.float32),
            beta=0.05 * jax.random.normal(k4, (cout,), jnp.float32),
        ))
    return params


# --------------------------------------------------------------------------
# Forward pass (getIntermFeat=True, use_sigmoid=False)
# --------------------------------------------------------------------------

def discriminator_forward(x_ncdhw, params, n_layers=3, eps=1e-5):
    x = jnp.transpose(x_ncdhw, (0, 2, 3, 4, 1)).astype(jnp.float32)  # NDHWC
    n_total = n_layers + 2
    feats = []
    for li in range(n_total):
        p = params[li]
        Cout = p['w'].shape[0]
        stride = 2 if li < n_layers else 1
        has_bn = 1 <= li <= n_layers
        has_lrelu = li < n_total - 1
        out_p, stats, M, M_pad, (N, OD, OH, OW) = conv3d_layer(
            x, p['w'], p['b'], stride,
            apply_lrelu=(has_lrelu and not has_bn))
        if has_bn:
            # Finalize train-mode BN stats from the fused per-tile partials.
            s = jnp.sum(stats[:, 0, :Cout], axis=0)
            ss = jnp.sum(stats[:, 1, :Cout], axis=0)
            n_padded = M_pad - M          # zero patch rows -> conv output == bias
            bias = p['b']
            mean = (s - n_padded * bias) / M
            var = (ss - n_padded * bias * bias) / M - mean * mean   # biased (BN train)
            invstd = jax.lax.rsqrt(jnp.maximum(var, 0.0) + eps)
            scale = p['gamma'] * invstd
            shift = p['beta'] - mean * scale
            out_p = bn_lrelu(out_p, scale.reshape(1, Cout), shift.reshape(1, Cout))
        y = out_p[:M].reshape(N, OD, OH, OW, Cout)
        x = y
        feats.append(jnp.transpose(y, (0, 4, 1, 2, 3)))   # back to NCDHW
    # PyTorch: return (res[-1], res[1:])
    return feats[-1], feats


# --------------------------------------------------------------------------

if __name__ == "__main__":
    key = jax.random.PRNGKey(0)
    k_in, k_par = jax.random.split(key)

    input_nc, ndf, n_layers = 3, 8, 3
    x = jax.random.normal(k_in, (2, input_nc, 16, 16, 16), jnp.float32)  # NCDHW
    params = init_params(k_par, input_nc, ndf, n_layers)

    fwd = jax.jit(functools.partial(discriminator_forward, n_layers=n_layers))
    final_out, interm_feats = fwd(x, params)

    jax.block_until_ready(final_out)
    for f in interm_feats:
        jax.block_until_ready(f)

    assert final_out.shape == (2, 1, 5, 5, 5), final_out.shape
    assert len(interm_feats) == n_layers + 2
    print("KERNEL_OK")
</pallas_src>

<mosaic_0001>
module attributes {stable_mosaic.version = 11 : i64} {
  func.func @_conv_mm_kernel(%arg0: i32, %arg1: i32, %arg2: memref<512x256xbf16, #tpu.memory_space<vmem>>, %arg3: memref<256x128xbf16, #tpu.memory_space<vmem>>, %arg4: memref<1x128xf32, #tpu.memory_space<vmem>>, %arg5: memref<512x8xf32, #tpu.memory_space<vmem>>, %arg6: memref<1x2x128xf32, #tpu.memory_space<vmem>>, %arg7: memref<512x128xf32, #tpu.memory_space<vmem>>) attributes {dimension_semantics = [#tpu.dimension_semantics<parallel>, #tpu.dimension_semantics<arbitrary>], iteration_bounds = array<i64: 3, 1>, scalar_prefetch = 0 : i64, scratch_operands = 1 : i64, tpu.core_type = #tpu.core_type<tc>, window_params = [{transform_indices = @transform_0, window_bounds = array<i64: 512, 256>}, {transform_indices = @transform_1, window_bounds = array<i64: 256, 128>}, {pipeline_mode = #tpu.pipeline_mode<synchronous>, transform_indices = @transform_2, window_bounds = array<i64: 1, 128>}, {transform_indices = @transform_3, window_bounds = array<i64: 512, 8>}, {transform_indices = @transform_4, window_bounds = array<i64: 1, 2, 128>}]} {
    %c0_i32 = arith.constant 0 : i32
    %0 = arith.cmpi eq, %arg1, %c0_i32 : i32
    %1 = arith.extui %0 : i1 to i32
    %c0_i32_0 = arith.constant 0 : i32
    %2 = arith.cmpi ne, %1, %c0_i32_0 : i32
    scf.if %2 {
      %cst_10 = arith.constant 0.000000e+00 : f32
      %12 = vector.broadcast %cst_10 : f32 to vector<512x128xf32>
      %c0_11 = arith.constant 0 : index
      %c0_12 = arith.constant 0 : index
      %13 = vector.load %arg7[%c0_11, %c0_12] : memref<512x128xf32, #tpu.memory_space<vmem>>, vector<512x128xf32>
      tpu.vector_store %arg7[%c0_11, %c0_12], %12 {strides = array<i32>} : memref<512x128xf32, #tpu.memory_space<vmem>>, vector<512x128xf32>,
    } else {
    }
    %c0 = arith.constant 0 : index
    %c0_1 = arith.constant 0 : index
    %3 = vector.load %arg7[%c0, %c0_1] : memref<512x128xf32, #tpu.memory_space<vmem>>, vector<512x128xf32>
    %c0_2 = arith.constant 0 : index
    %c0_3 = arith.constant 0 : index
    %4 = vector.load %arg2[%c0_2, %c0_3] : memref<512x256xbf16, #tpu.memory_space<vmem>>, vector<512x256xbf16>
    %c0_4 = arith.constant 0 : index
    %c0_5 = arith.constant 0 : index
    %5 = vector.load %arg3[%c0_4, %c0_5] : memref<256x128xbf16, #tpu.memory_space<vmem>>, vector<256x128xbf16>
    %cst = arith.constant dense<0.000000e+00> : vector<512x128xf32>
    %6 = tpu.matmul %4, %5, %cst {dimension_numbers = #tpu.dot_dimension_numbers<[1], [0], [0], [1], [0, 0, 1, 1], [], []>} : vector<512x256xbf16>, vector<256x128xbf16>, vector<512x128xf32> -> vector<512x128xf32>
    %7 = arith.addf %3, %6 : vector<512x128xf32>
    %c0_6 = arith.constant 0 : index
    %c0_7 = arith.constant 0 : index
    %8 = vector.load %arg7[%c0_6, %c0_7] : memref<512x128xf32, #tpu.memory_space<vmem>>, vector<512x128xf32>
    tpu.vector_store %arg7[%c0_6, %c0_7], %7 {strides = array<i32>} : memref<512x128xf32, #tpu.memory_space<vmem>>, vector<512x128xf32>,
    %c0_i32_8 = arith.constant 0 : i32
    %9 = arith.cmpi eq, %arg1, %c0_i32_8 : i32
    %10 = arith.extui %9 : i1 to i32
    %c0_i32_9 = arith.constant 0 : i32
    %11 = arith.cmpi ne, %10, %c0_i32_9 : i32
    scf.if %11 {
      %c0_10 = arith.constant 0 : index
      %c0_11 = arith.constant 0 : index
      %12 = vector.load %arg7[%c0_10, %c0_11] : memref<512x128xf32, #tpu.memory_space<vmem>>, vector<512x128xf32>
      %c0_12 = arith.constant 0 : index
      %c0_13 = arith.constant 0 : index
      %13 = vector.load %arg4[%c0_12, %c0_13] : memref<1x128xf32, #tpu.memory_space<vmem>>, vector<1x128xf32>
      %14 = vector.broadcast %13 : vector<1x128xf32> to vector<512x128xf32>
      %15 = arith.addf %12, %14 : vector<512x128xf32>
      %cst_14 = arith.constant 0.000000e+00 : f32
      %16 = vector.broadcast %cst_14 : f32 to vector<512x128xf32>
      %17 = arith.cmpf ogt, %15, %16 : vector<512x128xf32>
      %cst_15 = arith.constant 2.000000e-01 : f32
      %18 = vector.broadcast %cst_15 : f32 to vector<512x128xf32>
      %19 = arith.mulf %18, %15 : vector<512x128xf32>
      %20 = arith.select %17, %15, %19 : vector<512x128xi1>, vector<512x128xf32>
      %21 = vector.extract_strided_slice %20 {offsets = [0, 0], sizes = [512, 8], strides = [1, 1]} : vector<512x128xf32> to vector<512x8xf32>
      %c0_16 = arith.constant 0 : index
      %c0_17 = arith.constant 0 : index
      %22 = vector.load %arg5[%c0_16, %c0_17] : memref<512x8xf32, #tpu.memory_space<vmem>>, vector<512x8xf32>
      tpu.vector_store %arg5[%c0_16, %c0_17], %21 {strides = array<i32>} : memref<512x8xf32, #tpu.memory_space<vmem>>, vector<512x8xf32>,
      %cst_18 = arith.constant dense<0.000000e+00> : vector<128xf32>
      %23 = vector.multi_reduction <add>, %20, %cst_18 [0] : vector<512x128xf32> to vector<128xf32>
      %24 = vector.shape_cast %23 : vector<128xf32> to vector<1x128xf32>
      %25 = arith.mulf %20, %20 : vector<512x128xf32>
      %cst_19 = arith.constant dense<0.000000e+00> : vector<128xf32>
      %26 = vector.multi_reduction <add>, %25, %cst_19 [0] : vector<512x128xf32> to vector<128xf32>
      %27 = vector.shape_cast %26 : vector<128xf32> to vector<1x128xf32>
      %28 = tpu.concatenate %24, %27 in 0 : vector<1x128xf32>, vector<1x128xf32> -> vector<2x128xf32>
      %29 = vector.shape_cast %28 : vector<2x128xf32> to vector<1x2x128xf32>
      %c0_20 = arith.constant 0 : index
      %c0_21 = arith.constant 0 : index
      %c0_22 = arith.constant 0 : index
      %30 = vector.load %arg6[%c0_20, %c0_21, %c0_22] : memref<1x2x128xf32, #tpu.memory_space<vmem>>, vector<1x2x128xf32>
      tpu.vector_store %arg6[%c0_20, %c0_21, %c0_22], %29 {strides = array<i32>} : memref<1x2x128xf32, #tpu.memory_space<vmem>>, vector<1x2x128xf32>,
    } else {
    }
    return
  }
  func.func @transform_0(%arg0: i32, %arg1: i32) -> (i32, i32) {
    %c0_i32 = arith.constant 0 : i32
    return %arg0, %arg1 : i32, i32
  }
  func.func @transform_1(%arg0: i32, %arg1: i32) -> (i32, i32) {
    %c0_i32 = arith.constant 0 : i32
    %c0_i32_0 = arith.constant 0 : i32
    return %arg1, %c0_i32 : i32, i32
  }
  func.func @transform_2(%arg0: i32, %arg1: i32) -> (i32, i32) {
    %c0_i32 = arith.constant 0 : i32
    %c0_i32_0 = arith.constant 0 : i32
    %c0_i32_1 = arith.constant 0 : i32
    return %c0_i32, %c0_i32_0 : i32, i32
  }
  func.func @transform_3(%arg0: i32, %arg1: i32) -> (i32, i32) {
    %c0_i32 = arith.constant 0 : i32
    %c0_i32_0 = arith.constant 0 : i32
    return %arg0, %c0_i32 : i32, i32
  }
  func.func @transform_4(%arg0: i32, %arg1: i32) -> (i32, i32, i32) {
    %c0_i32 = arith.constant 0 : i32
    %c0_i32_0 = arith.constant 0 : i32
    %c0_i32_1 = arith.constant 0 : i32
    return %arg0, %c0_i32, %c0_i32_0 : i32, i32, i32
  }
}

module attributes {stable_mosaic.version = 11 : i64} {
  func.func @_conv_mm_kernel(%arg0: i32, %arg1: i32, %arg2: memref<128x512xbf16, #tpu.memory_space<vmem>>, %arg3: memref<512x128xbf16, #tpu.memory_space<vmem>>, %arg4: memref<1x128xf32, #tpu.memory_space<vmem>>, %arg5: memref<128x16xf32, #tpu.memory_space<vmem>>, %arg6: memref<1x2x128xf32, #tpu.memory_space<vmem>>, %arg7: memref<128x128xf32, #tpu.memory_space<vmem>>) attributes {dimension_semantics = [#tpu.dimension_semantics<parallel>, #tpu.dimension_semantics<arbitrary>], iteration_bounds = array<i64: 2, 1>, scalar_prefetch = 0 : i64, scratch_operands = 1 : i64, tpu.core_type = #tpu.core_type<tc>, window_params = [{transform_indices = @transform_0, window_bounds = array<i64: 128, 512>}, {transform_indices = @transform_1, window_bounds = array<i64: 512, 128>}, {pipeline_mode = #tpu.pipeline_mode<synchronous>, transform_indices = @transform_2, window_bounds = array<i64: 1, 128>}, {transform_indices = @transform_3, window_bounds = array<i64: 128, 16>}, {transform_indices = @transform_4, window_bounds = array<i64: 1, 2, 128>}]} {
    %c0_i32 = arith.constant 0 : i32
    %0 = arith.cmpi eq, %arg1, %c0_i32 : i32
    %1 = arith.extui %0 : i1 to i32
    %c0_i32_0 = arith.constant 0 : i32
    %2 = arith.cmpi ne, %1, %c0_i32_0 : i32
    scf.if %2 {
      %cst_10 = arith.constant 0.000000e+00 : f32
      %12 = vector.broadcast %cst_10 : f32 to vector<128x128xf32>
      %c0_11 = arith.constant 0 : index
      %c0_12 = arith.constant 0 : index
      %13 = vector.load %arg7[%c0_11, %c0_12] : memref<128x128xf32, #tpu.memory_space<vmem>>, vector<128x128xf32>
      tpu.vector_store %arg7[%c0_11, %c0_12], %12 {strides = array<i32>} : memref<128x128xf32, #tpu.memory_space<vmem>>, vector<128x128xf32>,
    } else {
    }
    %c0 = arith.constant 0 : index
    %c0_1 = arith.constant 0 : index
    %3 = vector.load %arg7[%c0, %c0_1] : memref<128x128xf32, #tpu.memory_space<vmem>>, vector<128x128xf32>
    %c0_2 = arith.constant 0 : index
    %c0_3 = arith.constant 0 : index
    %4 = vector.load %arg2[%c0_2, %c0_3] : memref<128x512xbf16, #tpu.memory_space<vmem>>, vector<128x512xbf16>
    %c0_4 = arith.constant 0 : index
    %c0_5 = arith.constant 0 : index
    %5 = vector.load %arg3[%c0_4, %c0_5] : memref<512x128xbf16, #tpu.memory_space<vmem>>, vector<512x128xbf16>
    %cst = arith.constant dense<0.000000e+00> : vector<128x128xf32>
    %6 = tpu.matmul %4, %5, %cst {dimension_numbers = #tpu.dot_dimension_numbers<[1], [0], [0], [1], [0, 0, 1, 1], [], []>} : vector<128x512xbf16>, vector<512x128xbf16>, vector<128x128xf32> -> vector<128x128xf32>
    %7 = arith.addf %3, %6 : vector<128x128xf32>
    %c0_6 = arith.constant 0 : index
    %c0_7 = arith.constant 0 : index
    %8 = vector.load %arg7[%c0_6, %c0_7] : memref<128x128xf32, #tpu.memory_space<vmem>>, vector<128x128xf32>
    tpu.vector_store %arg7[%c0_6, %c0_7], %7 {strides = array<i32>} : memref<128x128xf32, #tpu.memory_space<vmem>>, vector<128x128xf32>,
    %c0_i32_8 = arith.constant 0 : i32
    %9 = arith.cmpi eq, %arg1, %c0_i32_8 : i32
    %10 = arith.extui %9 : i1 to i32
    %c0_i32_9 = arith.constant 0 : i32
    %11 = arith.cmpi ne, %10, %c0_i32_9 : i32
    scf.if %11 {
      %c0_10 = arith.constant 0 : index
      %c0_11 = arith.constant 0 : index
      %12 = vector.load %arg7[%c0_10, %c0_11] : memref<128x128xf32, #tpu.memory_space<vmem>>, vector<128x128xf32>
      %c0_12 = arith.constant 0 : index
      %c0_13 = arith.constant 0 : index
      %13 = vector.load %arg4[%c0_12, %c0_13] : memref<1x128xf32, #tpu.memory_space<vmem>>, vector<1x128xf32>
      %14 = vector.broadcast %13 : vector<1x128xf32> to vector<128x128xf32>
      %15 = arith.addf %12, %14 : vector<128x128xf32>
      %16 = vector.extract_strided_slice %15 {offsets = [0, 0], sizes = [128, 16], strides = [1, 1]} : vector<128x128xf32> to vector<128x16xf32>
      %c0_14 = arith.constant 0 : index
      %c0_15 = arith.constant 0 : index
      %17 = vector.load %arg5[%c0_14, %c0_15] : memref<128x16xf32, #tpu.memory_space<vmem>>, vector<128x16xf32>
      tpu.vector_store %arg5[%c0_14, %c0_15], %16 {strides = array<i32>} : memref<128x16xf32, #tpu.memory_space<vmem>>, vector<128x16xf32>,
      %cst_16 = arith.constant dense<0.000000e+00> : vector<128xf32>
      %18 = vector.multi_reduction <add>, %15, %cst_16 [0] : vector<128x128xf32> to vector<128xf32>
      %19 = vector.shape_cast %18 : vector<128xf32> to vector<1x128xf32>
      %20 = arith.mulf %15, %15 : vector<128x128xf32>
      %cst_17 = arith.constant dense<0.000000e+00> : vector<128xf32>
      %21 = vector.multi_reduction <add>, %20, %cst_17 [0] : vector<128x128xf32> to vector<128xf32>
      %22 = vector.shape_cast %21 : vector<128xf32> to vector<1x128xf32>
      %23 = tpu.concatenate %19, %22 in 0 : vector<1x128xf32>, vector<1x128xf32> -> vector<2x128xf32>
      %24 = vector.shape_cast %23 : vector<2x128xf32> to vector<1x2x128xf32>
      %c0_18 = arith.constant 0 : index
      %c0_19 = arith.constant 0 : index
      %c0_20 = arith.constant 0 : index
      %25 = vector.load %arg6[%c0_18, %c0_19, %c0_20] : memref<1x2x128xf32, #tpu.memory_space<vmem>>, vector<1x2x128xf32>
      tpu.vector_store %arg6[%c0_18, %c0_19, %c0_20], %24 {strides = array<i32>} : memref<1x2x128xf32, #tpu.memory_space<vmem>>, vector<1x2x128xf32>,
    } else {
    }
    return
  }
  func.func @transform_0(%arg0: i32, %arg1: i32) -> (i32, i32) {
    %c0_i32 = arith.constant 0 : i32
    return %arg0, %arg1 : i32, i32
  }
  func.func @transform_1(%arg0: i32, %arg1: i32) -> (i32, i32) {
    %c0_i32 = arith.constant 0 : i32
    %c0_i32_0 = arith.constant 0 : i32
    return %arg1, %c0_i32 : i32, i32
  }
  func.func @transform_2(%arg0: i32, %arg1: i32) -> (i32, i32) {
    %c0_i32 = arith.constant 0 : i32
    %c0_i32_0 = arith.constant 0 : i32
    %c0_i32_1 = arith.constant 0 : i32
    return %c0_i32, %c0_i32_0 : i32, i32
  }
  func.func @transform_3(%arg0: i32, %arg1: i32) -> (i32, i32) {
    %c0_i32 = arith.constant 0 : i32
    %c0_i32_0 = arith.constant 0 : i32
    return %arg0, %c0_i32 : i32, i32
  }
  func.func @transform_4(%arg0: i32, %arg1: i32) -> (i32, i32, i32) {
    %c0_i32 = arith.constant 0 : i32
    %c0_i32_0 = arith.constant 0 : i32
    %c0_i32_1 = arith.constant 0 : i32
    return %arg0, %c0_i32, %c0_i32_0 : i32, i32, i32
  }
}

module attributes {stable_mosaic.version = 11 : i64} {
  func.func @_bn_lrelu_kernel(%arg0: i32, %arg1: memref<128x16xf32, #tpu.memory_space<vmem>>, %arg2: memref<1x16xf32, #tpu.memory_space<vmem>>, %arg3: memref<1x16xf32, #tpu.memory_space<vmem>>, %arg4: memref<128x16xf32, #tpu.memory_space<vmem>>) attributes {dimension_semantics = [#tpu.dimension_semantics<parallel>], iteration_bounds = array<i64: 2>, scalar_prefetch = 0 : i64, scratch_operands = 0 : i64, tpu.core_type = #tpu.core_type<tc>, window_params = [{transform_indices = @transform_0, window_bounds = array<i64: 128, 16>}, {pipeline_mode = #tpu.pipeline_mode<synchronous>, transform_indices = @transform_1, window_bounds = array<i64: 1, 16>}, {pipeline_mode = #tpu.pipeline_mode<synchronous>, transform_indices = @transform_2, window_bounds = array<i64: 1, 16>}, {transform_indices = @transform_3, window_bounds = array<i64: 128, 16>}]} {
    %c0 = arith.constant 0 : index
    %c0_0 = arith.constant 0 : index
    %0 = vector.load %arg1[%c0, %c0_0] : memref<128x16xf32, #tpu.memory_space<vmem>>, vector<128x16xf32>
    %c0_1 = arith.constant 0 : index
    %c0_2 = arith.constant 0 : index
    %1 = vector.load %arg2[%c0_1, %c0_2] : memref<1x16xf32, #tpu.memory_space<vmem>>, vector<1x16xf32>
    %2 = vector.broadcast %1 : vector<1x16xf32> to vector<128x16xf32>
    %3 = arith.mulf %0, %2 : vector<128x16xf32>
    %c0_3 = arith.constant 0 : index
    %c0_4 = arith.constant 0 : index
    %4 = vector.load %arg3[%c0_3, %c0_4] : memref<1x16xf32, #tpu.memory_space<vmem>>, vector<1x16xf32>
    %5 = vector.broadcast %4 : vector<1x16xf32> to vector<128x16xf32>
    %6 = arith.addf %3, %5 : vector<128x16xf32>
    %cst = arith.constant 0.000000e+00 : f32
    %7 = vector.broadcast %cst : f32 to vector<128x16xf32>
    %8 = arith.cmpf ogt, %6, %7 : vector<128x16xf32>
    %cst_5 = arith.constant 2.000000e-01 : f32
    %9 = vector.broadcast %cst_5 : f32 to vector<128x16xf32>
    %10 = arith.mulf %9, %6 : vector<128x16xf32>
    %11 = arith.select %8, %6, %10 : vector<128x16xi1>, vector<128x16xf32>
    %c0_6 = arith.constant 0 : index
    %c0_7 = arith.constant 0 : index
    %12 = vector.load %arg4[%c0_6, %c0_7] : memref<128x16xf32, #tpu.memory_space<vmem>>, vector<128x16xf32>
    tpu.vector_store %arg4[%c0_6, %c0_7], %11 {strides = array<i32>} : memref<128x16xf32, #tpu.memory_space<vmem>>, vector<128x16xf32>,
    return
  }
  func.func @transform_0(%arg0: i32) -> (i32, i32) {
    %c0_i32 = arith.constant 0 : i32
    %c0_i32_0 = arith.constant 0 : i32
    return %arg0, %c0_i32 : i32, i32
  }
  func.func @transform_1(%arg0: i32) -> (i32, i32) {
    %c0_i32 = arith.constant 0 : i32
    %c0_i32_0 = arith.constant 0 : i32
    %c0_i32_1 = arith.constant 0 : i32
    return %c0_i32, %c0_i32_0 : i32, i32
  }
  func.func @transform_2(%arg0: i32) -> (i32, i32) {
    %c0_i32 = arith.constant 0 : i32
    %c0_i32_0 = arith.constant 0 : i32
    %c0_i32_1 = arith.constant 0 : i32
    return %c0_i32, %c0_i32_0 : i32, i32
  }
  func.func @transform_3(%arg0: i32) -> (i32, i32) {
    %c0_i32 = arith.constant 0 : i32
    %c0_i32_0 = arith.constant 0 : i32
    return %arg0, %c0_i32 : i32, i32
  }
}

module attributes {stable_mosaic.version = 11 : i64} {
  func.func @_conv_mm_kernel(%arg0: i32, %arg1: i32, %arg2: memref<128x512xbf16, #tpu.memory_space<vmem>>, %arg3: memref<512x128xbf16, #tpu.memory_space<vmem>>, %arg4: memref<1x128xf32, #tpu.memory_space<vmem>>, %arg5: memref<128x32xf32, #tpu.memory_space<vmem>>, %arg6: memref<1x2x128xf32, #tpu.memory_space<vmem>>, %arg7: memref<128x128xf32, #tpu.memory_space<vmem>>) attributes {dimension_semantics = [#tpu.dimension_semantics<parallel>, #tpu.dimension_semantics<arbitrary>], iteration_bounds = array<i64: 1, 2>, scalar_prefetch = 0 : i64, scratch_operands = 1 : i64, tpu.core_type = #tpu.core_type<tc>, window_params = [{transform_indices = @transform_0, window_bounds = array<i64: 128, 512>}, {transform_indices = @transform_1, window_bounds = array<i64: 512, 128>}, {pipeline_mode = #tpu.pipeline_mode<synchronous>, transform_indices = @transform_2, window_bounds = array<i64: 1, 128>}, {transform_indices = @transform_3, window_bounds = array<i64: 128, 32>}, {transform_indices = @transform_4, window_bounds = array<i64: 1, 2, 128>}]} {
    %c0_i32 = arith.constant 0 : i32
    %0 = arith.cmpi eq, %arg1, %c0_i32 : i32
    %1 = arith.extui %0 : i1 to i32
    %c0_i32_0 = arith.constant 0 : i32
    %2 = arith.cmpi ne, %1, %c0_i32_0 : i32
    scf.if %2 {
      %cst_9 = arith.constant 0.000000e+00 : f32
      %12 = vector.broadcast %cst_9 : f32 to vector<128x128xf32>
      %c0_10 = arith.constant 0 : index
      %c0_11 = arith.constant 0 : index
      %13 = vector.load %arg7[%c0_10, %c0_11] : memref<128x128xf32, #tpu.memory_space<vmem>>, vector<128x128xf32>
      tpu.vector_store %arg7[%c0_10, %c0_11], %12 {strides = array<i32>} : memref<128x128xf32, #tpu.memory_space<vmem>>, vector<128x128xf32>,
    } else {
    }
    %c0 = arith.constant 0 : index
    %c0_1 = arith.constant 0 : index
    %3 = vector.load %arg7[%c0, %c0_1] : memref<128x128xf32, #tpu.memory_space<vmem>>, vector<128x128xf32>
    %c0_2 = arith.constant 0 : index
    %c0_3 = arith.constant 0 : index
    %4 = vector.load %arg2[%c0_2, %c0_3] : memref<128x512xbf16, #tpu.memory_space<vmem>>, vector<128x512xbf16>
    %c0_4 = arith.constant 0 : index
    %c0_5 = arith.constant 0 : index
    %5 = vector.load %arg3[%c0_4, %c0_5] : memref<512x128xbf16, #tpu.memory_space<vmem>>, vector<512x128xbf16>
    %cst = arith.constant dense<0.000000e+00> : vector<128x128xf32>
    %6 = tpu.matmul %4, %5, %cst {dimension_numbers = #tpu.dot_dimension_numbers<[1], [0], [0], [1], [0, 0, 1, 1], [], []>} : vector<128x512xbf16>, vector<512x128xbf16>, vector<128x128xf32> -> vector<128x128xf32>
    %7 = arith.addf %3, %6 : vector<128x128xf32>
    %c0_6 = arith.constant 0 : index
    %c0_7 = arith.constant 0 : index
    %8 = vector.load %arg7[%c0_6, %c0_7] : memref<128x128xf32, #tpu.memory_space<vmem>>, vector<128x128xf32>
    tpu.vector_store %arg7[%c0_6, %c0_7], %7 {strides = array<i32>} : memref<128x128xf32, #tpu.memory_space<vmem>>, vector<128x128xf32>,
    %c1_i32 = arith.constant 1 : i32
    %9 = arith.cmpi eq, %arg1, %c1_i32 : i32
    %10 = arith.extui %9 : i1 to i32
    %c0_i32_8 = arith.constant 0 : i32
    %11 = arith.cmpi ne, %10, %c0_i32_8 : i32
    scf.if %11 {
      %c0_9 = arith.constant 0 : index
      %c0_10 = arith.constant 0 : index
      %12 = vector.load %arg7[%c0_9, %c0_10] : memref<128x128xf32, #tpu.memory_space<vmem>>, vector<128x128xf32>
      %c0_11 = arith.constant 0 : index
      %c0_12 = arith.constant 0 : index
      %13 = vector.load %arg4[%c0_11, %c0_12] : memref<1x128xf32, #tpu.memory_space<vmem>>, vector<1x128xf32>
      %14 = vector.broadcast %13 : vector<1x128xf32> to vector<128x128xf32>
      %15 = arith.addf %12, %14 : vector<128x128xf32>
      %16 = vector.extract_strided_slice %15 {offsets = [0, 0], sizes = [128, 32], strides = [1, 1]} : vector<128x128xf32> to vector<128x32xf32>
      %c0_13 = arith.constant 0 : index
      %c0_14 = arith.constant 0 : index
      %17 = vector.load %arg5[%c0_13, %c0_14] : memref<128x32xf32, #tpu.memory_space<vmem>>, vector<128x32xf32>
      tpu.vector_store %arg5[%c0_13, %c0_14], %16 {strides = array<i32>} : memref<128x32xf32, #tpu.memory_space<vmem>>, vector<128x32xf32>,
      %cst_15 = arith.constant dense<0.000000e+00> : vector<128xf32>
      %18 = vector.multi_reduction <add>, %15, %cst_15 [0] : vector<128x128xf32> to vector<128xf32>
      %19 = vector.shape_cast %18 : vector<128xf32> to vector<1x128xf32>
      %20 = arith.mulf %15, %15 : vector<128x128xf32>
      %cst_16 = arith.constant dense<0.000000e+00> : vector<128xf32>
      %21 = vector.multi_reduction <add>, %20, %cst_16 [0] : vector<128x128xf32> to vector<128xf32>
      %22 = vector.shape_cast %21 : vector<128xf32> to vector<1x128xf32>
      %23 = tpu.concatenate %19, %22 in 0 : vector<1x128xf32>, vector<1x128xf32> -> vector<2x128xf32>
      %24 = vector.shape_cast %23 : vector<2x128xf32> to vector<1x2x128xf32>
      %c0_17 = arith.constant 0 : index
      %c0_18 = arith.constant 0 : index
      %c0_19 = arith.constant 0 : index
      %25 = vector.load %arg6[%c0_17, %c0_18, %c0_19] : memref<1x2x128xf32, #tpu.memory_space<vmem>>, vector<1x2x128xf32>
      tpu.vector_store %arg6[%c0_17, %c0_18, %c0_19], %24 {strides = array<i32>} : memref<1x2x128xf32, #tpu.memory_space<vmem>>, vector<1x2x128xf32>,
    } else {
    }
    return
  }
  func.func @transform_0(%arg0: i32, %arg1: i32) -> (i32, i32) {
    %c0_i32 = arith.constant 0 : i32
    return %arg0, %arg1 : i32, i32
  }
  func.func @transform_1(%arg0: i32, %arg1: i32) -> (i32, i32) {
    %c0_i32 = arith.constant 0 : i32
    %c0_i32_0 = arith.constant 0 : i32
    return %arg1, %c0_i32 : i32, i32
  }
  func.func @transform_2(%arg0: i32, %arg1: i32) -> (i32, i32) {
    %c0_i32 = arith.constant 0 : i32
    %c0_i32_0 = arith.constant 0 : i32
    %c0_i32_1 = arith.constant 0 : i32
    return %c0_i32, %c0_i32_0 : i32, i32
  }
  func.func @transform_3(%arg0: i32, %arg1: i32) -> (i32, i32) {
    %c0_i32 = arith.constant 0 : i32
    %c0_i32_0 = arith.constant 0 : i32
    return %arg0, %c0_i32 : i32, i32
  }
  func.func @transform_4(%arg0: i32, %arg1: i32) -> (i32, i32, i32) {
    %c0_i32 = arith.constant 0 : i32
    %c0_i32_0 = arith.constant 0 : i32
    %c0_i32_1 = arith.constant 0 : i32
    return %arg0, %c0_i32, %c0_i32_0 : i32, i32, i32
  }
}

module attributes {stable_mosaic.version = 11 : i64} {
  func.func @_bn_lrelu_kernel(%arg0: i32, %arg1: memref<128x32xf32, #tpu.memory_space<vmem>>, %arg2: memref<1x32xf32, #tpu.memory_space<vmem>>, %arg3: memref<1x32xf32, #tpu.memory_space<vmem>>, %arg4: memref<128x32xf32, #tpu.memory_space<vmem>>) attributes {dimension_semantics = [#tpu.dimension_semantics<parallel>], iteration_bounds = array<i64: 1>, scalar_prefetch = 0 : i64, scratch_operands = 0 : i64, tpu.core_type = #tpu.core_type<tc>, window_params = [{transform_indices = @transform_0, window_bounds = array<i64: 128, 32>}, {pipeline_mode = #tpu.pipeline_mode<synchronous>, transform_indices = @transform_1, window_bounds = array<i64: 1, 32>}, {pipeline_mode = #tpu.pipeline_mode<synchronous>, transform_indices = @transform_2, window_bounds = array<i64: 1, 32>}, {transform_indices = @transform_3, window_bounds = array<i64: 128, 32>}]} {
    %c0 = arith.constant 0 : index
    %c0_0 = arith.constant 0 : index
    %0 = vector.load %arg1[%c0, %c0_0] : memref<128x32xf32, #tpu.memory_space<vmem>>, vector<128x32xf32>
    %c0_1 = arith.constant 0 : index
    %c0_2 = arith.constant 0 : index
    %1 = vector.load %arg2[%c0_1, %c0_2] : memref<1x32xf32, #tpu.memory_space<vmem>>, vector<1x32xf32>
    %2 = vector.broadcast %1 : vector<1x32xf32> to vector<128x32xf32>
    %3 = arith.mulf %0, %2 : vector<128x32xf32>
    %c0_3 = arith.constant 0 : index
    %c0_4 = arith.constant 0 : index
    %4 = vector.load %arg3[%c0_3, %c0_4] : memref<1x32xf32, #tpu.memory_space<vmem>>, vector<1x32xf32>
    %5 = vector.broadcast %4 : vector<1x32xf32> to vector<128x32xf32>
    %6 = arith.addf %3, %5 : vector<128x32xf32>
    %cst = arith.constant 0.000000e+00 : f32
    %7 = vector.broadcast %cst : f32 to vector<128x32xf32>
    %8 = arith.cmpf ogt, %6, %7 : vector<128x32xf32>
    %cst_5 = arith.constant 2.000000e-01 : f32
    %9 = vector.broadcast %cst_5 : f32 to vector<128x32xf32>
    %10 = arith.mulf %9, %6 : vector<128x32xf32>
    %11 = arith.select %8, %6, %10 : vector<128x32xi1>, vector<128x32xf32>
    %c0_6 = arith.constant 0 : index
    %c0_7 = arith.constant 0 : index
    %12 = vector.load %arg4[%c0_6, %c0_7] : memref<128x32xf32, #tpu.memory_space<vmem>>, vector<128x32xf32>
    tpu.vector_store %arg4[%c0_6, %c0_7], %11 {strides = array<i32>} : memref<128x32xf32, #tpu.memory_space<vmem>>, vector<128x32xf32>,
    return
  }
  func.func @transform_0(%arg0: i32) -> (i32, i32) {
    %c0_i32 = arith.constant 0 : i32
    %c0_i32_0 = arith.constant 0 : i32
    return %arg0, %c0_i32 : i32, i32
  }
  func.func @transform_1(%arg0: i32) -> (i32, i32) {
    %c0_i32 = arith.constant 0 : i32
    %c0_i32_0 = arith.constant 0 : i32
    %c0_i32_1 = arith.constant 0 : i32
    return %c0_i32, %c0_i32_0 : i32, i32
  }
  func.func @transform_2(%arg0: i32) -> (i32, i32) {
    %c0_i32 = arith.constant 0 : i32
    %c0_i32_0 = arith.constant 0 : i32
    %c0_i32_1 = arith.constant 0 : i32
    return %c0_i32, %c0_i32_0 : i32, i32
  }
  func.func @transform_3(%arg0: i32) -> (i32, i32) {
    %c0_i32 = arith.constant 0 : i32
    %c0_i32_0 = arith.constant 0 : i32
    return %arg0, %c0_i32 : i32, i32
  }
}

module attributes {stable_mosaic.version = 11 : i64} {
  func.func @_conv_mm_kernel(%arg0: i32, %arg1: i32, %arg2: memref<128x512xbf16, #tpu.memory_space<vmem>>, %arg3: memref<512x128xbf16, #tpu.memory_space<vmem>>, %arg4: memref<1x128xf32, #tpu.memory_space<vmem>>, %arg5: memref<128x64xf32, #tpu.memory_space<vmem>>, %arg6: memref<1x2x128xf32, #tpu.memory_space<vmem>>, %arg7: memref<128x128xf32, #tpu.memory_space<vmem>>) attributes {dimension_semantics = [#tpu.dimension_semantics<parallel>, #tpu.dimension_semantics<arbitrary>], iteration_bounds = array<i64: 1, 4>, scalar_prefetch = 0 : i64, scratch_operands = 1 : i64, tpu.core_type = #tpu.core_type<tc>, window_params = [{transform_indices = @transform_0, window_bounds = array<i64: 128, 512>}, {transform_indices = @transform_1, window_bounds = array<i64: 512, 128>}, {pipeline_mode = #tpu.pipeline_mode<synchronous>, transform_indices = @transform_2, window_bounds = array<i64: 1, 128>}, {transform_indices = @transform_3, window_bounds = array<i64: 128, 64>}, {transform_indices = @transform_4, window_bounds = array<i64: 1, 2, 128>}]} {
    %c0_i32 = arith.constant 0 : i32
    %0 = arith.cmpi eq, %arg1, %c0_i32 : i32
    %1 = arith.extui %0 : i1 to i32
    %c0_i32_0 = arith.constant 0 : i32
    %2 = arith.cmpi ne, %1, %c0_i32_0 : i32
    scf.if %2 {
      %cst_9 = arith.constant 0.000000e+00 : f32
      %12 = vector.broadcast %cst_9 : f32 to vector<128x128xf32>
      %c0_10 = arith.constant 0 : index
      %c0_11 = arith.constant 0 : index
      %13 = vector.load %arg7[%c0_10, %c0_11] : memref<128x128xf32, #tpu.memory_space<vmem>>, vector<128x128xf32>
      tpu.vector_store %arg7[%c0_10, %c0_11], %12 {strides = array<i32>} : memref<128x128xf32, #tpu.memory_space<vmem>>, vector<128x128xf32>,
    } else {
    }
    %c0 = arith.constant 0 : index
    %c0_1 = arith.constant 0 : index
    %3 = vector.load %arg7[%c0, %c0_1] : memref<128x128xf32, #tpu.memory_space<vmem>>, vector<128x128xf32>
    %c0_2 = arith.constant 0 : index
    %c0_3 = arith.constant 0 : index
    %4 = vector.load %arg2[%c0_2, %c0_3] : memref<128x512xbf16, #tpu.memory_space<vmem>>, vector<128x512xbf16>
    %c0_4 = arith.constant 0 : index
    %c0_5 = arith.constant 0 : index
    %5 = vector.load %arg3[%c0_4, %c0_5] : memref<512x128xbf16, #tpu.memory_space<vmem>>, vector<512x128xbf16>
    %cst = arith.constant dense<0.000000e+00> : vector<128x128xf32>
    %6 = tpu.matmul %4, %5, %cst {dimension_numbers = #tpu.dot_dimension_numbers<[1], [0], [0], [1], [0, 0, 1, 1], [], []>} : vector<128x512xbf16>, vector<512x128xbf16>, vector<128x128xf32> -> vector<128x128xf32>
    %7 = arith.addf %3, %6 : vector<128x128xf32>
    %c0_6 = arith.constant 0 : index
    %c0_7 = arith.constant 0 : index
    %8 = vector.load %arg7[%c0_6, %c0_7] : memref<128x128xf32, #tpu.memory_space<vmem>>, vector<128x128xf32>
    tpu.vector_store %arg7[%c0_6, %c0_7], %7 {strides = array<i32>} : memref<128x128xf32, #tpu.memory_space<vmem>>, vector<128x128xf32>,
    %c3_i32 = arith.constant 3 : i32
    %9 = arith.cmpi eq, %arg1, %c3_i32 : i32
    %10 = arith.extui %9 : i1 to i32
    %c0_i32_8 = arith.constant 0 : i32
    %11 = arith.cmpi ne, %10, %c0_i32_8 : i32
    scf.if %11 {
      %c0_9 = arith.constant 0 : index
      %c0_10 = arith.constant 0 : index
      %12 = vector.load %arg7[%c0_9, %c0_10] : memref<128x128xf32, #tpu.memory_space<vmem>>, vector<128x128xf32>
      %c0_11 = arith.constant 0 : index
      %c0_12 = arith.constant 0 : index
      %13 = vector.load %arg4[%c0_11, %c0_12] : memref<1x128xf32, #tpu.memory_space<vmem>>, vector<1x128xf32>
      %14 = vector.broadcast %13 : vector<1x128xf32> to vector<128x128xf32>
      %15 = arith.addf %12, %14 : vector<128x128xf32>
      %16 = vector.extract_strided_slice %15 {offsets = [0, 0], sizes = [128, 64], strides = [1, 1]} : vector<128x128xf32> to vector<128x64xf32>
      %c0_13 = arith.constant 0 : index
      %c0_14 = arith.constant 0 : index
      %17 = vector.load %arg5[%c0_13, %c0_14] : memref<128x64xf32, #tpu.memory_space<vmem>>, vector<128x64xf32>
      tpu.vector_store %arg5[%c0_13, %c0_14], %16 {strides = array<i32>} : memref<128x64xf32, #tpu.memory_space<vmem>>, vector<128x64xf32>,
      %cst_15 = arith.constant dense<0.000000e+00> : vector<128xf32>
      %18 = vector.multi_reduction <add>, %15, %cst_15 [0] : vector<128x128xf32> to vector<128xf32>
      %19 = vector.shape_cast %18 : vector<128xf32> to vector<1x128xf32>
      %20 = arith.mulf %15, %15 : vector<128x128xf32>
      %cst_16 = arith.constant dense<0.000000e+00> : vector<128xf32>
      %21 = vector.multi_reduction <add>, %20, %cst_16 [0] : vector<128x128xf32> to vector<128xf32>
      %22 = vector.shape_cast %21 : vector<128xf32> to vector<1x128xf32>
      %23 = tpu.concatenate %19, %22 in 0 : vector<1x128xf32>, vector<1x128xf32> -> vector<2x128xf32>
      %24 = vector.shape_cast %23 : vector<2x128xf32> to vector<1x2x128xf32>
      %c0_17 = arith.constant 0 : index
      %c0_18 = arith.constant 0 : index
      %c0_19 = arith.constant 0 : index
      %25 = vector.load %arg6[%c0_17, %c0_18, %c0_19] : memref<1x2x128xf32, #tpu.memory_space<vmem>>, vector<1x2x128xf32>
      tpu.vector_store %arg6[%c0_17, %c0_18, %c0_19], %24 {strides = array<i32>} : memref<1x2x128xf32, #tpu.memory_space<vmem>>, vector<1x2x128xf32>,
    } else {
    }
    return
  }
  func.func @transform_0(%arg0: i32, %arg1: i32) -> (i32, i32) {
    %c0_i32 = arith.constant 0 : i32
    return %arg0, %arg1 : i32, i32
  }
  func.func @transform_1(%arg0: i32, %arg1: i32) -> (i32, i32) {
    %c0_i32 = arith.constant 0 : i32
    %c0_i32_0 = arith.constant 0 : i32
    return %arg1, %c0_i32 : i32, i32
  }
  func.func @transform_2(%arg0: i32, %arg1: i32) -> (i32, i32) {
    %c0_i32 = arith.constant 0 : i32
    %c0_i32_0 = arith.constant 0 : i32
    %c0_i32_1 = arith.constant 0 : i32
    return %c0_i32, %c0_i32_0 : i32, i32
  }
  func.func @transform_3(%arg0: i32, %arg1: i32) -> (i32, i32) {
    %c0_i32 = arith.constant 0 : i32
    %c0_i32_0 = arith.constant 0 : i32
    return %arg0, %c0_i32 : i32, i32
  }
  func.func @transform_4(%arg0: i32, %arg1: i32) -> (i32, i32, i32) {
    %c0_i32 = arith.constant 0 : i32
    %c0_i32_0 = arith.constant 0 : i32
    %c0_i32_1 = arith.constant 0 : i32
    return %arg0, %c0_i32, %c0_i32_0 : i32, i32, i32
  }
}

module attributes {stable_mosaic.version = 11 : i64} {
  func.func @_bn_lrelu_kernel(%arg0: i32, %arg1: memref<128x64xf32, #tpu.memory_space<vmem>>, %arg2: memref<1x64xf32, #tpu.memory_space<vmem>>, %arg3: memref<1x64xf32, #tpu.memory_space<vmem>>, %arg4: memref<128x64xf32, #tpu.memory_space<vmem>>) attributes {dimension_semantics = [#tpu.dimension_semantics<parallel>], iteration_bounds = array<i64: 1>, scalar_prefetch = 0 : i64, scratch_operands = 0 : i64, tpu.core_type = #tpu.core_type<tc>, window_params = [{transform_indices = @transform_0, window_bounds = array<i64: 128, 64>}, {pipeline_mode = #tpu.pipeline_mode<synchronous>, transform_indices = @transform_1, window_bounds = array<i64: 1, 64>}, {pipeline_mode = #tpu.pipeline_mode<synchronous>, transform_indices = @transform_2, window_bounds = array<i64: 1, 64>}, {transform_indices = @transform_3, window_bounds = array<i64: 128, 64>}]} {
    %c0 = arith.constant 0 : index
    %c0_0 = arith.constant 0 : index
    %0 = vector.load %arg1[%c0, %c0_0] : memref<128x64xf32, #tpu.memory_space<vmem>>, vector<128x64xf32>
    %c0_1 = arith.constant 0 : index
    %c0_2 = arith.constant 0 : index
    %1 = vector.load %arg2[%c0_1, %c0_2] : memref<1x64xf32, #tpu.memory_space<vmem>>, vector<1x64xf32>
    %2 = vector.broadcast %1 : vector<1x64xf32> to vector<128x64xf32>
    %3 = arith.mulf %0, %2 : vector<128x64xf32>
    %c0_3 = arith.constant 0 : index
    %c0_4 = arith.constant 0 : index
    %4 = vector.load %arg3[%c0_3, %c0_4] : memref<1x64xf32, #tpu.memory_space<vmem>>, vector<1x64xf32>
    %5 = vector.broadcast %4 : vector<1x64xf32> to vector<128x64xf32>
    %6 = arith.addf %3, %5 : vector<128x64xf32>
    %cst = arith.constant 0.000000e+00 : f32
    %7 = vector.broadcast %cst : f32 to vector<128x64xf32>
    %8 = arith.cmpf ogt, %6, %7 : vector<128x64xf32>
    %cst_5 = arith.constant 2.000000e-01 : f32
    %9 = vector.broadcast %cst_5 : f32 to vector<128x64xf32>
    %10 = arith.mulf %9, %6 : vector<128x64xf32>
    %11 = arith.select %8, %6, %10 : vector<128x64xi1>, vector<128x64xf32>
    %c0_6 = arith.constant 0 : index
    %c0_7 = arith.constant 0 : index
    %12 = vector.load %arg4[%c0_6, %c0_7] : memref<128x64xf32, #tpu.memory_space<vmem>>, vector<128x64xf32>
    tpu.vector_store %arg4[%c0_6, %c0_7], %11 {strides = array<i32>} : memref<128x64xf32, #tpu.memory_space<vmem>>, vector<128x64xf32>,
    return
  }
  func.func @transform_0(%arg0: i32) -> (i32, i32) {
    %c0_i32 = arith.constant 0 : i32
    %c0_i32_0 = arith.constant 0 : i32
    return %arg0, %c0_i32 : i32, i32
  }
  func.func @transform_1(%arg0: i32) -> (i32, i32) {
    %c0_i32 = arith.constant 0 : i32
    %c0_i32_0 = arith.constant 0 : i32
    %c0_i32_1 = arith.constant 0 : i32
    return %c0_i32, %c0_i32_0 : i32, i32
  }
  func.func @transform_2(%arg0: i32) -> (i32, i32) {
    %c0_i32 = arith.constant 0 : i32
    %c0_i32_0 = arith.constant 0 : i32
    %c0_i32_1 = arith.constant 0 : i32
    return %c0_i32, %c0_i32_0 : i32, i32
  }
  func.func @transform_3(%arg0: i32) -> (i32, i32) {
    %c0_i32 = arith.constant 0 : i32
    %c0_i32_0 = arith.constant 0 : i32
    return %arg0, %c0_i32 : i32, i32
  }
}

module attributes {stable_mosaic.version = 11 : i64} {
  func.func @_conv_mm_kernel(%arg0: i32, %arg1: i32, %arg2: memref<128x512xbf16, #tpu.memory_space<vmem>>, %arg3: memref<512x128xbf16, #tpu.memory_space<vmem>>, %arg4: memref<1x128xf32, #tpu.memory_space<vmem>>, %arg5: memref<128x1xf32, #tpu.memory_space<vmem>>, %arg6: memref<1x2x128xf32, #tpu.memory_space<vmem>>, %arg7: memref<128x128xf32, #tpu.memory_space<vmem>>) attributes {dimension_semantics = [#tpu.dimension_semantics<parallel>, #tpu.dimension_semantics<arbitrary>], iteration_bounds = array<i64: 2, 8>, scalar_prefetch = 0 : i64, scratch_operands = 1 : i64, tpu.core_type = #tpu.core_type<tc>, window_params = [{transform_indices = @transform_0, window_bounds = array<i64: 128, 512>}, {transform_indices = @transform_1, window_bounds = array<i64: 512, 128>}, {pipeline_mode = #tpu.pipeline_mode<synchronous>, transform_indices = @transform_2, window_bounds = array<i64: 1, 128>}, {transform_indices = @transform_3, window_bounds = array<i64: 128, 1>}, {transform_indices = @transform_4, window_bounds = array<i64: 1, 2, 128>}]} {
    %c0_i32 = arith.constant 0 : i32
    %0 = arith.cmpi eq, %arg1, %c0_i32 : i32
    %1 = arith.extui %0 : i1 to i32
    %c0_i32_0 = arith.constant 0 : i32
    %2 = arith.cmpi ne, %1, %c0_i32_0 : i32
    scf.if %2 {
      %cst_9 = arith.constant 0.000000e+00 : f32
      %12 = vector.broadcast %cst_9 : f32 to vector<128x128xf32>
      %c0_10 = arith.constant 0 : index
      %c0_11 = arith.constant 0 : index
      %13 = vector.load %arg7[%c0_10, %c0_11] : memref<128x128xf32, #tpu.memory_space<vmem>>, vector<128x128xf32>
      tpu.vector_store %arg7[%c0_10, %c0_11], %12 {strides = array<i32>} : memref<128x128xf32, #tpu.memory_space<vmem>>, vector<128x128xf32>,
    } else {
    }
    %c0 = arith.constant 0 : index
    %c0_1 = arith.constant 0 : index
    %3 = vector.load %arg7[%c0, %c0_1] : memref<128x128xf32, #tpu.memory_space<vmem>>, vector<128x128xf32>
    %c0_2 = arith.constant 0 : index
    %c0_3 = arith.constant 0 : index
    %4 = vector.load %arg2[%c0_2, %c0_3] : memref<128x512xbf16, #tpu.memory_space<vmem>>, vector<128x512xbf16>
    %c0_4 = arith.constant 0 : index
    %c0_5 = arith.constant 0 : index
    %5 = vector.load %arg3[%c0_4, %c0_5] : memref<512x128xbf16, #tpu.memory_space<vmem>>, vector<512x128xbf16>
    %cst = arith.constant dense<0.000000e+00> : vector<128x128xf32>
    %6 = tpu.matmul %4, %5, %cst {dimension_numbers = #tpu.dot_dimension_numbers<[1], [0], [0], [1], [0, 0, 1, 1], [], []>} : vector<128x512xbf16>, vector<512x128xbf16>, vector<128x128xf32> -> vector<128x128xf32>
    %7 = arith.addf %3, %6 : vector<128x128xf32>
    %c0_6 = arith.constant 0 : index
    %c0_7 = arith.constant 0 : index
    %8 = vector.load %arg7[%c0_6, %c0_7] : memref<128x128xf32, #tpu.memory_space<vmem>>, vector<128x128xf32>
    tpu.vector_store %arg7[%c0_6, %c0_7], %7 {strides = array<i32>} : memref<128x128xf32, #tpu.memory_space<vmem>>, vector<128x128xf32>,
    %c7_i32 = arith.constant 7 : i32
    %9 = arith.cmpi eq, %arg1, %c7_i32 : i32
    %10 = arith.extui %9 : i1 to i32
    %c0_i32_8 = arith.constant 0 : i32
    %11 = arith.cmpi ne, %10, %c0_i32_8 : i32
    scf.if %11 {
      %c0_9 = arith.constant 0 : index
      %c0_10 = arith.constant 0 : index
      %12 = vector.load %arg7[%c0_9, %c0_10] : memref<128x128xf32, #tpu.memory_space<vmem>>, vector<128x128xf32>
      %c0_11 = arith.constant 0 : index
      %c0_12 = arith.constant 0 : index
      %13 = vector.load %arg4[%c0_11, %c0_12] : memref<1x128xf32, #tpu.memory_space<vmem>>, vector<1x128xf32>
      %14 = vector.broadcast %13 : vector<1x128xf32> to vector<128x128xf32>
      %15 = arith.addf %12, %14 : vector<128x128xf32>
      %16 = vector.extract_strided_slice %15 {offsets = [0, 0], sizes = [128, 1], strides = [1, 1]} : vector<128x128xf32> to vector<128x1xf32>
      %c0_13 = arith.constant 0 : index
      %c0_14 = arith.constant 0 : index
      %17 = vector.load %arg5[%c0_13, %c0_14] : memref<128x1xf32, #tpu.memory_space<vmem>>, vector<128x1xf32>
      tpu.vector_store %arg5[%c0_13, %c0_14], %16 {strides = array<i32>} : memref<128x1xf32, #tpu.memory_space<vmem>>, vector<128x1xf32>,
      %cst_15 = arith.constant dense<0.000000e+00> : vector<128xf32>
      %18 = vector.multi_reduction <add>, %15, %cst_15 [0] : vector<128x128xf32> to vector<128xf32>
      %19 = vector.shape_cast %18 : vector<128xf32> to vector<1x128xf32>
      %20 = arith.mulf %15, %15 : vector<128x128xf32>
      %cst_16 = arith.constant dense<0.000000e+00> : vector<128xf32>
      %21 = vector.multi_reduction <add>, %20, %cst_16 [0] : vector<128x128xf32> to vector<128xf32>
      %22 = vector.shape_cast %21 : vector<128xf32> to vector<1x128xf32>
      %23 = tpu.concatenate %19, %22 in 0 : vector<1x128xf32>, vector<1x128xf32> -> vector<2x128xf32>
      %24 = vector.shape_cast %23 : vector<2x128xf32> to vector<1x2x128xf32>
      %c0_17 = arith.constant 0 : index
      %c0_18 = arith.constant 0 : index
      %c0_19 = arith.constant 0 : index
      %25 = vector.load %arg6[%c0_17, %c0_18, %c0_19] : memref<1x2x128xf32, #tpu.memory_space<vmem>>, vector<1x2x128xf32>
      tpu.vector_store %arg6[%c0_17, %c0_18, %c0_19], %24 {strides = array<i32>} : memref<1x2x128xf32, #tpu.memory_space<vmem>>, vector<1x2x128xf32>,
    } else {
    }
    return
  }
  func.func @transform_0(%arg0: i32, %arg1: i32) -> (i32, i32) {
    %c0_i32 = arith.constant 0 : i32
    return %arg0, %arg1 : i32, i32
  }
  func.func @transform_1(%arg0: i32, %arg1: i32) -> (i32, i32) {
    %c0_i32 = arith.constant 0 : i32
    %c0_i32_0 = arith.constant 0 : i32
    return %arg1, %c0_i32 : i32, i32
  }
  func.func @transform_2(%arg0: i32, %arg1: i32) -> (i32, i32) {
    %c0_i32 = arith.constant 0 : i32
    %c0_i32_0 = arith.constant 0 : i32
    %c0_i32_1 = arith.constant 0 : i32
    return %c0_i32, %c0_i32_0 : i32, i32
  }
  func.func @transform_3(%arg0: i32, %arg1: i32) -> (i32, i32) {
    %c0_i32 = arith.constant 0 : i32
    %c0_i32_0 = arith.constant 0 : i32
    return %arg0, %c0_i32 : i32, i32
  }
  func.func @transform_4(%arg0: i32, %arg1: i32) -> (i32, i32, i32) {
    %c0_i32 = arith.constant 0 : i32
    %c0_i32_0 = arith.constant 0 : i32
    %c0_i32_1 = arith.constant 0 : i32
    return %arg0, %c0_i32, %c0_i32_0 : i32, i32, i32
  }
}

</mosaic_0001>

<bundles_post_ra>
// kernel: discriminator_forward.8
= control target key start
LH: loop header
LB: loop body
LE: loop exit
PB: predicated region body
PF: predicated region fallthrough
CT: control target
= control target key end

     0   :  { %10 = vsyncpa [#allocation4], 0  ;;  %s3275_s0 = inlined_call_operand.vmem [shape: bf16[1536,256], index: 0, kind: input, shape index: {}]   ;;  %s3276_s1 = inlined_call_operand.vmem [shape: bf16[256,128], index: 1, kind: input, shape index: {}]   ;;  %s3277_s2 = inlined_call_operand.vmem [shape: f32[1,128], index: 2, kind: input, shape index: {}]   ;;  %s3278_s3 = inlined_call_operand.vmem [shape: f32[1536,8], index: 3, kind: output, shape index: {0}]   ;;  %s3279_s4 = inlined_call_operand.hbm [shape: f32[3,2,128], index: 4, kind: output, shape index: {1}]  }
   0x1   :  { %12 = vsyncpa [#allocation4 + $0x1], 0  ;;  %s2467_s15 = smov 0   ;;  %s2469_s16 = smov 0  }
   0x2   :  { %s2471_s17 = smov 0   ;;  %s2473_s18 = smov 0  }
   0x3   :  { %s2475_s19 = smov 0   ;;  %s2477_s20 = smov 0  }
   0x4 LB: > { %s2063_s21 = sadd.s32 4294967295, %s2438_s20   ;;  %s2064_s22 = sadd.s32 4294967294, %s2438_s20   ;;  %s2438_s20 = sphi %s2477_s20, %s18_s20   ;;  %s2434_s19 = sphi %s2475_s19, %s3286_s19   ;;  %s2430_s18 = sphi %s2473_s18, %s3285_s18   ;;  %s2426_s17 = sphi %s2471_s17, %s3284_s17   ;;  %s2422_s16 = sphi %s2469_s16, %s3283_s16   ;;  %s2418_s15 = sphi %s2467_s15, %s3282_s15  }
   0x5   : > { %s30_s23 = sadd.s32 1, %s2434_s19  ;;  %s138_s24 = sadd.s32 1, %s2426_s17 }
   0x6   : > { %p32_p0 = scmp.ge.s32.totalorder %s30_s23, 3  ;;  %p148_p1 = scmp.ne.s32.totalorder %s2426_s17, %s2422_s16 }
   0x7   : > { %p149_p2 = scmp.eq.s32.totalorder %s2063_s21, 2  ;;  %p154_p3 = scmp.ne.s32.totalorder %s2422_s16, %s2418_s15 }
   0x8   : > { %s3288_s23 = smov (%p32_p0, %s30_s23), 0  ;;  %p155_p5 = scmp.eq.s32.totalorder %s2064_s22, 2 }
   0x9   : > { %p2507_p4 = por %p149_p2, %p148_p1  ;;  %s135_s26 = ssub.s32 %s2434_s19, %s3288_s23 }
   0xa   : > { %p2068_p6 = scmp.ge.s32.totalorder %s2438_s20, 1  ;;  %p136_p7 = scmp.eq.s32.totalorder %s135_s26, 0 }
   0xb   : > { %p2514_p8 = por %p155_p5, %p154_p3  ;;  %p200_p9 = scmp.lt.s32.totalorder %s2438_s20, 4 }
   0xc   : > { %s2520_s28 = scalar_select %p136_p7, %s2426_s17, %s138_s24  }
   0xd   : > { %p201_p10 = pnand %p2068_p6, %p200_p9 }
   0xe   : > { %s2070_s5 = sshll.u32 (!%p201_p10), %s2430_s18, 6  ;;  %s238_s26 = sand.u32 (!%p201_p10), 1, %s2422_s16  }
   0xf   : > { %204 = sbr.rel (%p201_p10) target bundleno = 501 (0x1f5), region = 32  ;;  %p243_p11 = scmp.lt.s32.totalorder (!%p201_p10), %s2070_s5, 191 }
  0x10   : > { %s2069_s29 = sshll.u32 (!%p201_p10), %s238_s26, 1  ;;  %s2157_s30 = sshll.u32 (!%p201_p10), %s2430_s18, 5 }
  0x11   : > { %s240_s6 = scalar_lea.vmem (!%p201_p10), [#allocation3], %s2069_s29  ;;  %s3235_s10 = scalar_lea.hbm (!%p201_p10), %s3279_s4, %s2157_s30 }
  0x12   : > { %s1950_s7 = sshll.u32 (!%p201_p10), %s240_s6, 4  ;;  %s1933_s11 = scalar_lea.sflag (!%p201_p10), [#allocation4], %s238_s26  ;;  %s1951_s7 = int_to_ptr.vmem [resolvable:$true] %s1950_s7 }
  0x13   : > { %s2362_s13 = scalar_lea.vmem (!%p201_p10), %s1951_s7, 32  ;;  %s2441_s18 = smov (!%p201_p10), [#allocation3]  }
  0x14   : > { %v2249_v0 = vld [vmem:[%s3276_s1 + $0x38] sm:$0xff]   ;;  %v2440_v1 = vmov 0   ;;  %v2250_v2 = vld [vmem:[%s3276_s1 + $0x30] sm:$0xff]   ;;  %v2251_v3 = vld [vmem:[%s3276_s1 + $0x28] sm:$0xff]   ;;  %s3290_s5 = smov (!%p243_p11, %s2070_s5), 191  ;;  %vm1657_vm0 = vcmask 64512   ;;  %p2363_p12 = scmp.ne.s32.totalorder %s1951_s7, %s2362_s13 }
  0x15   : > { %910 = vmatprep.subr.bf16.mxu0 %v2440_v1  ;;  %2161 = vmatprep.subr.bf16.mxu1 %v2440_v1  ;;  %v2252_v4 = vld [vmem:[%s3276_s1 + $0x20] sm:$0xff]   ;;  %s2160_s12 = sshll.u32 %s3290_s5, 3  ;;  %v2253_v5 = vld [vmem:[%s3276_s1 + $0x18] sm:$0xff]   ;;  %v2254_v7 = vld [vmem:[%s3276_s1 + $0x10] sm:$0xff]   ;;  %s2366_s14 = sshll.u32 %s2441_s18, 4  ;;  %s2367_s14 = int_to_ptr.vmem [resolvable:$false] %s2366_s14 }
  0x16   : > { %911 = vmatpush1.bf16.msra.mxu0 %v2249_v0  ;;  %2177 = vmatpush1.bf16.msra.mxu1 %v2249_v0  ;;  %s2554_s24 = scalar_lea.vmem %s3275_s0, %s2160_s12  ;;  %v2255_v8 = vld [vmem:[%s3276_s1 + $0x8] sm:$0xff]   ;;  %v2256_v9 = vld [vmem:[%s3276_s1] sm:$0xff]   ;;  %v2257_v11 = vld [vmem:[%s3276_s1 + $0x78] sm:$0xff]   ;;  %p2364_p13 = pnand %p2363_p12, %p2507_p4 }
  0x17   : > { %912 = vmatprep.subr.bf16.mxu0 %v2440_v1  ;;  %2162 = vmatprep.subr.bf16.mxu1 %v2440_v1  ;;  %v2267_v6 = vld [vmem:[%s2554_s24 + $0x4] ss:$8 sps:$4 sm:$0xff]   ;;  %v2258_v12 = vld [vmem:[%s3276_s1 + $0x70] sm:$0xff]   ;;  %v2261_v15 = vld [vmem:[%s3276_s1 + $0x58] sm:$0xff]   ;;  %s2368_s21 = scalar_lea.vmem %s2367_s14, 64  ;;  %p2369_p1 = scmp.lt.s32.totalorder %s1951_s7, %s2367_s14 }
  0x18   : > { %942 = vmatprep.mubr.bf16.mxu0 %v2267_v6  ;;  %v2291_v10 = vld [vmem:[%s2554_s24 + $0x104] ss:$8 sps:$4 sm:$0xff]   ;;  %v2262_v16 = vld [vmem:[%s3276_s1 + $0x50] sm:$0xff]   ;;  %v2265_v19 = vld [vmem:[%s2554_s24] ss:$8 sps:$4 sm:$0xff]   ;;  %p2365_p0 = pneg %p2364_p13  ;;  %p2370_p2 = scmp.lt.s32.totalorder %s2368_s21, %s2362_s13 }
  0x19   : > { %1070 = vmatprep.mubr.bf16.mxu1 %v2291_v10  ;;  %v2259_v13 = vld [vmem:[%s3276_s1 + $0x68] sm:$0xff]   ;;  %v2260_v14 = vld [vmem:[%s3276_s1 + $0x60] sm:$0xff]   ;;  %v2268_v21 = vld [vmem:[%s2554_s24 + $0x14] ss:$8 sps:$4 sm:$0xff]  }
  0x1a   : > { %913 = vmatpush1.bf16.msra.mxu0 %v2250_v2  ;;  %2178 = vmatpush1.bf16.msra.mxu1 %v2250_v2  ;;  %v2263_v17 = vld [vmem:[%s3276_s1 + $0x48] sm:$0xff]   ;;  %v2264_v18 = vld [vmem:[%s3276_s1 + $0x40] sm:$0xff]   ;;  %v2295_v22 = vld [vmem:[%s2554_s24 + $0x114] ss:$8 sps:$4 sm:$0xff]   ;;  %p2371_p3 = por %p2370_p2, %p2369_p1 }
  0x1b   : > { %914 = vmatprep.subr.bf16.mxu0 %v2440_v1  ;;  %2163 = vmatprep.subr.bf16.mxu1 %v2440_v1  ;;  %v2289_v20 = vld [vmem:[%s2554_s24 + $0x100] ss:$8 sps:$4 sm:$0xff]   ;;  %v2270_v23 = vld [vmem:[%s2554_s24 + $0x10] ss:$8 sps:$4 sm:$0xff]   ;;  %v2271_v25 = vld [vmem:[%s2554_s24 + $0x24] ss:$8 sps:$4 sm:$0xff]  }
  0x1c   : > { %v2297_v24 = vld [vmem:[%s2554_s24 + $0x110] ss:$8 sps:$4 sm:$0xff]   ;;  %v2301_v26 = vld [vmem:[%s2554_s24 + $0x124] ss:$8 sps:$4 sm:$0xff]   ;;  %v2273_v27 = vld [vmem:[%s2554_s24 + $0x20] ss:$8 sps:$4 sm:$0xff]   ;;  %p2372_p5 = pnand %p2371_p3, %p2365_p0 }
  0x1d   : > { %v2303_v28 = vld [vmem:[%s2554_s24 + $0x120] ss:$8 sps:$4 sm:$0xff]   ;;  %v2274_v29 = vld [vmem:[%s2554_s24 + $0x34] ss:$8 sps:$4 sm:$0xff]   ;;  %v2276_v31 = vld [vmem:[%s2554_s24 + $0x30] ss:$8 sps:$4 sm:$0xff]  }
  0x1e   : > { %915 = vmatpush1.bf16.msra.mxu0 %v2251_v3  ;;  %2179 = vmatpush1.bf16.msra.mxu1 %v2251_v3  ;;  %v2307_v30 = vld [vmem:[%s2554_s24 + $0x134] ss:$8 sps:$4 sm:$0xff]   ;;  %v2309_v32 = vld [vmem:[%s2554_s24 + $0x130] ss:$8 sps:$4 sm:$0xff]   ;;  %v2277_v33 = vld [vmem:[%s2554_s24 + $0x44] ss:$8 sps:$4 sm:$0xff]  }
  0x1f   : > { %916 = vmatprep.subr.bf16.mxu0 %v2440_v1  ;;  %2164 = vmatprep.subr.bf16.mxu1 %v2440_v1  ;;  %v2313_v34 = vld [vmem:[%s2554_s24 + $0x144] ss:$8 sps:$4 sm:$0xff]   ;;  %v2279_v35 = vld [vmem:[%s2554_s24 + $0x40] ss:$8 sps:$4 sm:$0xff]   ;;  %v2280_v37 = vld [vmem:[%s2554_s24 + $0x54] ss:$8 sps:$4 sm:$0xff]  }
  0x20   : > { %v2315_v36 = vld [vmem:[%s2554_s24 + $0x140] ss:$8 sps:$4 sm:$0xff]   ;;  %v2319_v38 = vld [vmem:[%s2554_s24 + $0x154] ss:$8 sps:$4 sm:$0xff]   ;;  %v2282_v39 = vld [vmem:[%s2554_s24 + $0x50] ss:$8 sps:$4 sm:$0xff]  }
  0x21   : > { %v2321_v40 = vld [vmem:[%s2554_s24 + $0x150] ss:$8 sps:$4 sm:$0xff]   ;;  %v2283_v41 = vld [vmem:[%s2554_s24 + $0x64] ss:$8 sps:$4 sm:$0xff]   ;;  %v2285_v43 = vld [vmem:[%s2554_s24 + $0x60] ss:$8 sps:$4 sm:$0xff]  }
  0x22   : > { %917 = vmatpush1.bf16.msra.mxu0 %v2252_v4  ;;  %2180 = vmatpush1.bf16.msra.mxu1 %v2252_v4  ;;  %v2325_v42 = vld [vmem:[%s2554_s24 + $0x164] ss:$8 sps:$4 sm:$0xff]   ;;  %v2327_v44 = vld [vmem:[%s2554_s24 + $0x160] ss:$8 sps:$4 sm:$0xff]   ;;  %v2286_v45 = vld [vmem:[%s2554_s24 + $0x74] ss:$8 sps:$4 sm:$0xff]  }
  0x23   : > { %918 = vmatprep.subr.bf16.mxu0 %v2440_v1  ;;  %2165 = vmatprep.subr.bf16.mxu1 %v2440_v1  ;;  %v2331_v46 = vld [vmem:[%s2554_s24 + $0x174] ss:$8 sps:$4 sm:$0xff]   ;;  %v2288_v47 = vld [vmem:[%s2554_s24 + $0x70] ss:$8 sps:$4 sm:$0xff]   ;;  %v2292_v49 = vld [vmem:[%s2554_s24 + $0x84] ss:$8 sps:$4 sm:$0xff]  }
  0x24   : > { %v2333_v48 = vld [vmem:[%s2554_s24 + $0x170] ss:$8 sps:$4 sm:$0xff]   ;;  %v2337_v50 = vld [vmem:[%s2554_s24 + $0x184] ss:$8 sps:$4 sm:$0xff]   ;;  %v2294_v51 = vld [vmem:[%s2554_s24 + $0x80] ss:$8 sps:$4 sm:$0xff]  }
  0x25   : > { %v2339_v52 = vld [vmem:[%s2554_s24 + $0x180] ss:$8 sps:$4 sm:$0xff]   ;;  %v2298_v53 = vld [vmem:[%s2554_s24 + $0x94] ss:$8 sps:$4 sm:$0xff]   ;;  %v2300_v55 = vld [vmem:[%s2554_s24 + $0x90] ss:$8 sps:$4 sm:$0xff]  }
  0x26   : > { %919 = vmatpush1.bf16.msra.mxu0 %v2253_v5  ;;  %2181 = vmatpush1.bf16.msra.mxu1 %v2253_v5  ;;  %v2340_v54 = vld [vmem:[%s2554_s24 + $0x194] ss:$8 sps:$4 sm:$0xff]   ;;  %v2342_v56 = vld [vmem:[%s2554_s24 + $0x190] ss:$8 sps:$4 sm:$0xff]   ;;  %v2304_v57 = vld [vmem:[%s2554_s24 + $0xa4] ss:$8 sps:$4 sm:$0xff]  }
  0x27   : > { %920 = vmatprep.subr.bf16.mxu0 %v2440_v1  ;;  %2166 = vmatprep.subr.bf16.mxu1 %v2440_v1  ;;  %v2343_v58 = vld [vmem:[%s2554_s24 + $0x1a4] ss:$8 sps:$4 sm:$0xff]   ;;  %v2306_v59 = vld [vmem:[%s2554_s24 + $0xa0] ss:$8 sps:$4 sm:$0xff]   ;;  %v2310_v61 = vld [vmem:[%s2554_s24 + $0xb4] ss:$8 sps:$4 sm:$0xff]  }
  0x28   : > { %v2345_v60 = vld [vmem:[%s2554_s24 + $0x1a0] ss:$8 sps:$4 sm:$0xff]   ;;  %v2346_v62 = vld [vmem:[%s2554_s24 + $0x1b4] ss:$8 sps:$4 sm:$0xff]   ;;  %v2312_v63 = vld [vmem:[%s2554_s24 + $0xb0] ss:$8 sps:$4 sm:$0xff]  }
  0x29   : > { %v2348_v0 = vld [vmem:[%s2554_s24 + $0x1b0] ss:$8 sps:$4 sm:$0xff]   ;;  %v2349_v2 = vld [vmem:[%s2554_s24 + $0x1c4] ss:$8 sps:$4 sm:$0xff]   ;;  %v2318_v3 = vld [vmem:[%s2554_s24 + $0xc0] ss:$8 sps:$4 sm:$0xff]  }
  0x2a   : > { %921 = vmatpush1.bf16.msra.mxu0 %v2254_v7  ;;  %2182 = vmatpush1.bf16.msra.mxu1 %v2254_v7  ;;  %v2351_v4 = vld [vmem:[%s2554_s24 + $0x1c0] ss:$8 sps:$4 sm:$0xff]   ;;  %v2322_v5 = vld [vmem:[%s2554_s24 + $0xd4] ss:$8 sps:$4 sm:$0xff]   ;;  %v2324_v7 = vld [vmem:[%s2554_s24 + $0xd0] ss:$8 sps:$4 sm:$0xff]  }
  0x2b   : > { %922 = vmatprep.subr.bf16.mxu0 %v2440_v1  ;;  %2167 = vmatprep.subr.bf16.mxu1 %v2440_v1  ;;  %v2352_v6 = vld [vmem:[%s2554_s24 + $0x1d4] ss:$8 sps:$4 sm:$0xff]   ;;  %v2355_v10 = vld [vmem:[%s2554_s24 + $0x1e4] ss:$8 sps:$4 sm:$0xff]  }
  0x2e   : > { %923 = vmatpush1.bf16.msra.mxu0 %v2255_v8  ;;  %2183 = vmatpush1.bf16.msra.mxu1 %v2255_v8  ;;  %v2354_v8 = vld [vmem:[%s2554_s24 + $0x1d0] ss:$8 sps:$4 sm:$0xff]  }
  0x2f   : > { %924 = vmatprep.subr.bf16.mxu0 %v2440_v1  ;;  %2168 = vmatprep.subr.bf16.mxu1 %v2440_v1 }
  0x32   : > { %925 = vmatpush1.bf16.msra.mxu0 %v2256_v9  ;;  %2184 = vmatpush1.bf16.msra.mxu1 %v2256_v9  ;;  %v2328_v9 = vld [vmem:[%s2554_s24 + $0xe4] ss:$8 sps:$4 sm:$0xff]  }
  0x33   : > { %926 = vmatprep.subr.bf16.mxu0 %v2440_v1  ;;  %2169 = vmatprep.subr.bf16.mxu1 %v2440_v1 }
  0x36   : > { %927 = vmatpush2.bf16.msra.mxu0 %v2257_v11  ;;  %2185 = vmatpush2.bf16.msra.mxu1 %v2257_v11  ;;  %v2330_v11 = vld [vmem:[%s2554_s24 + $0xe0] ss:$8 sps:$4 sm:$0xff]  }
  0x37   : > { %928 = vmatprep.subr.bf16.mxu0 %v2440_v1  ;;  %2170 = vmatprep.subr.bf16.mxu1 %v2440_v1 }
  0x3a   : > { %929 = vmatpush2.bf16.msra.mxu0 %v2258_v12  ;;  %2186 = vmatpush2.bf16.msra.mxu1 %v2258_v12  ;;  %v2357_v12 = vld [vmem:[%s2554_s24 + $0x1e0] ss:$8 sps:$4 sm:$0xff]  }
  0x3b   : > { %930 = vmatprep.subr.bf16.mxu0 %v2440_v1  ;;  %2171 = vmatprep.subr.bf16.mxu1 %v2440_v1 }
  0x3e   : > { %931 = vmatpush2.bf16.msra.mxu0 %v2259_v13  ;;  %2187 = vmatpush2.bf16.msra.mxu1 %v2259_v13  ;;  %v2334_v13 = vld [vmem:[%s2554_s24 + $0xf4] ss:$8 sps:$4 sm:$0xff]  }
  0x3f   : > { %932 = vmatprep.subr.bf16.mxu0 %v2440_v1  ;;  %2172 = vmatprep.subr.bf16.mxu1 %v2440_v1 }
  0x42   : > { %933 = vmatpush2.bf16.msra.mxu0 %v2260_v14  ;;  %2188 = vmatpush2.bf16.msra.mxu1 %v2260_v14  ;;  %v2358_v14 = vld [vmem:[%s2554_s24 + $0x1f4] ss:$8 sps:$4 sm:$0xff]  }
  0x43   : > { %934 = vmatprep.subr.bf16.mxu0 %v2440_v1  ;;  %2173 = vmatprep.subr.bf16.mxu1 %v2440_v1 }
  0x46   : > { %935 = vmatpush2.bf16.msra.mxu0 %v2261_v15  ;;  %2189 = vmatpush2.bf16.msra.mxu1 %v2261_v15  ;;  %v2336_v15 = vld [vmem:[%s2554_s24 + $0xf0] ss:$8 sps:$4 sm:$0xff]  }
  0x47   : > { %936 = vmatprep.subr.bf16.mxu0 %v2440_v1  ;;  %2174 = vmatprep.subr.bf16.mxu1 %v2440_v1 }
  0x4a   : > { %937 = vmatpush2.bf16.msra.mxu0 %v2262_v16  ;;  %2190 = vmatpush2.bf16.msra.mxu1 %v2262_v16  ;;  %v2360_v16 = vld [vmem:[%s2554_s24 + $0x1f0] ss:$8 sps:$4 sm:$0xff]  }
  0x4b   : > { %938 = vmatprep.subr.bf16.mxu0 %v2440_v1  ;;  %2175 = vmatprep.subr.bf16.mxu1 %v2440_v1 }
  0x4e   : > { %939 = vmatpush2.bf16.msra.mxu0 %v2263_v17  ;;  %2191 = vmatpush2.bf16.msra.mxu1 %v2263_v17  ;;  %v2680_v17 = vld [vmem:[%s3277_s2] ss:$0 sm:$0xff] }
  0x4f   : > { %940 = vmatprep.subr.bf16.mxu0 %v2440_v1  ;;  %2176 = vmatprep.subr.bf16.mxu1 %v2440_v1  ;;  %v2316_v1 = vld [vmem:[%s2554_s24 + $0xc4] ss:$8 sps:$4 sm:$0xff]   ;;  %s2689_s24 = scalar_lea.vmem %s3278_s3, %s2160_s12 }
  0x52   : > { %941 = vmatpush2.bf16.msra.mxu0 %v2264_v18  ;;  %2192 = vmatpush2.bf16.msra.mxu1 %v2264_v18 }
  0x55   : > { %943 = vmatmul.mubr.bf16.vlgmr.msra.gmra.mxu0 %v2265_v19  ;;  %1071 = vmatmul.mubr.bf16.vlgmr.msra.gmra.mxu1 %v2289_v20 }
  0x56   : > { %950 = vmatprep.mubr.bf16.mxu0 %v2268_v21  ;;  %1078 = vmatprep.mubr.bf16.mxu1 %v2295_v22 }
  0x5d   : > { %951 = vmatmul.mubr.bf16.gmra.mxu0 %v2270_v23  ;;  %1079 = vmatmul.mubr.bf16.gmra.mxu1 %v2297_v24 }
  0x5e   : > { %958 = vmatprep.mubr.bf16.mxu0 %v2271_v25  ;;  %1086 = vmatprep.mubr.bf16.mxu1 %v2301_v26 }
  0x65   : > { %959 = vmatmul.mubr.bf16.gmra.mxu0 %v2273_v27  ;;  %1087 = vmatmul.mubr.bf16.gmra.mxu1 %v2303_v28 }
  0x66   : > { %966 = vmatprep.mubr.bf16.mxu0 %v2274_v29  ;;  %1094 = vmatprep.mubr.bf16.mxu1 %v2307_v30 }
  0x6d   : > { %967 = vmatmul.mubr.bf16.gmra.mxu0 %v2276_v31  ;;  %1095 = vmatmul.mubr.bf16.gmra.mxu1 %v2309_v32 }
  0x6e   : > { %974 = vmatprep.mubr.bf16.mxu0 %v2277_v33  ;;  %1102 = vmatprep.mubr.bf16.mxu1 %v2313_v34 }
  0x75   : > { %975 = vmatmul.mubr.bf16.gmra.mxu0 %v2279_v35  ;;  %1103 = vmatmul.mubr.bf16.gmra.mxu1 %v2315_v36 }
  0x76   : > { %982 = vmatprep.mubr.bf16.mxu0 %v2280_v37  ;;  %1110 = vmatprep.mubr.bf16.mxu1 %v2319_v38 }
  0x7d   : > { %983 = vmatmul.mubr.bf16.gmra.mxu0 %v2282_v39  ;;  %1111 = vmatmul.mubr.bf16.gmra.mxu1 %v2321_v40 }
  0x7e   : > { %990 = vmatprep.mubr.bf16.mxu0 %v2283_v41  ;;  %1118 = vmatprep.mubr.bf16.mxu1 %v2325_v42 }
  0x85   : > { %991 = vmatmul.mubr.bf16.gmra.mxu0 %v2285_v43  ;;  %1119 = vmatmul.mubr.bf16.gmra.mxu1 %v2327_v44 }
  0x86   : > { %998 = vmatprep.mubr.bf16.mxu0 %v2286_v45  ;;  %1126 = vmatprep.mubr.bf16.mxu1 %v2331_v46 }
  0x8d   : > { %999 = vmatmul.mubr.bf16.gmra.mxu0 %v2288_v47  ;;  %1127 = vmatmul.mubr.bf16.gmra.mxu1 %v2333_v48 }
  0x8e   : > { %1006 = vmatprep.mubr.bf16.mxu0 %v2292_v49  ;;  %1134 = vmatprep.mubr.bf16.mxu1 %v2337_v50 }
  0x95   : > { %1007 = vmatmul.mubr.bf16.gmra.mxu0 %v2294_v51  ;;  %1135 = vmatmul.mubr.bf16.gmra.mxu1 %v2339_v52 }
  0x96   : > { %1014 = vmatprep.mubr.bf16.mxu0 %v2298_v53  ;;  %1142 = vmatprep.mubr.bf16.mxu1 %v2340_v54 }
  0x9d   : > { %1015 = vmatmul.mubr.bf16.gmra.mxu0 %v2300_v55  ;;  %1143 = vmatmul.mubr.bf16.gmra.mxu1 %v2342_v56 }
  0x9e   : > { %1022 = vmatprep.mubr.bf16.mxu0 %v2304_v57  ;;  %1150 = vmatprep.mubr.bf16.mxu1 %v2343_v58 }
  0xa5   : > { %1023 = vmatmul.mubr.bf16.gmra.mxu0 %v2306_v59  ;;  %1151 = vmatmul.mubr.bf16.gmra.mxu1 %v2345_v60 }
  0xa6   : > { %1030 = vmatprep.mubr.bf16.mxu0 %v2310_v61  ;;  %1158 = vmatprep.mubr.bf16.mxu1 %v2346_v62 }
  0xad   : > { %1031 = vmatmul.mubr.bf16.gmra.mxu0 %v2312_v63  ;;  %1159 = vmatmul.mubr.bf16.gmra.mxu1 %v2348_v0 }
  0xae   : > { %1038 = vmatprep.mubr.bf16.mxu0 %v2316_v1  ;;  %1166 = vmatprep.mubr.bf16.mxu1 %v2349_v2 }
  0xb5   : > { %1039 = vmatmul.mubr.bf16.gmra.mxu0 %v2318_v3  ;;  %1167 = vmatmul.mubr.bf16.gmra.mxu1 %v2351_v4 }
  0xb6   : > { %1046 = vmatprep.mubr.bf16.mxu0 %v2322_v5  ;;  %1174 = vmatprep.mubr.bf16.mxu1 %v2352_v6 }
  0xbd   : > { %1047 = vmatmul.mubr.bf16.gmra.mxu0 %v2324_v7  ;;  %1175 = vmatmul.mubr.bf16.gmra.mxu1 %v2354_v8 }
  0xbe   : > { %1054 = vmatprep.mubr.bf16.mxu0 %v2328_v9  ;;  %1182 = vmatprep.mubr.bf16.mxu1 %v2355_v10 }
  0xc5   : > { %1055 = vmatmul.mubr.bf16.gmra.mxu0 %v2330_v11  ;;  %1183 = vmatmul.mubr.bf16.gmra.mxu1 %v2357_v12 }
  0xc6   : > { %1062 = vmatprep.mubr.bf16.mxu0 %v2334_v13  ;;  %1190 = vmatprep.mubr.bf16.mxu1 %v2358_v14 }
  0xcd   : > { %1063 = vmatmul.mubr.bf16.gmra.mxu0 %v2336_v15  ;;  %1191 = vmatmul.mubr.bf16.gmra.mxu1 %v2360_v16 }
 0x115   : > { %v944_v18 = vpop.f32.mrf.mxu0  ;;  %v1072_v19 = vpop.f32.mrf.mxu1 }
 0x116   : > { %v1401_v20 = vadd.f32 %v2680_v17, %v944_v18  ;;  %v1433_v21 = vadd.f32 %v2680_v17, %v1072_v19 }
 0x117   : > { %v946_v22 = vpop.f32.mrf.mxu0  ;;  %v1074_v23 = vpop.f32.mrf.mxu1 }
 0x118   : > { %vm1465_vm1 = vcmp.gt.f32.partialorder %v1401_v20, 0.0  ;;  %v1529_v24 = vmul.f32 0.2, %v1401_v20  ;;  %vm1497_vm2 = vcmp.gt.f32.partialorder %v1433_v21, 0.0  ;;  %v1561_v25 = vmul.f32 0.2, %v1433_v21 }
 0x119   : > { %v947_v26 = vpop.f32.mrf.mxu0  ;;  %v1075_v27 = vpop.f32.mrf.mxu1 }
 0x11a   : > { %v2691_v28 = vsel %vm1465_vm1, %v1401_v20, %v1529_v24  ;;  %v1402_v29 = vadd.f32 %v2680_v17, %v947_v26  ;;  %v2694_v30 = vsel %vm1497_vm2, %v1433_v21, %v1561_v25  ;;  %v1434_v31 = vadd.f32 %v2680_v17, %v1075_v27 }
 0x11b   : > { %1658 = vst.msk [vmem:[%s2689_s24] sm:$0xff] %vm1657_vm0, %v2691_v28  ;;  %v949_v32 = vpop.f32.mrf.mxu0  ;;  %1690 = vst.msk [vmem:[%s2689_s24 + $0x100] sm:$0xff] %vm1657_vm0, %v2694_v30  ;;  %v1077_v33 = vpop.f32.mrf.mxu1 }
 0x11c   : > { %vm1466_vm3 = vcmp.gt.f32.partialorder %v1402_v29, 0.0  ;;  %v1530_v34 = vmul.f32 0.2, %v1402_v29  ;;  %vm1498_vm4 = vcmp.gt.f32.partialorder %v1434_v31, 0.0  ;;  %v1562_v35 = vmul.f32 0.2, %v1434_v31 }
 0x11d   : > { %v952_v36 = vpop.f32.mrf.mxu0  ;;  %v1080_v37 = vpop.f32.mrf.mxu1 }
 0x11e   : > { %v2703_v38 = vsel %vm1466_vm3, %v1402_v29, %v1530_v34  ;;  %v1403_v39 = vadd.f32 %v2680_v17, %v952_v36  ;;  %v2706_v40 = vsel %vm1498_vm4, %v1434_v31, %v1562_v35  ;;  %v1435_v41 = vadd.f32 %v2680_v17, %v1080_v37 }
 0x11f   : > { %1659 = vst.msk [vmem:[%s2689_s24 + $0x8] sm:$0xff] %vm1657_vm0, %v2703_v38  ;;  %v954_v42 = vpop.f32.mrf.mxu0  ;;  %1691 = vst.msk [vmem:[%s2689_s24 + $0x108] sm:$0xff] %vm1657_vm0, %v2706_v40  ;;  %v1082_v43 = vpop.f32.mrf.mxu1 }
 0x120   : > { %vm1467_vm5 = vcmp.gt.f32.partialorder %v1403_v39, 0.0  ;;  %v1531_v44 = vmul.f32 0.2, %v1403_v39  ;;  %vm1499_vm6 = vcmp.gt.f32.partialorder %v1435_v41, 0.0  ;;  %v1563_v45 = vmul.f32 0.2, %v1435_v41 }
 0x121   : > { %v955_v46 = vpop.f32.mrf.mxu0  ;;  %v1083_v47 = vpop.f32.mrf.mxu1 }
 0x122   : > { %v2715_v48 = vsel %vm1467_vm5, %v1403_v39, %v1531_v44  ;;  %v1404_v49 = vadd.f32 %v2680_v17, %v955_v46  ;;  %v2718_v50 = vsel %vm1499_vm6, %v1435_v41, %v1563_v45  ;;  %v1436_v51 = vadd.f32 %v2680_v17, %v1083_v47 }
 0x123   : > { %1660 = vst.msk [vmem:[%s2689_s24 + $0x10] sm:$0xff] %vm1657_vm0, %v2715_v48  ;;  %v957_v52 = vpop.f32.mrf.mxu0  ;;  %1692 = vst.msk [vmem:[%s2689_s24 + $0x110] sm:$0xff] %vm1657_vm0, %v2718_v50  ;;  %v1085_v53 = vpop.f32.mrf.mxu1 }
 0x124   : > { %vm1468_vm7 = vcmp.gt.f32.partialorder %v1404_v49, 0.0  ;;  %v1532_v54 = vmul.f32 0.2, %v1404_v49  ;;  %vm1500_vm8 = vcmp.gt.f32.partialorder %v1436_v51, 0.0  ;;  %v1564_v55 = vmul.f32 0.2, %v1436_v51 }
 0x125   : > { %v960_v56 = vpop.f32.mrf.mxu0  ;;  %v1088_v57 = vpop.f32.mrf.mxu1 }
 0x126   : > { %v2727_v58 = vsel %vm1468_vm7, %v1404_v49, %v1532_v54  ;;  %v1405_v59 = vadd.f32 %v2680_v17, %v960_v56  ;;  %v2730_v60 = vsel %vm1500_vm8, %v1436_v51, %v1564_v55  ;;  %v1437_v61 = vadd.f32 %v2680_v17, %v1088_v57 }
 0x127   : > { %1661 = vst.msk [vmem:[%s2689_s24 + $0x18] sm:$0xff] %vm1657_vm0, %v2727_v58  ;;  %v962_v62 = vpop.f32.mrf.mxu0  ;;  %1693 = vst.msk [vmem:[%s2689_s24 + $0x118] sm:$0xff] %vm1657_vm0, %v2730_v60  ;;  %v1090_v63 = vpop.f32.mrf.mxu1 }
 0x128   : > { %vm1469_vm9 = vcmp.gt.f32.partialorder %v1405_v59, 0.0  ;;  %v1533_v0 = vmul.f32 0.2, %v1405_v59  ;;  %vm1501_vm10 = vcmp.gt.f32.partialorder %v1437_v61, 0.0  ;;  %v1565_v1 = vmul.f32 0.2, %v1437_v61 }
 0x129   : > { %v963_v2 = vpop.f32.mrf.mxu0  ;;  %v1091_v3 = vpop.f32.mrf.mxu1 }
 0x12a   : > { %v2739_v4 = vsel %vm1469_vm9, %v1405_v59, %v1533_v0  ;;  %v1406_v5 = vadd.f32 %v2680_v17, %v963_v2  ;;  %v2742_v6 = vsel %vm1501_vm10, %v1437_v61, %v1565_v1  ;;  %v1438_v7 = vadd.f32 %v2680_v17, %v1091_v3 }
 0x12b   : > { %1662 = vst.msk [vmem:[%s2689_s24 + $0x20] sm:$0xff] %vm1657_vm0, %v2739_v4  ;;  %v965_v8 = vpop.f32.mrf.mxu0  ;;  %1694 = vst.msk [vmem:[%s2689_s24 + $0x120] sm:$0xff] %vm1657_vm0, %v2742_v6  ;;  %v1093_v9 = vpop.f32.mrf.mxu1 }
 0x12c   : > { %vm1470_vm11 = vcmp.gt.f32.partialorder %v1406_v5, 0.0  ;;  %v1534_v10 = vmul.f32 0.2, %v1406_v5  ;;  %vm1502_vm12 = vcmp.gt.f32.partialorder %v1438_v7, 0.0  ;;  %v1566_v11 = vmul.f32 0.2, %v1438_v7 }
 0x12d   : > { %v968_v12 = vpop.f32.mrf.mxu0  ;;  %v1096_v13 = vpop.f32.mrf.mxu1 }
 0x12e   : > { %v2751_v14 = vsel %vm1470_vm11, %v1406_v5, %v1534_v10  ;;  %v1407_v15 = vadd.f32 %v2680_v17, %v968_v12  ;;  %v2754_v16 = vsel %vm1502_vm12, %v1438_v7, %v1566_v11  ;;  %v1439_v18 = vadd.f32 %v2680_v17, %v1096_v13 }
 0x12f   : > { %1663 = vst.msk [vmem:[%s2689_s24 + $0x28] sm:$0xff] %vm1657_vm0, %v2751_v14  ;;  %v970_v19 = vpop.f32.mrf.mxu0  ;;  %1695 = vst.msk [vmem:[%s2689_s24 + $0x128] sm:$0xff] %vm1657_vm0, %v2754_v16  ;;  %v1098_v20 = vpop.f32.mrf.mxu1 }
 0x130   : > { %vm1471_vm13 = vcmp.gt.f32.partialorder %v1407_v15, 0.0  ;;  %v1535_v21 = vmul.f32 0.2, %v1407_v15  ;;  %vm1503_vm14 = vcmp.gt.f32.partialorder %v1439_v18, 0.0  ;;  %v1567_v22 = vmul.f32 0.2, %v1439_v18 }
 0x131   : > { %v971_v23 = vpop.f32.mrf.mxu0  ;;  %v1099_v24 = vpop.f32.mrf.mxu1 }
 0x132   : > { %v2763_v25 = vsel %vm1471_vm13, %v1407_v15, %v1535_v21  ;;  %v1408_v26 = vadd.f32 %v2680_v17, %v971_v23  ;;  %v2766_v27 = vsel %vm1503_vm14, %v1439_v18, %v1567_v22  ;;  %v1440_v29 = vadd.f32 %v2680_v17, %v1099_v24 }
 0x133   : > { %1664 = vst.msk [vmem:[%s2689_s24 + $0x30] sm:$0xff] %vm1657_vm0, %v2763_v25  ;;  %v973_v31 = vpop.f32.mrf.mxu0  ;;  %1696 = vst.msk [vmem:[%s2689_s24 + $0x130] sm:$0xff] %vm1657_vm0, %v2766_v27  ;;  %v1101_v32 = vpop.f32.mrf.mxu1 }
 0x134   : > { %vm1472_vm15 = vcmp.gt.f32.partialorder %v1408_v26, 0.0  ;;  %v1536_v33 = vmul.f32 0.2, %v1408_v26  ;;  %vm1504_vm1 = vcmp.gt.f32.partialorder %v1440_v29, 0.0  ;;  %v1568_v34 = vmul.f32 0.2, %v1440_v29 }
 0x135   : > { %v976_v35 = vpop.f32.mrf.mxu0  ;;  %v1104_v36 = vpop.f32.mrf.mxu1 }
 0x136   : > { %v2775_v37 = vsel %vm1472_vm15, %v1408_v26, %v1536_v33  ;;  %v1409_v39 = vadd.f32 %v2680_v17, %v976_v35  ;;  %v2778_v41 = vsel %vm1504_vm1, %v1440_v29, %v1568_v34  ;;  %v1441_v42 = vadd.f32 %v2680_v17, %v1104_v36 }
 0x137   : > { %1665 = vst.msk [vmem:[%s2689_s24 + $0x38] sm:$0xff] %vm1657_vm0, %v2775_v37  ;;  %v978_v43 = vpop.f32.mrf.mxu0  ;;  %1697 = vst.msk [vmem:[%s2689_s24 + $0x138] sm:$0xff] %vm1657_vm0, %v2778_v41  ;;  %v1106_v44 = vpop.f32.mrf.mxu1 }
 0x138   : > { %vm1473_vm2 = vcmp.gt.f32.partialorder %v1409_v39, 0.0  ;;  %v1537_v45 = vmul.f32 0.2, %v1409_v39  ;;  %vm1505_vm3 = vcmp.gt.f32.partialorder %v1441_v42, 0.0  ;;  %v1569_v46 = vmul.f32 0.2, %v1441_v42 }
 0x139   : > { %v979_v47 = vpop.f32.mrf.mxu0  ;;  %v1107_v49 = vpop.f32.mrf.mxu1 }
 0x13a   : > { %v2787_v51 = vsel %vm1473_vm2, %v1409_v39, %v1537_v45  ;;  %v1410_v52 = vadd.f32 %v2680_v17, %v979_v47  ;;  %v2790_v53 = vsel %vm1505_vm3, %v1441_v42, %v1569_v46  ;;  %v1442_v54 = vadd.f32 %v2680_v17, %v1107_v49 }
 0x13b   : > { %1666 = vst.msk [vmem:[%s2689_s24 + $0x40] sm:$0xff] %vm1657_vm0, %v2787_v51  ;;  %v981_v55 = vpop.f32.mrf.mxu0  ;;  %1698 = vst.msk [vmem:[%s2689_s24 + $0x140] sm:$0xff] %vm1657_vm0, %v2790_v53  ;;  %v1109_v56 = vpop.f32.mrf.mxu1 }
 0x13c   : > { %vm1474_vm4 = vcmp.gt.f32.partialorder %v1410_v52, 0.0  ;;  %v1538_v57 = vmul.f32 0.2, %v1410_v52  ;;  %vm1506_vm5 = vcmp.gt.f32.partialorder %v1442_v54, 0.0  ;;  %v1570_v59 = vmul.f32 0.2, %v1442_v54 }
 0x13d   : > { %v984_v61 = vpop.f32.mrf.mxu0  ;;  %v1112_v62 = vpop.f32.mrf.mxu1 }
 0x13e   : > { %v2799_v63 = vsel %vm1474_vm4, %v1410_v52, %v1538_v57  ;;  %v1411_v0 = vadd.f32 %v2680_v17, %v984_v61  ;;  %v2802_v1 = vsel %vm1506_vm5, %v1442_v54, %v1570_v59  ;;  %v1443_v2 = vadd.f32 %v2680_v17, %v1112_v62 }
 0x13f   : > { %1667 = vst.msk [vmem:[%s2689_s24 + $0x48] sm:$0xff] %vm1657_vm0, %v2799_v63  ;;  %v986_v3 = vpop.f32.mrf.mxu0  ;;  %1699 = vst.msk [vmem:[%s2689_s24 + $0x148] sm:$0xff] %vm1657_vm0, %v2802_v1  ;;  %v1114_v5 = vpop.f32.mrf.mxu1 }
 0x140   : > { %vm1475_vm6 = vcmp.gt.f32.partialorder %v1411_v0, 0.0  ;;  %v1539_v7 = vmul.f32 0.2, %v1411_v0  ;;  %vm1507_vm7 = vcmp.gt.f32.partialorder %v1443_v2, 0.0  ;;  %v1571_v8 = vmul.f32 0.2, %v1443_v2 }
 0x141   : > { %v987_v9 = vpop.f32.mrf.mxu0  ;;  %v1115_v10 = vpop.f32.mrf.mxu1 }
 0x142   : > { %v2811_v11 = vsel %vm1475_vm6, %v1411_v0, %v1539_v7  ;;  %v1412_v12 = vadd.f32 %v2680_v17, %v987_v9  ;;  %v2814_v13 = vsel %vm1507_vm7, %v1443_v2, %v1571_v8  ;;  %v1444_v15 = vadd.f32 %v2680_v17, %v1115_v10 }
 0x143   : > { %1668 = vst.msk [vmem:[%s2689_s24 + $0x50] sm:$0xff] %vm1657_vm0, %v2811_v11  ;;  %v989_v18 = vpop.f32.mrf.mxu0  ;;  %1700 = vst.msk [vmem:[%s2689_s24 + $0x150] sm:$0xff] %vm1657_vm0, %v2814_v13  ;;  %v1117_v19 = vpop.f32.mrf.mxu1 }
 0x144   : > { %vm1476_vm8 = vcmp.gt.f32.partialorder %v1412_v12, 0.0  ;;  %v1540_v20 = vmul.f32 0.2, %v1412_v12  ;;  %vm1508_vm9 = vcmp.gt.f32.partialorder %v1444_v15, 0.0  ;;  %v1572_v21 = vmul.f32 0.2, %v1444_v15 }
 0x145   : > { %v992_v22 = vpop.f32.mrf.mxu0  ;;  %v1120_v23 = vpop.f32.mrf.mxu1 }
 0x146   : > { %v2823_v24 = vsel %vm1476_vm8, %v1412_v12, %v1540_v20  ;;  %v1413_v26 = vadd.f32 %v2680_v17, %v992_v22  ;;  %v2826_v29 = vsel %vm1508_vm9, %v1444_v15, %v1572_v21  ;;  %v1445_v31 = vadd.f32 %v2680_v17, %v1120_v23 }
 0x147   : > { %1669 = vst.msk [vmem:[%s2689_s24 + $0x58] sm:$0xff] %vm1657_vm0, %v2823_v24  ;;  %v994_v32 = vpop.f32.mrf.mxu0  ;;  %1701 = vst.msk [vmem:[%s2689_s24 + $0x158] sm:$0xff] %vm1657_vm0, %v2826_v29  ;;  %v1122_v33 = vpop.f32.mrf.mxu1 }
 0x148   : > { %vm1477_vm10 = vcmp.gt.f32.partialorder %v1413_v26, 0.0  ;;  %v1541_v34 = vmul.f32 0.2, %v1413_v26  ;;  %vm1509_vm11 = vcmp.gt.f32.partialorder %v1445_v31, 0.0  ;;  %v1573_v35 = vmul.f32 0.2, %v1445_v31 }
 0x149   : > { %v995_v36 = vpop.f32.mrf.mxu0  ;;  %v1123_v39 = vpop.f32.mrf.mxu1 }
 0x14a   : > { %v2835_v42 = vsel %vm1477_vm10, %v1413_v26, %v1541_v34  ;;  %v1414_v43 = vadd.f32 %v2680_v17, %v995_v36  ;;  %v2838_v44 = vsel %vm1509_vm11, %v1445_v31, %v1573_v35  ;;  %v1446_v45 = vadd.f32 %v2680_v17, %v1123_v39 }
 0x14b   : > { %1670 = vst.msk [vmem:[%s2689_s24 + $0x60] sm:$0xff] %vm1657_vm0, %v2835_v42  ;;  %v997_v46 = vpop.f32.mrf.mxu0  ;;  %1702 = vst.msk [vmem:[%s2689_s24 + $0x160] sm:$0xff] %vm1657_vm0, %v2838_v44  ;;  %v1125_v47 = vpop.f32.mrf.mxu1  ;;  %v1792_v39 = vmul.f32 %v2703_v38, %v2703_v38 }
 0x14c   : > { %vm1478_vm12 = vcmp.gt.f32.partialorder %v1414_v43, 0.0  ;;  %v1542_v49 = vmul.f32 0.2, %v1414_v43  ;;  %vm1510_vm13 = vcmp.gt.f32.partialorder %v1446_v45, 0.0  ;;  %v1574_v52 = vmul.f32 0.2, %v1446_v45 }
 0x14d   : > { %v1000_v54 = vpop.f32.mrf.mxu0  ;;  %v1128_v55 = vpop.f32.mrf.mxu1 }
 0x14e   : > { %v2847_v56 = vsel %vm1478_vm12, %v1414_v43, %v1542_v49  ;;  %v1415_v57 = vadd.f32 %v2680_v17, %v1000_v54  ;;  %v2850_v59 = vsel %vm1510_vm13, %v1446_v45, %v1574_v52  ;;  %v1447_v61 = vadd.f32 %v2680_v17, %v1128_v55 }
 0x14f   : > { %1671 = vst.msk [vmem:[%s2689_s24 + $0x68] sm:$0xff] %vm1657_vm0, %v2847_v56  ;;  %v1002_v62 = vpop.f32.mrf.mxu0  ;;  %1703 = vst.msk [vmem:[%s2689_s24 + $0x168] sm:$0xff] %vm1657_vm0, %v2850_v59  ;;  %v1130_v0 = vpop.f32.mrf.mxu1  ;;  %v1791_v54 = vmul.f32 %v2691_v28, %v2691_v28  ;;  %v1722_v55 = vadd.f32 %v2703_v38, %v2691_v28  ;;  %v1794_v38 = vmul.f32 %v2727_v58, %v2727_v58 }
 0x150   : > { %vm1479_vm14 = vcmp.gt.f32.partialorder %v1415_v57, 0.0  ;;  %v1543_v2 = vmul.f32 0.2, %v1415_v57  ;;  %vm1511_vm15 = vcmp.gt.f32.partialorder %v1447_v61, 0.0  ;;  %v1575_v3 = vmul.f32 0.2, %v1447_v61 }
 0x151   : > { %v1003_v5 = vpop.f32.mrf.mxu0  ;;  %v1131_v7 = vpop.f32.mrf.mxu1  ;;  %v1723_v28 = vadd.f32 %v1722_v55, %v2715_v48  ;;  %v1797_v55 = vmul.f32 %v2763_v25, %v2763_v25 }
 0x152   : > { %v2859_v8 = vsel %vm1479_vm14, %v1415_v57, %v1543_v2  ;;  %v1416_v9 = vadd.f32 %v2680_v17, %v1003_v5  ;;  %v2862_v10 = vsel %vm1511_vm15, %v1447_v61, %v1575_v3  ;;  %v1448_v12 = vadd.f32 %v2680_v17, %v1131_v7 }
 0x153   : > { %1672 = vst.msk [vmem:[%s2689_s24 + $0x70] sm:$0xff] %vm1657_vm0, %v2859_v8  ;;  %v1005_v15 = vpop.f32.mrf.mxu0  ;;  %1704 = vst.msk [vmem:[%s2689_s24 + $0x170] sm:$0xff] %vm1657_vm0, %v2862_v10  ;;  %v1133_v18 = vpop.f32.mrf.mxu1  ;;  %v1793_v57 = vmul.f32 %v2715_v48, %v2715_v48  ;;  %v1855_v3 = vadd.f32 %v1792_v39, %v1791_v54 }
 0x154   : > { %vm1480_vm1 = vcmp.gt.f32.partialorder %v1416_v9, 0.0  ;;  %v1544_v19 = vmul.f32 0.2, %v1416_v9  ;;  %vm1512_vm2 = vcmp.gt.f32.partialorder %v1448_v12, 0.0  ;;  %v1576_v20 = vmul.f32 0.2, %v1448_v12 }
 0x155   : > { %v1008_v21 = vpop.f32.mrf.mxu0  ;;  %v1136_v22 = vpop.f32.mrf.mxu1 }
 0x156   : > { %v2871_v23 = vsel %vm1480_vm1, %v1416_v9, %v1544_v19  ;;  %v1417_v26 = vadd.f32 %v2680_v17, %v1008_v21  ;;  %v2874_v31 = vsel %vm1512_vm2, %v1448_v12, %v1576_v20  ;;  %v1449_v32 = vadd.f32 %v2680_v17, %v1136_v22 }
 0x157   : > { %1673 = vst.msk [vmem:[%s2689_s24 + $0x78] sm:$0xff] %vm1657_vm0, %v2871_v23  ;;  %v1010_v33 = vpop.f32.mrf.mxu0  ;;  %1705 = vst.msk [vmem:[%s2689_s24 + $0x178] sm:$0xff] %vm1657_vm0, %v2874_v31  ;;  %v1138_v34 = vpop.f32.mrf.mxu1  ;;  %v1856_v19 = vadd.f32 %v1855_v3, %v1793_v57  ;;  %v1724_v20 = vadd.f32 %v1723_v28, %v2727_v58  ;;  %v1795_v21 = vmul.f32 %v2739_v4, %v2739_v4 }
 0x158   : > { %vm1481_vm3 = vcmp.gt.f32.partialorder %v1417_v26, 0.0  ;;  %v1545_v35 = vmul.f32 0.2, %v1417_v26  ;;  %vm1513_vm4 = vcmp.gt.f32.partialorder %v1449_v32, 0.0  ;;  %v1577_v36 = vmul.f32 0.2, %v1449_v32 }
 0x159   : > { %v1011_v43 = vpop.f32.mrf.mxu0  ;;  %v1139_v45 = vpop.f32.mrf.mxu1  ;;  %v1857_v33 = vadd.f32 %v1856_v19, %v1794_v38  ;;  %v1725_v58 = vadd.f32 %v1724_v20, %v2739_v4  ;;  %v1796_v34 = vmul.f32 %v2751_v14, %v2751_v14  ;;  %v1799_v20 = vmul.f32 %v2787_v51, %v2787_v51 }
 0x15a   : > { %v2885_v46 = vsel %vm1481_vm3, %v1417_v26, %v1545_v35  ;;  %v1418_v47 = vadd.f32 %v2680_v17, %v1011_v43  ;;  %v2888_v49 = vsel %vm1513_vm4, %v1449_v32, %v1577_v36  ;;  %v1450_v52 = vadd.f32 %v2680_v17, %v1139_v45 }
 0x15b   : > { %1674 = vst.msk [vmem:[%s2689_s24 + $0x80] sm:$0xff] %vm1657_vm0, %v2885_v46  ;;  %v1013_v61 = vpop.f32.mrf.mxu0  ;;  %1706 = vst.msk [vmem:[%s2689_s24 + $0x180] sm:$0xff] %vm1657_vm0, %v2888_v49  ;;  %v1141_v62 = vpop.f32.mrf.mxu1  ;;  %v1726_v54 = vadd.f32 %v1725_v58, %v2751_v14 }
 0x15c   : > { %vm1482_vm5 = vcmp.gt.f32.partialorder %v1418_v47, 0.0  ;;  %v1546_v0 = vmul.f32 0.2, %v1418_v47  ;;  %vm1514_vm6 = vcmp.gt.f32.partialorder %v1450_v52, 0.0  ;;  %v1578_v2 = vmul.f32 0.2, %v1450_v52 }
 0x15d   : > { %v1016_v5 = vpop.f32.mrf.mxu0  ;;  %v1144_v7 = vpop.f32.mrf.mxu1  ;;  %v1727_v14 = vadd.f32 %v1726_v54, %v2763_v25  ;;  %v1801_v54 = vmul.f32 %v2811_v11, %v2811_v11 }
 0x15e   : > { %v2906_v9 = vsel %vm1482_vm5, %v1418_v47, %v1546_v0  ;;  %v1419_v12 = vadd.f32 %v2680_v17, %v1016_v5  ;;  %v2909_v15 = vsel %vm1514_vm6, %v1450_v52, %v1578_v2  ;;  %v1451_v18 = vadd.f32 %v2680_v17, %v1144_v7 }
 0x15f   : > { %1675 = vst.msk [vmem:[%s2689_s24 + $0x88] sm:$0xff] %vm1657_vm0, %v2906_v9  ;;  %v1018_v48 = vpop.f32.mrf.mxu0  ;;  %1707 = vst.msk [vmem:[%s2689_s24 + $0x188] sm:$0xff] %vm1657_vm0, %v2909_v15  ;;  %v1146_v22 = vpop.f32.mrf.mxu1  ;;  %v1858_v52 = vadd.f32 %v1857_v33, %v1795_v21  ;;  %v1798_v2 = vmul.f32 %v2775_v37, %v2775_v37  ;;  %v1728_v19 = vadd.f32 %v1727_v14, %v2775_v37 }
 0x160   : > { %vm1483_vm7 = vcmp.gt.f32.partialorder %v1419_v12, 0.0  ;;  %v1547_v26 = vmul.f32 0.2, %v1419_v12  ;;  %vm1515_vm8 = vcmp.gt.f32.partialorder %v1451_v18, 0.0  ;;  %v1579_v32 = vmul.f32 0.2, %v1451_v18 }
 0x161   : > { %v1019_v35 = vpop.f32.mrf.mxu0  ;;  %v1147_v36 = vpop.f32.mrf.mxu1  ;;  %v1859_v0 = vadd.f32 %v1858_v52, %v1796_v34  ;;  %v1729_v37 = vadd.f32 %v1728_v19, %v2787_v51  ;;  %v1803_v19 = vmul.f32 %v2835_v42, %v2835_v42 }
 0x162   : > { %v2924_v39 = vsel %vm1483_vm7, %v1419_v12, %v1547_v26  ;;  %v1420_v43 = vadd.f32 %v2680_v17, %v1019_v35  ;;  %v2927_v45 = vsel %vm1515_vm8, %v1451_v18, %v1579_v32  ;;  %v1452_v47 = vadd.f32 %v2680_v17, %v1147_v36 }
 0x163   : > { %1676 = vst.msk [vmem:[%s2689_s24 + $0x90] sm:$0xff] %vm1657_vm0, %v2924_v39  ;;  %v1021_v4 = vpop.f32.mrf.mxu0  ;;  %1708 = vst.msk [vmem:[%s2689_s24 + $0x190] sm:$0xff] %vm1657_vm0, %v2927_v45  ;;  %v1149_v57 = vpop.f32.mrf.mxu1  ;;  %v1860_v18 = vadd.f32 %v1859_v0, %v1797_v55  ;;  %v1800_v32 = vmul.f32 %v2799_v63, %v2799_v63  ;;  %v1730_v52 = vadd.f32 %v1729_v37, %v2799_v63 }
 0x164   : > { %vm1484_vm9 = vcmp.gt.f32.partialorder %v1420_v43, 0.0  ;;  %v1548_v61 = vmul.f32 0.2, %v1420_v43  ;;  %vm1516_vm10 = vcmp.gt.f32.partialorder %v1452_v47, 0.0  ;;  %v1580_v62 = vmul.f32 0.2, %v1452_v47 }
 0x165   : > { %v1024_v3 = vpop.f32.mrf.mxu0  ;;  %v1152_v28 = vpop.f32.mrf.mxu1  ;;  %v1861_v26 = vadd.f32 %v1860_v18, %v1798_v2  ;;  %v1731_v63 = vadd.f32 %v1730_v52, %v2811_v11  ;;  %v1805_v52 = vmul.f32 %v2859_v8, %v2859_v8 }
 0x166   : > { %v2942_v38 = vsel %vm1484_vm9, %v1420_v43, %v1548_v61  ;;  %v1421_v5 = vadd.f32 %v2680_v17, %v1024_v3  ;;  %v2945_v7 = vsel %vm1516_vm10, %v1452_v47, %v1580_v62  ;;  %v1453_v12 = vadd.f32 %v2680_v17, %v1152_v28 }
 0x167   : > { %1677 = vst.msk [vmem:[%s2689_s24 + $0x98] sm:$0xff] %vm1657_vm0, %v2942_v38  ;;  %v1026_v25 = vpop.f32.mrf.mxu0  ;;  %1709 = vst.msk [vmem:[%s2689_s24 + $0x198] sm:$0xff] %vm1657_vm0, %v2945_v7  ;;  %v1154_v21 = vpop.f32.mrf.mxu1  ;;  %v1862_v47 = vadd.f32 %v1861_v26, %v1799_v20  ;;  %v1802_v62 = vmul.f32 %v2823_v24, %v2823_v24  ;;  %v1732_v18 = vadd.f32 %v1731_v63, %v2823_v24 }
 0x168   : > { %vm1485_vm11 = vcmp.gt.f32.partialorder %v1421_v5, 0.0  ;;  %v1549_v48 = vmul.f32 0.2, %v1421_v5  ;;  %vm1517_vm12 = vcmp.gt.f32.partialorder %v1453_v12, 0.0  ;;  %v1581_v22 = vmul.f32 0.2, %v1453_v12 }
 0x169   : > { %v1027_v33 = vpop.f32.mrf.mxu0  ;;  %v1155_v58 = vpop.f32.mrf.mxu1  ;;  %v1863_v61 = vadd.f32 %v1862_v47, %v1800_v32  ;;  %v1733_v24 = vadd.f32 %v1732_v18, %v2835_v42  ;;  %v1807_v18 = vmul.f32 %v2885_v46, %v2885_v46 }
 0x16a   : > { %v2960_v34 = vsel %vm1485_vm11, %v1421_v5, %v1549_v48  ;;  %v1422_v35 = vadd.f32 %v2680_v17, %v1027_v33  ;;  %v2963_v36 = vsel %vm1517_vm12, %v1453_v12, %v1581_v22  ;;  %v1454_v43 = vadd.f32 %v2680_v17, %v1155_v58 }
 0x16b   : > { %1678 = vst.msk [vmem:[%s2689_s24 + $0xa0] sm:$0xff] %vm1657_vm0, %v2960_v34  ;;  %v1029_v51 = vpop.f32.mrf.mxu0  ;;  %1710 = vst.msk [vmem:[%s2689_s24 + $0x1a0] sm:$0xff] %vm1657_vm0, %v2963_v36  ;;  %v1157_v55 = vpop.f32.mrf.mxu1  ;;  %v1864_v12 = vadd.f32 %v1863_v61, %v1801_v54  ;;  %v1804_v22 = vmul.f32 %v2847_v56, %v2847_v56  ;;  %v1734_v47 = vadd.f32 %v1733_v24, %v2847_v56 }
 0x16c   : > { %vm1486_vm13 = vcmp.gt.f32.partialorder %v1422_v35, 0.0  ;;  %v1550_v4 = vmul.f32 0.2, %v1422_v35  ;;  %vm1518_vm14 = vcmp.gt.f32.partialorder %v1454_v43, 0.0  ;;  %v1582_v57 = vmul.f32 0.2, %v1454_v43 }
 0x16d   : > { %v1032_v0 = vpop.f32.mrf.mxu0  ;;  %v1160_v14 = vpop.f32.mrf.mxu1  ;;  %v1865_v48 = vadd.f32 %v1864_v12, %v1802_v62  ;;  %v1735_v56 = vadd.f32 %v1734_v47, %v2859_v8  ;;  %v1809_v47 = vmul.f32 %v2924_v39, %v2924_v39 }
 0x16e   : > { %v2978_v2 = vsel %vm1486_vm13, %v1422_v35, %v1550_v4  ;;  %v1423_v3 = vadd.f32 %v2680_v17, %v1032_v0  ;;  %v2981_v28 = vsel %vm1518_vm14, %v1454_v43, %v1582_v57  ;;  %v1455_v5 = vadd.f32 %v2680_v17, %v1160_v14 }
 0x16f   : > { %1679 = vst.msk [vmem:[%s2689_s24 + $0xa8] sm:$0xff] %vm1657_vm0, %v2978_v2  ;;  %v1034_v11 = vpop.f32.mrf.mxu0  ;;  %1711 = vst.msk [vmem:[%s2689_s24 + $0x1a8] sm:$0xff] %vm1657_vm0, %v2981_v28  ;;  %v1162_v20 = vpop.f32.mrf.mxu1  ;;  %v1866_v43 = vadd.f32 %v1865_v48, %v1803_v19  ;;  %v1806_v57 = vmul.f32 %v2871_v23, %v2871_v23  ;;  %v1736_v12 = vadd.f32 %v1735_v56, %v2871_v23 }
 0x170   : > { %vm1487_vm15 = vcmp.gt.f32.partialorder %v1423_v3, 0.0  ;;  %v1551_v25 = vmul.f32 0.2, %v1423_v3  ;;  %vm1519_vm1 = vcmp.gt.f32.partialorder %v1455_v5, 0.0  ;;  %v1583_v21 = vmul.f32 0.2, %v1455_v5 }
 0x171   : > { %v1035_v26 = vpop.f32.mrf.mxu0  ;;  %v1163_v37 = vpop.f32.mrf.mxu1  ;;  %v1867_v4 = vadd.f32 %v1866_v43, %v1804_v22  ;;  %v1737_v23 = vadd.f32 %v1736_v12, %v2885_v46  ;;  %v1811_v12 = vmul.f32 %v2960_v34, %v2960_v34 }
 0x172   : > { %v2996_v32 = vsel %vm1487_vm15, %v1423_v3, %v1551_v25  ;;  %v1424_v33 = vadd.f32 %v2680_v17, %v1035_v26  ;;  %v2999_v58 = vsel %vm1519_vm1, %v1455_v5, %v1583_v21  ;;  %v1456_v35 = vadd.f32 %v2680_v17, %v1163_v37 }
 0x173   : > { %1680 = vst.msk [vmem:[%s2689_s24 + $0xb0] sm:$0xff] %vm1657_vm0, %v2996_v32  ;;  %v1037_v42 = vpop.f32.mrf.mxu0  ;;  %1712 = vst.msk [vmem:[%s2689_s24 + $0x1b0] sm:$0xff] %vm1657_vm0, %v2999_v58  ;;  %v1165_v54 = vpop.f32.mrf.mxu1  ;;  %v1868_v5 = vadd.f32 %v1867_v4, %v1805_v52  ;;  %v1808_v21 = vmul.f32 %v2906_v9, %v2906_v9  ;;  %v1738_v43 = vadd.f32 %v1737_v23, %v2906_v9 }
 0x174   : > { %vm1488_vm2 = vcmp.gt.f32.partialorder %v1424_v33, 0.0  ;;  %v1552_v51 = vmul.f32 0.2, %v1424_v33  ;;  %vm1520_vm3 = vcmp.gt.f32.partialorder %v1456_v35, 0.0  ;;  %v1584_v55 = vmul.f32 0.2, %v1456_v35 }
 0x175   : > { %v1040_v61 = vpop.f32.mrf.mxu0  ;;  %v1168_v63 = vpop.f32.mrf.mxu1  ;;  %v1869_v25 = vadd.f32 %v1868_v5, %v1806_v57  ;;  %v1739_v9 = vadd.f32 %v1738_v43, %v2924_v39  ;;  %v1813_v43 = vmul.f32 %v2996_v32, %v2996_v32 }
 0x176   : > { %v3014_v62 = vsel %vm1488_vm2, %v1424_v33, %v1552_v51  ;;  %v1425_v0 = vadd.f32 %v2680_v17, %v1040_v61  ;;  %v3017_v14 = vsel %vm1520_vm3, %v1456_v35, %v1584_v55  ;;  %v1457_v3 = vadd.f32 %v2680_v17, %v1168_v63 }
 0x177   : > { %1681 = vst.msk [vmem:[%s2689_s24 + $0xb8] sm:$0xff] %vm1657_vm0, %v3014_v62  ;;  %v1042_v8 = vpop.f32.mrf.mxu0  ;;  %1713 = vst.msk [vmem:[%s2689_s24 + $0x1b8] sm:$0xff] %vm1657_vm0, %v3017_v14  ;;  %v1170_v19 = vpop.f32.mrf.mxu1  ;;  %v1870_v35 = vadd.f32 %v1869_v25, %v1807_v18  ;;  %v1810_v55 = vmul.f32 %v2942_v38, %v2942_v38  ;;  %v1740_v5 = vadd.f32 %v1739_v9, %v2942_v38 }
 0x178   : > { %vm1489_vm4 = vcmp.gt.f32.partialorder %v1425_v0, 0.0  ;;  %v1553_v11 = vmul.f32 0.2, %v1425_v0  ;;  %vm1521_vm5 = vcmp.gt.f32.partialorder %v1457_v3, 0.0  ;;  %v1585_v20 = vmul.f32 0.2, %v1457_v3 }
 0x179   : > { %v1043_v48 = vpop.f32.mrf.mxu0  ;;  %v1171_v24 = vpop.f32.mrf.mxu1  ;;  %v1871_v51 = vadd.f32 %v1870_v35, %v1808_v21  ;;  %v1741_v38 = vadd.f32 %v1740_v5, %v2960_v34 }
 0x17a   : > { %v3032_v22 = vsel %vm1489_vm4, %v1425_v0, %v1553_v11  ;;  %v1426_v26 = vadd.f32 %v2680_v17, %v1043_v48  ;;  %v3035_v37 = vsel %vm1521_vm5, %v1457_v3, %v1585_v20  ;;  %v1458_v33 = vadd.f32 %v2680_v17, %v1171_v24 }
 0x17b   : > { %1682 = vst.msk [vmem:[%s2689_s24 + $0xc0] sm:$0xff] %vm1657_vm0, %v3032_v22  ;;  %v1045_v46 = vpop.f32.mrf.mxu0  ;;  %1714 = vst.msk [vmem:[%s2689_s24 + $0x1c0] sm:$0xff] %vm1657_vm0, %v3035_v37  ;;  %v1173_v52 = vpop.f32.mrf.mxu1  ;;  %v1872_v3 = vadd.f32 %v1871_v51, %v1809_v47  ;;  %v1812_v20 = vmul.f32 %v2978_v2, %v2978_v2  ;;  %v1742_v35 = vadd.f32 %v1741_v38, %v2978_v2 }
 0x17c   : > { %vm1490_vm6 = vcmp.gt.f32.partialorder %v1426_v26, 0.0  ;;  %v1554_v42 = vmul.f32 0.2, %v1426_v26  ;;  %vm1522_vm7 = vcmp.gt.f32.partialorder %v1458_v33, 0.0  ;;  %v1586_v54 = vmul.f32 0.2, %v1458_v33 }
 0x17d   : > { %v1048_v4 = vpop.f32.mrf.mxu0  ;;  %v1176_v56 = vpop.f32.mrf.mxu1  ;;  %v1873_v11 = vadd.f32 %v1872_v3, %v1810_v55  ;;  %v1814_v2 = vmul.f32 %v3014_v62, %v3014_v62  ;;  %v1815_v5 = vmul.f32 %v3032_v22, %v3032_v22 }
 0x17e   : > { %v3050_v57 = vsel %vm1490_vm6, %v1426_v26, %v1554_v42  ;;  %v1427_v61 = vadd.f32 %v2680_v17, %v1048_v4  ;;  %v3053_v63 = vsel %vm1522_vm7, %v1458_v33, %v1586_v54  ;;  %v1459_v0 = vadd.f32 %v2680_v17, %v1176_v56 }
 0x17f   : > { %1683 = vst.msk [vmem:[%s2689_s24 + $0xc8] sm:$0xff] %vm1657_vm0, %v3050_v57  ;;  %v1050_v39 = vpop.f32.mrf.mxu0  ;;  %1715 = vst.msk [vmem:[%s2689_s24 + $0x1c8] sm:$0xff] %vm1657_vm0, %v3053_v63  ;;  %v1178_v18 = vpop.f32.mrf.mxu1  ;;  %v1874_v33 = vadd.f32 %v1873_v11, %v1811_v12  ;;  %v1743_v54 = vadd.f32 %v1742_v35, %v2996_v32 }
 0x180   : > { %vm1491_vm8 = vcmp.gt.f32.partialorder %v1427_v61, 0.0  ;;  %v1555_v8 = vmul.f32 0.2, %v1427_v61  ;;  %vm1523_vm9 = vcmp.gt.f32.partialorder %v1459_v0, 0.0  ;;  %v1587_v19 = vmul.f32 0.2, %v1459_v0 }
 0x181   : > { %v1051_v25 = vpop.f32.mrf.mxu0  ;;  %v1179_v23 = vpop.f32.mrf.mxu1  ;;  %v1875_v42 = vadd.f32 %v1874_v33, %v1812_v20  ;;  %v1744_v3 = vadd.f32 %v1743_v54, %v3014_v62  ;;  %v1816_v62 = vmul.f32 %v3050_v57, %v3050_v57 }
 0x182   : > { %v1619_v21 = vsel %vm1491_vm8, %v1427_v61, %v1555_v8  ;;  %v1428_v48 = vadd.f32 %v2680_v17, %v1051_v25  ;;  %v3069_v24 = vsel %vm1523_vm9, %v1459_v0, %v1587_v19  ;;  %v1460_v26 = vadd.f32 %v2680_v17, %v1179_v23 }
 0x183   : > { %1684 = vst.msk [vmem:[%s2689_s24 + $0xd0] sm:$0xff] %vm1657_vm0, %v1619_v21  ;;  %v1053_v34 = vpop.f32.mrf.mxu0  ;;  %1716 = vst.msk [vmem:[%s2689_s24 + $0x1d0] sm:$0xff] %vm1657_vm0, %v3069_v24  ;;  %v1181_v47 = vpop.f32.mrf.mxu1  ;;  %v1876_v0 = vadd.f32 %v1875_v42, %v1813_v43  ;;  %v1745_v19 = vadd.f32 %v1744_v3, %v3032_v22  ;;  %v1817_v35 = vmul.f32 %v1619_v21, %v1619_v21 }
 0x184   : > { %vm1492_vm10 = vcmp.gt.f32.partialorder %v1428_v48, 0.0  ;;  %v1556_v46 = vmul.f32 0.2, %v1428_v48  ;;  %vm1524_vm11 = vcmp.gt.f32.partialorder %v1460_v26, 0.0  ;;  %v1588_v52 = vmul.f32 0.2, %v1460_v26 }
 0x185   : > { %v1056_v51 = vpop.f32.mrf.mxu0  ;;  %v1184_v9 = vpop.f32.mrf.mxu1  ;;  %v1877_v8 = vadd.f32 %v1876_v0, %v1814_v2  ;;  %v1746_v33 = vadd.f32 %v1745_v19, %v3050_v57 }
 0x186   : > { %v1620_v55 = vsel %vm1492_vm10, %v1428_v48, %v1556_v46  ;;  %v1429_v4 = vadd.f32 %v2680_v17, %v1056_v51  ;;  %v3084_v56 = vsel %vm1524_vm11, %v1460_v26, %v1588_v52  ;;  %v1461_v61 = vadd.f32 %v2680_v17, %v1184_v9 }
 0x187   : > { %1685 = vst.msk [vmem:[%s2689_s24 + $0xd8] sm:$0xff] %vm1657_vm0, %v1620_v55  ;;  %v1058_v32 = vpop.f32.mrf.mxu0  ;;  %1717 = vst.msk [vmem:[%s2689_s24 + $0x1d8] sm:$0xff] %vm1657_vm0, %v3084_v56  ;;  %v1186_v12 = vpop.f32.mrf.mxu1  ;;  %v1878_v26 = vadd.f32 %v1877_v8, %v1815_v5  ;;  %v1747_v52 = vadd.f32 %v1746_v33, %v1619_v21  ;;  %v1818_v42 = vmul.f32 %v1620_v55, %v1620_v55 }
 0x188   : > { %vm1493_vm12 = vcmp.gt.f32.partialorder %v1429_v4, 0.0  ;;  %v1557_v39 = vmul.f32 0.2, %v1429_v4  ;;  %vm1525_vm13 = vcmp.gt.f32.partialorder %v1461_v61, 0.0  ;;  %v1589_v18 = vmul.f32 0.2, %v1461_v61 }
 0x189   : > { %v1059_v11 = vpop.f32.mrf.mxu0  ;;  %v1187_v38 = vpop.f32.mrf.mxu1  ;;  %v1879_v46 = vadd.f32 %v1878_v26, %v1816_v62  ;;  %v1748_v0 = vadd.f32 %v1747_v52, %v1620_v55  ;;  %v2361_v62 = vld [vmem:[%s3277_s2] ss:$0 sm:$0xff] }
 0x18a   : > { %v1621_v20 = vsel %vm1493_vm12, %v1429_v4, %v1557_v39  ;;  %v1430_v25 = vadd.f32 %v2680_v17, %v1059_v11  ;;  %v3099_v23 = vsel %vm1525_vm13, %v1461_v61, %v1589_v18  ;;  %v1462_v48 = vadd.f32 %v2680_v17, %v1187_v38 }
 0x18b   : > { %1686 = vst.msk [vmem:[%s2689_s24 + $0xe0] sm:$0xff] %vm1657_vm0, %v1621_v20  ;;  %v1061_v43 = vpop.f32.mrf.mxu0  ;;  %1718 = vst.msk [vmem:[%s2689_s24 + $0x1e0] sm:$0xff] %vm1657_vm0, %v3099_v23  ;;  %v1189_v22 = vpop.f32.mrf.mxu1  ;;  %v1880_v61 = vadd.f32 %v1879_v46, %v1817_v35  ;;  %v1819_v3 = vmul.f32 %v1621_v20, %v1621_v20  ;;  %v1749_v18 = vadd.f32 %v1748_v0, %v1621_v20 }
 0x18c   : > { %vm1494_vm14 = vcmp.gt.f32.partialorder %v1430_v25, 0.0  ;;  %v1558_v34 = vmul.f32 0.2, %v1430_v25  ;;  %vm1526_vm15 = vcmp.gt.f32.partialorder %v1462_v48, 0.0  ;;  %v1590_v47 = vmul.f32 0.2, %v1462_v48 }
 0x18d   : > { %v1064_v54 = vpop.f32.mrf.mxu0  ;;  %v1192_v2 = vpop.f32.mrf.mxu1  ;;  %v1881_v39 = vadd.f32 %v1880_v61, %v1818_v42  ;;  %v1824_v61 = vmul.f32 %v2706_v40, %v2706_v40 }
 0x18e   : > { %v1622_v57 = vsel %vm1494_vm14, %v1430_v25, %v1558_v34  ;;  %v1431_v51 = vadd.f32 %v2680_v17, %v1064_v54  ;;  %v3109_v9 = vsel %vm1526_vm15, %v1462_v48, %v1590_v47  ;;  %v1463_v4 = vadd.f32 %v2680_v17, %v1192_v2 }
 0x18f   : > { %1687 = vst.msk [vmem:[%s2689_s24 + $0xe8] sm:$0xff] %vm1657_vm0, %v1622_v57  ;;  %v1066_v5 = vpop.f32.mrf.mxu0  ;;  %1719 = vst.msk [vmem:[%s2689_s24 + $0x1e8] sm:$0xff] %vm1657_vm0, %v3109_v9  ;;  %v1194_v21 = vpop.f32.mrf.mxu1  ;;  %v1820_v8 = vmul.f32 %v1622_v57, %v1622_v57  ;;  %v1882_v48 = vadd.f32 %v1881_v39, %v1819_v3  ;;  %v1750_v26 = vadd.f32 %v1749_v18, %v1622_v57 }
 0x190   : > { %vm1495_vm1 = vcmp.gt.f32.partialorder %v1431_v51, 0.0  ;;  %v1559_v32 = vmul.f32 0.2, %v1431_v51  ;;  %vm1527_vm2 = vcmp.gt.f32.partialorder %v1463_v4, 0.0  ;;  %v1591_v12 = vmul.f32 0.2, %v1463_v4 }
 0x191   : > { %v1067_v17 = vpop.f32.mrf.mxu0  ;;  %v1195_v19 = vpop.f32.mrf.mxu1  ;;  %v1883_v34 = vadd.f32 %v1882_v48, %v1820_v8  ;;  %v1823_v57 = vmul.f32 %v2694_v30, %v2694_v30  ;;  %v1825_v5 = vmul.f32 %v2718_v50, %v2718_v50 }
 0x192   : > { %v1623_v55 = vsel %vm1495_vm1, %v1431_v51, %v1559_v32  ;;  %v1432_v11 = vadd.f32 %v2361_v62, %v1067_v17  ;;  %v3120_v38 = vsel %vm1527_vm2, %v1463_v4, %v1591_v12  ;;  %v1464_v25 = vadd.f32 %v2361_v62, %v1195_v19 }
 0x193   : > { %1688 = vst.msk [vmem:[%s2689_s24 + $0xf0] sm:$0xff] %vm1657_vm0, %v1623_v55  ;;  %v1821_v33 = vmul.f32 %v1623_v55, %v1623_v55  ;;  %v1069_v20 = vpop.f32.mrf.mxu0  ;;  %1720 = vst.msk [vmem:[%s2689_s24 + $0x1f0] sm:$0xff] %vm1657_vm0, %v3120_v38  ;;  %v1197_v35 = vpop.f32.mrf.mxu1  ;;  %v1751_v47 = vadd.f32 %v1750_v26, %v1623_v55  ;;  %v1826_v12 = vmul.f32 %v2730_v60, %v2730_v60 }
 0x194   : > { %vm1496_vm3 = vcmp.gt.f32.partialorder %v1432_v11, 0.0  ;;  %v1560_v43 = vmul.f32 0.2, %v1432_v11  ;;  %vm1528_vm4 = vcmp.gt.f32.partialorder %v1464_v25, 0.0  ;;  %v1592_v22 = vmul.f32 0.2, %v1464_v25 }
 0x195   : > { %v1884_v42 = vadd.f32 %v1883_v34, %v1821_v33 }
 0x196   : > { %v1624_v46 = vsel %vm1496_vm3, %v1432_v11, %v1560_v43  ;;  %v3127_v52 = vsel %vm1528_vm4, %v1464_v25, %v1592_v22 }
 0x197   : > { %1689 = vst.msk [vmem:[%s2689_s24 + $0xf8] sm:$0xff] %vm1657_vm0, %v1624_v46  ;;  %v1752_v54 = vadd.f32 %v1751_v47, %v1624_v46  ;;  %v1822_v2 = vmul.f32 %v1624_v46, %v1624_v46  ;;  %1721 = vst.msk [vmem:[%s2689_s24 + $0x1f8] sm:$0xff] %vm1657_vm0, %v3127_v52  ;;  %vm1924_vm0 = vcmask 1040384  }
 0x199   : > { %v1753_v51 = vadd.f32 %v1752_v54, %v2694_v30  ;;  %v1885_v4 = vadd.f32 %v1884_v42, %v1822_v2  ;;  %v1827_v30 = vmul.f32 %v2742_v6, %v2742_v6 }
 0x19b   : > { %v1754_v0 = vadd.f32 %v1753_v51, %v2706_v40  ;;  %v1886_v3 = vadd.f32 %v1885_v4, %v1823_v57  ;;  %v1828_v40 = vmul.f32 %v2754_v16, %v2754_v16 }
 0x19d   : > { %v1755_v21 = vadd.f32 %v1754_v0, %v2718_v50  ;;  %v1887_v32 = vadd.f32 %v1886_v3, %v1824_v61  ;;  %v1829_v50 = vmul.f32 %v2766_v27, %v2766_v27 }
 0x19f   : > { %v1756_v39 = vadd.f32 %v1755_v21, %v2730_v60  ;;  %v1888_v18 = vadd.f32 %v1887_v32, %v1825_v5  ;;  %v1830_v60 = vmul.f32 %v2778_v41, %v2778_v41  ;;  %v1840_v5 = vmul.f32 %v2909_v15, %v2909_v15 }
 0x1a1   : > { %v1757_v8 = vadd.f32 %v1756_v39, %v2742_v6  ;;  %v1889_v17 = vadd.f32 %v1888_v18, %v1826_v12  ;;  %v1831_v6 = vmul.f32 %v2790_v53, %v2790_v53  ;;  %v1841_v12 = vmul.f32 %v2927_v45, %v2927_v45 }
 0x1a2   : > { %v1842_v18 = vmul.f32 %v2945_v7, %v2945_v7 }
 0x1a3   : > { %v1758_v19 = vadd.f32 %v1757_v8, %v2754_v16  ;;  %v1890_v55 = vadd.f32 %v1889_v17, %v1827_v30  ;;  %v1832_v16 = vmul.f32 %v2802_v1, %v2802_v1  ;;  %v1843_v8 = vmul.f32 %v2963_v36, %v2963_v36 }
 0x1a5   : > { %v1759_v62 = vadd.f32 %v1758_v19, %v2766_v27  ;;  %v1891_v11 = vadd.f32 %v1890_v55, %v1828_v40  ;;  %v1833_v27 = vmul.f32 %v2814_v13, %v2814_v13  ;;  %v1844_v40 = vmul.f32 %v2981_v28, %v2981_v28 }
 0x1a6   : > { %v1845_v55 = vmul.f32 %v2999_v58, %v2999_v58 }
 0x1a7   : > { %v1760_v25 = vadd.f32 %v1759_v62, %v2778_v41  ;;  %v1892_v48 = vadd.f32 %v1891_v11, %v1829_v50  ;;  %v1834_v41 = vmul.f32 %v2826_v29, %v2826_v29  ;;  %v1846_v62 = vmul.f32 %v3017_v14, %v3017_v14 }
 0x1a9   : > { %v1893_v26 = vadd.f32 %v1892_v48, %v1830_v60  ;;  %v1761_v33 = vadd.f32 %v1760_v25, %v2790_v53  ;;  %v1835_v53 = vmul.f32 %v2838_v44, %v2838_v44  ;;  %v1847_v60 = vmul.f32 %v3035_v37, %v3035_v37 }
 0x1aa   : > { %v1848_v48 = vmul.f32 %v3053_v63, %v3053_v63 }
 0x1ab   : > { %v1762_v20 = vadd.f32 %v1761_v33, %v2802_v1  ;;  %v1894_v35 = vadd.f32 %v1893_v26, %v1831_v6  ;;  %v1836_v1 = vmul.f32 %v2850_v59, %v2850_v59  ;;  %v1849_v26 = vmul.f32 %v3069_v24, %v3069_v24 }
 0x1ad   : > { %v1763_v43 = vadd.f32 %v1762_v20, %v2814_v13  ;;  %v1895_v22 = vadd.f32 %v1894_v35, %v1832_v16  ;;  %v1837_v13 = vmul.f32 %v2862_v10, %v2862_v10  ;;  %v1850_v16 = vmul.f32 %v3084_v56, %v3084_v56 }
 0x1ae   : > { %v1851_v35 = vmul.f32 %v3099_v23, %v3099_v23 }
 0x1af   : > { %v1764_v34 = vadd.f32 %v1763_v43, %v2826_v29  ;;  %v1896_v47 = vadd.f32 %v1895_v22, %v1833_v27  ;;  %v1838_v29 = vmul.f32 %v2874_v31, %v2874_v31  ;;  %v1852_v43 = vmul.f32 %v3109_v9, %v3109_v9 }
 0x1b1   : > { %v1765_v46 = vadd.f32 %v1764_v34, %v2838_v44  ;;  %v1897_v42 = vadd.f32 %v1896_v47, %v1834_v41  ;;  %v1839_v44 = vmul.f32 %v2888_v49, %v2888_v49  ;;  %v1853_v41 = vmul.f32 %v3120_v38, %v3120_v38 }
 0x1b2   : > { %v1854_v47 = vmul.f32 %v3127_v52, %v3127_v52 }
 0x1b3   : > { %v1766_v54 = vadd.f32 %v1765_v46, %v2850_v59  ;;  %v1898_v2 = vadd.f32 %v1897_v42, %v1835_v53 }
 0x1b5   : > { %v1767_v57 = vadd.f32 %v1766_v54, %v2862_v10  ;;  %v1899_v51 = vadd.f32 %v1898_v2, %v1836_v1 }
 0x1b7   : > { %v1768_v4 = vadd.f32 %v1767_v57, %v2874_v31  ;;  %v1900_v61 = vadd.f32 %v1899_v51, %v1837_v13 }
 0x1b9   : > { %v1769_v0 = vadd.f32 %v1768_v4, %v2888_v49  ;;  %v1901_v3 = vadd.f32 %v1900_v61, %v1838_v29 }
 0x1bb   : > { %v1770_v59 = vadd.f32 %v1769_v0, %v2909_v15  ;;  %v1902_v21 = vadd.f32 %v1901_v3, %v1839_v44 }
 0x1bd   : > { %v1903_v10 = vadd.f32 %v1902_v21, %v1840_v5  ;;  %v1771_v32 = vadd.f32 %v1770_v59, %v2927_v45 }
 0x1bf   : > { %v1904_v31 = vadd.f32 %v1903_v10, %v1841_v12  ;;  %v1772_v39 = vadd.f32 %v1771_v32, %v2945_v7 }
 0x1c1   : > { %v1905_v49 = vadd.f32 %v1904_v31, %v1842_v18  ;;  %v1773_v30 = vadd.f32 %v1772_v39, %v2963_v36 }
 0x1c3   : > { %v1906_v15 = vadd.f32 %v1905_v49, %v1843_v8  ;;  %v1774_v17 = vadd.f32 %v1773_v30, %v2981_v28 }
 0x1c5   : > { %v1907_v19 = vadd.f32 %v1906_v15, %v1844_v40  ;;  %v1775_v45 = vadd.f32 %v1774_v17, %v2999_v58 }
 0x1c7   : > { %v1908_v50 = vadd.f32 %v1907_v19, %v1845_v55  ;;  %v1776_v7 = vadd.f32 %v1775_v45, %v3017_v14 }
 0x1c9   : > { %v1909_v11 = vadd.f32 %v1908_v50, %v1846_v62  ;;  %v1777_v36 = vadd.f32 %v1776_v7, %v3035_v37 }
 0x1cb   : > { %v1910_v25 = vadd.f32 %v1909_v11, %v1847_v60  ;;  %v1778_v28 = vadd.f32 %v1777_v36, %v3053_v63 }
 0x1cd   : > { %v1911_v6 = vadd.f32 %v1910_v25, %v1848_v48  ;;  %v1779_v58 = vadd.f32 %v1778_v28, %v3069_v24 }
 0x1cf   : > { %v1912_v33 = vadd.f32 %v1911_v6, %v1849_v26  ;;  %v1780_v14 = vadd.f32 %v1779_v58, %v3084_v56 }
 0x1d1   : > { %v1913_v37 = vadd.f32 %v1912_v33, %v1850_v16  ;;  %v1781_v20 = vadd.f32 %v1780_v14, %v3099_v23 }
 0x1d3   : > { %v1914_v63 = vadd.f32 %v1913_v37, %v1851_v35  ;;  %v1782_v27 = vadd.f32 %v1781_v20, %v3109_v9 }
 0x1d5   : > { %v1915_v24 = vadd.f32 %v1914_v63, %v1852_v43  ;;  %v1783_v22 = vadd.f32 %v1782_v27, %v3120_v38 }
 0x1d7   : > { %v1916_v56 = vadd.f32 %v1915_v24, %v1853_v41  ;;  %v1784_v34 = vadd.f32 %v1783_v22, %v3127_v52 }
 0x1d9   : > { %v1785_v23 = vrot.slane %v1784_v34, 4  ;;  %v1917_v53 = vadd.f32 %v1916_v56, %v1854_v47 }
 0x1db   : > { %v1786_v46 = vadd.f32 %v1785_v23, %v1784_v34  ;;  %v1918_v42 = vrot.slane %v1917_v53, 4 }
 0x1dd   : > { %v1787_v1 = vrot.slane %v1786_v46, 2  ;;  %v1919_v9 = vadd.f32 %v1918_v42, %v1917_v53 }
 0x1df   : > { %v1788_v54 = vadd.f32 %v1787_v1, %v1786_v46  ;;  %v1920_v2 = vrot.slane %v1919_v9, 2 }
 0x1e1   : > { %v1789_v13 = vrot.slane %v1788_v54, 1  ;;  %v1921_v38 = vadd.f32 %v1920_v2, %v1919_v9 }
 0x1e3   : > { %v1922_v57 = vrot.slane %v1921_v38, 1  ;;  %v1790_v51 = vadd.f32 %v1789_v13, %v1788_v54 }
 0x1e5   : > { %v1923_v52 = vadd.f32 %v1922_v57, %v1921_v38 }
 0x1e7   : > { %v1925_v29 = vsel %vm1924_vm0, %v1790_v51, %v1923_v52 }
 0x1e8   : > { %1926 = vst [vmem:[%s240_s6] sm:$0x3] %v1925_v29 }
 0x1e9   : > { %2375 = shalt.err (!%p2372_p5)
}
 0x1ea   : > { %s2376_s22 = scalar_lea.hbm %s3235_s10, 32  ;;  %s2380_s12 = scalar_lea.hbm %s3279_s4, 96 }
 0x1eb   : > { %p2377_p6 = scmp.ne.s32.totalorder %s3235_s10, %s2376_s22  ;;  %p2381_p10 = scmp.lt.s32.totalorder %s3235_s10, %s3279_s4 }
 0x1ec   : > { %p2382_p11 = scmp.lt.s32.totalorder %s2380_s12, %s2376_s22 }
 0x1ed   : > { %p2378_p7 = pnand %p2377_p6, %p2507_p4 }
 0x1ee   : > { %p2383_p12 = por %p2382_p11, %p2381_p10 }
 0x1ef   : > { %p2379_p9 = pneg %p2378_p7 }
 0x1f1   : > { %p2384_p13 = pnand %p2383_p12, %p2379_p9 }
 0x1f3   : > { %2387 = shalt.err (!%p2384_p13)
}
 0x1f4   : > { %2193 = dma.vmem_to_hbm [thread:$0]  (%p2507_p4), %s1951_s7, 32, %s3235_s10, %s1933_s11  }
 0x1f5 PF: > { %p2199_p0 = scmp.ge.s32.totalorder %s2438_s20, 2  ;;  %s1970_s30 = sand.u32 1, %s2418_s15  }
 0x1f6   : > { %s1971_s6 = scalar_lea.sflag [#allocation4], %s1970_s30 }
 0x1f7   : > { %p2196_p1 = pnand %p2199_p0, %p2514_p8 }
 0x1f9   : > { %p2197_p2 = pneg %p2196_p1 }
 0x1fb   : > { %2413 = dma.done.wait (%p2197_p2), %s1971_s6, 32  }
 0x1fc   : > { %2415 = vsyncadd (%p2197_p2), %s1971_s6, 4294967264  ;;  %s18_s20 = sadd.s32 1, %s2438_s20   ;;  %s3282_s15 = smov %s2422_s16 }
 0x1fd   : > { %p15_p3 = scmp.ge.s32.totalorder %s18_s20, 5   ;;  %s3283_s16 = smov %s2426_s17 }
 0x1fe   : > { %s3284_s17 = smov %s2520_s28  ;;  %s3285_s18 = smov %s2434_s19 }
 0x1ff   : > { %s3286_s19 = smov %s3288_s23  ;;  %17 = sbr.rel (!%p15_p3) target bundleno = 4 (0x4), region = 90 }
 0x204   :  { %1976 = vsyncpa [#allocation4], 1 }
 0x205   :  { %1978 = vsyncpa [#allocation4 + $0x1], 1 }

// kernel: discriminator_forward.10
= control target key start
LH: loop header
LB: loop body
LE: loop exit
PB: predicated region body
PF: predicated region fallthrough
CT: control target
= control target key end

     0   :  { %s406_s12 = smov 0   ;;  %s520_s0 = inlined_call_operand.vmem [shape: f32[256,16], index: 0, kind: input, shape index: {}]   ;;  %s521_s1 = inlined_call_operand.vmem [shape: f32[1,16], index: 1, kind: input, shape index: {}]   ;;  %s522_s2 = inlined_call_operand.vmem [shape: f32[1,16], index: 2, kind: input, shape index: {}]   ;;  %s523_s3 = inlined_call_operand.vmem [shape: f32[256,16], index: 3, kind: output, shape index: {}]  }
   0x1 LB: > { %s357_s13 = sadd.s32 4294967295, %s384_s12   ;;  %p361_p0 = scmp.ge.s32.totalorder %s384_s12, 1  ;;  %s384_s12 = sphi %s406_s12, %s13_s12  }
   0x2   : > { %p138_p1 = scmp.lt.s32.totalorder %s384_s12, 3 }
   0x4   : > { %p139_p2 = pnand %p361_p0, %p138_p1 }
   0x5   : > { %s362_s14 = sshll.u32 (!%p139_p2), %s357_s13, 4 }
   0x6   : > { %142 = sbr.rel (%p139_p2) target bundleno = 40 (0x28), region = 32  ;;  %p163_p3 = scmp.lt.s32.totalorder (!%p139_p2), %s362_s14, 31 }
   0xb   : > { %s525_s14 = smov (!%p163_p3, %s362_s14), 31  ;;  %v420_v0 = vld [vmem:[%s521_s1] ss:$0 sm:$0xff]  ;;  %vm284_vm0 = vcmask 130048  }
   0xc   : > { %s363_s15 = sshll.u32 %s525_s14, 3  ;;  %v430_v1 = vld [vmem:[%s522_s2] ss:$0 sm:$0xff] }
   0xd   : > { %s425_s20 = scalar_lea.vmem %s520_s0, %s363_s15  ;;  %s458_s25 = scalar_lea.vmem %s523_s3, %s363_s15 }
   0xe   : > { %v174_v2 = vld [vmem:[%s425_s20] sm:$0xff]  ;;  %v175_v3 = vld [vmem:[%s425_s20 + $0x8] sm:$0xff]  ;;  %v176_v4 = vld [vmem:[%s425_s20 + $0x10] sm:$0xff] }
   0xf   : > { %v197_v5 = vmul.f32 %v420_v0, %v174_v2  ;;  %v198_v6 = vmul.f32 %v420_v0, %v175_v3  ;;  %v199_v7 = vmul.f32 %v420_v0, %v176_v4  ;;  %v177_v8 = vld [vmem:[%s425_s20 + $0x18] sm:$0xff]  ;;  %v178_v9 = vld [vmem:[%s425_s20 + $0x20] sm:$0xff]  ;;  %v179_v10 = vld [vmem:[%s425_s20 + $0x28] sm:$0xff] }
  0x10   : > { %v200_v11 = vmul.f32 %v420_v0, %v177_v8  ;;  %v201_v12 = vmul.f32 %v420_v0, %v178_v9  ;;  %v202_v13 = vmul.f32 %v420_v0, %v179_v10  ;;  %v180_v14 = vld [vmem:[%s425_s20 + $0x30] sm:$0xff]  ;;  %v181_v15 = vld [vmem:[%s425_s20 + $0x38] sm:$0xff]  ;;  %v182_v24 = vld [vmem:[%s425_s20 + $0x40] sm:$0xff] }
  0x11   : > { %v220_v16 = vadd.f32 %v430_v1, %v197_v5  ;;  %v221_v17 = vadd.f32 %v430_v1, %v198_v6  ;;  %v222_v18 = vadd.f32 %v430_v1, %v199_v7  ;;  %v203_v19 = vmul.f32 %v420_v0, %v180_v14  ;;  %v183_v32 = vld [vmem:[%s425_s20 + $0x48] sm:$0xff]  ;;  %v184_v33 = vld [vmem:[%s425_s20 + $0x50] sm:$0xff]  ;;  %v185_v34 = vld [vmem:[%s425_s20 + $0x58] sm:$0xff] }
  0x12   : > { %v223_v20 = vadd.f32 %v430_v1, %v200_v11  ;;  %v224_v21 = vadd.f32 %v430_v1, %v201_v12  ;;  %v225_v22 = vadd.f32 %v430_v1, %v202_v13  ;;  %v204_v23 = vmul.f32 %v420_v0, %v181_v15  ;;  %v186_v46 = vld [vmem:[%s425_s20 + $0x60] sm:$0xff]  ;;  %v187_v47 = vld [vmem:[%s425_s20 + $0x68] sm:$0xff]  ;;  %v188_v58 = vld [vmem:[%s425_s20 + $0x70] sm:$0xff] }
  0x13   : > { %vm236_vm1 = vcmp.gt.f32.partialorder %v220_v16, 0.0  ;;  %v252_v25 = vmul.f32 0.2, %v220_v16  ;;  %vm237_vm2 = vcmp.gt.f32.partialorder %v221_v17, 0.0  ;;  %v253_v26 = vmul.f32 0.2, %v221_v17 }
  0x14   : > { %vm238_vm3 = vcmp.gt.f32.partialorder %v222_v18, 0.0  ;;  %v254_v27 = vmul.f32 0.2, %v222_v18  ;;  %vm239_vm4 = vcmp.gt.f32.partialorder %v223_v20, 0.0  ;;  %v255_v28 = vmul.f32 0.2, %v223_v20 }
  0x15   : > { %v268_v29 = vsel %vm236_vm1, %v220_v16, %v252_v25  ;;  %v269_v30 = vsel %vm237_vm2, %v221_v17, %v253_v26  ;;  %vm240_vm5 = vcmp.gt.f32.partialorder %v224_v21, 0.0  ;;  %v256_v31 = vmul.f32 0.2, %v224_v21  ;;  %v189_v59 = vld [vmem:[%s425_s20 + $0x78] sm:$0xff] }
  0x16   : > { %285 = vst.msk [vmem:[%s458_s25] sm:$0xff] %vm284_vm0, %v268_v29  ;;  %286 = vst.msk [vmem:[%s458_s25 + $0x8] sm:$0xff] %vm284_vm0, %v269_v30  ;;  %v270_v35 = vsel %vm238_vm3, %v222_v18, %v254_v27  ;;  %v271_v36 = vsel %vm239_vm4, %v223_v20, %v255_v28  ;;  %vm241_vm6 = vcmp.gt.f32.partialorder %v225_v22, 0.0  ;;  %v257_v37 = vmul.f32 0.2, %v225_v22 }
  0x17   : > { %287 = vst.msk [vmem:[%s458_s25 + $0x10] sm:$0xff] %vm284_vm0, %v270_v35  ;;  %288 = vst.msk [vmem:[%s458_s25 + $0x18] sm:$0xff] %vm284_vm0, %v271_v36  ;;  %v272_v38 = vsel %vm240_vm5, %v224_v21, %v256_v31  ;;  %v226_v39 = vadd.f32 %v430_v1, %v203_v19  ;;  %v227_v40 = vadd.f32 %v430_v1, %v204_v23 }
  0x18   : > { %v205_v41 = vmul.f32 %v420_v0, %v182_v24  ;;  %289 = vst.msk [vmem:[%s458_s25 + $0x20] sm:$0xff] %vm284_vm0, %v272_v38  ;;  %v273_v42 = vsel %vm241_vm6, %v225_v22, %v257_v37  ;;  %v206_v43 = vmul.f32 %v420_v0, %v183_v32  ;;  %v207_v44 = vmul.f32 %v420_v0, %v184_v33 }
  0x19   : > { %v208_v45 = vmul.f32 %v420_v0, %v185_v34  ;;  %290 = vst.msk [vmem:[%s458_s25 + $0x28] sm:$0xff] %vm284_vm0, %v273_v42  ;;  %vm242_vm7 = vcmp.gt.f32.partialorder %v226_v39, 0.0  ;;  %v258_v48 = vmul.f32 0.2, %v226_v39  ;;  %vm243_vm8 = vcmp.gt.f32.partialorder %v227_v40, 0.0 }
  0x1a   : > { %v259_v49 = vmul.f32 0.2, %v227_v40  ;;  %v228_v50 = vadd.f32 %v430_v1, %v205_v41  ;;  %v229_v51 = vadd.f32 %v430_v1, %v206_v43  ;;  %v230_v52 = vadd.f32 %v430_v1, %v207_v44 }
  0x1b   : > { %v231_v53 = vadd.f32 %v430_v1, %v208_v45  ;;  %v274_v54 = vsel %vm242_vm7, %v226_v39, %v258_v48  ;;  %v209_v56 = vmul.f32 %v420_v0, %v186_v46  ;;  %v210_v57 = vmul.f32 %v420_v0, %v187_v47 }
  0x1c   : > { %v275_v55 = vsel %vm243_vm8, %v227_v40, %v259_v49  ;;  %291 = vst.msk [vmem:[%s458_s25 + $0x30] sm:$0xff] %vm284_vm0, %v274_v54  ;;  %vm244_vm9 = vcmp.gt.f32.partialorder %v228_v50, 0.0  ;;  %v260_v60 = vmul.f32 0.2, %v228_v50  ;;  %vm245_vm10 = vcmp.gt.f32.partialorder %v229_v51, 0.0 }
  0x1d   : > { %292 = vst.msk [vmem:[%s458_s25 + $0x38] sm:$0xff] %vm284_vm0, %v275_v55  ;;  %v261_v61 = vmul.f32 0.2, %v229_v51  ;;  %vm246_vm11 = vcmp.gt.f32.partialorder %v230_v52, 0.0  ;;  %v262_v62 = vmul.f32 0.2, %v230_v52  ;;  %v232_v4 = vadd.f32 %v430_v1, %v209_v56 }
  0x1e   : > { %vm247_vm12 = vcmp.gt.f32.partialorder %v231_v53, 0.0  ;;  %v263_v63 = vmul.f32 0.2, %v231_v53  ;;  %v276_v2 = vsel %vm244_vm9, %v228_v50, %v260_v60  ;;  %v233_v5 = vadd.f32 %v430_v1, %v210_v57 }
  0x1f   : > { %v277_v3 = vsel %vm245_vm10, %v229_v51, %v261_v61  ;;  %293 = vst.msk [vmem:[%s458_s25 + $0x40] sm:$0xff] %vm284_vm0, %v276_v2  ;;  %v278_v6 = vsel %vm246_vm11, %v230_v52, %v262_v62  ;;  %v211_v8 = vmul.f32 %v420_v0, %v188_v58  ;;  %v212_v9 = vmul.f32 %v420_v0, %v189_v59 }
  0x20   : > { %294 = vst.msk [vmem:[%s458_s25 + $0x48] sm:$0xff] %vm284_vm0, %v277_v3  ;;  %v279_v7 = vsel %vm247_vm12, %v231_v53, %v263_v63  ;;  %295 = vst.msk [vmem:[%s458_s25 + $0x50] sm:$0xff] %vm284_vm0, %v278_v6  ;;  %vm248_vm13 = vcmp.gt.f32.partialorder %v232_v4, 0.0  ;;  %v264_v10 = vmul.f32 0.2, %v232_v4  ;;  %vm249_vm14 = vcmp.gt.f32.partialorder %v233_v5, 0.0 }
  0x21   : > { %296 = vst.msk [vmem:[%s458_s25 + $0x58] sm:$0xff] %vm284_vm0, %v279_v7  ;;  %v265_v11 = vmul.f32 0.2, %v233_v5  ;;  %v234_v12 = vadd.f32 %v430_v1, %v211_v8  ;;  %v235_v13 = vadd.f32 %v430_v1, %v212_v9 }
  0x22   : > { %v280_v14 = vsel %vm248_vm13, %v232_v4, %v264_v10 }
  0x23   : > { %v281_v15 = vsel %vm249_vm14, %v233_v5, %v265_v11  ;;  %297 = vst.msk [vmem:[%s458_s25 + $0x60] sm:$0xff] %vm284_vm0, %v280_v14  ;;  %vm250_vm15 = vcmp.gt.f32.partialorder %v234_v12, 0.0  ;;  %v266_v0 = vmul.f32 0.2, %v234_v12  ;;  %vm251_vm1 = vcmp.gt.f32.partialorder %v235_v13, 0.0 }
  0x24   : > { %298 = vst.msk [vmem:[%s458_s25 + $0x68] sm:$0xff] %vm284_vm0, %v281_v15  ;;  %v267_v16 = vmul.f32 0.2, %v235_v13 }
  0x25   : > { %v282_v17 = vsel %vm250_vm15, %v234_v12, %v266_v0 }
  0x26   : > { %v283_v18 = vsel %vm251_vm1, %v235_v13, %v267_v16  ;;  %299 = vst.msk [vmem:[%s458_s25 + $0x70] sm:$0xff] %vm284_vm0, %v282_v17 }
  0x27   : > { %300 = vst.msk [vmem:[%s458_s25 + $0x78] sm:$0xff] %vm284_vm0, %v283_v18 }
  0x28 PF: > { %s13_s12 = sadd.s32 1, %s384_s12  }
  0x29   : > { %p10_p4 = scmp.ge.s32.totalorder %s13_s12, 4  }
  0x2b   :  { %12 = sbr.rel (!%p10_p4) target bundleno = 1 (0x1), region = 62 }

// kernel: discriminator_forward.9
= control target key start
LH: loop header
LB: loop body
LE: loop exit
PB: predicated region body
PF: predicated region fallthrough
CT: control target
= control target key end

     0   :  { %s1574_s15 = smov 0   ;;  %s1576_s16 = smov 0   ;;  %s1846_s0 = inlined_call_operand.vmem [shape: bf16[256,512], index: 0, kind: input, shape index: {}]   ;;  %s1847_s1 = inlined_call_operand.vmem [shape: bf16[512,128], index: 1, kind: input, shape index: {}]   ;;  %s1848_s2 = inlined_call_operand.vmem [shape: f32[1,128], index: 2, kind: input, shape index: {}]   ;;  %s1849_s3 = inlined_call_operand.vmem [shape: f32[256,16], index: 3, kind: output, shape index: {0}]   ;;  %s1850_s4 = inlined_call_operand.vmem [shape: f32[2,2,128], index: 4, kind: output, shape index: {1}]  }
   0x1   :  { %s1578_s17 = smov 0  }
   0x2 LB: > { %s27_s18 = sadd.s32 1, %s1543_s16  ;;  %p1218_p0 = scmp.ge.s32.totalorder %s1547_s17, 1  ;;  %s1547_s17 = sphi %s1578_s17, %s15_s17   ;;  %s1543_s16 = sphi %s1576_s16, %s1852_s16   ;;  %s1539_s15 = sphi %s1574_s15, %s1851_s15  }
   0x3   : > { %p29_p1 = scmp.ge.s32.totalorder %s27_s18, 2  ;;  %p197_p2 = scmp.lt.s32.totalorder %s1547_s17, 3 }
   0x5   : > { %s1854_s18 = smov (%p29_p1, %s27_s18), 0  ;;  %p198_p3 = pnand %p1218_p0, %p197_p2 }
   0x6   : > { %s1219_s29 = sshll.u32 (!%p198_p3), %s1539_s15, 4  ;;  %p261_p5 = scmp.lt.s32.totalorder (!%p198_p3), %s1539_s15, 1 }
   0x7   : > { %201 = sbr.rel (%p198_p3) target bundleno = 326 (0x146), region = 32  ;;  %p239_p4 = scmp.lt.s32.totalorder (!%p198_p3), %s1219_s29, 31 }
   0xc   : > { %v1445_v0 = vld [vmem:[%s1847_s1 + $0x78] sm:$0xff]   ;;  %v1449_v4 = vld [vmem:[%s1847_s1 + $0x70] sm:$0xff]   ;;  %v1453_v8 = vld [vmem:[%s1847_s1 + $0x68] sm:$0xff]   ;;  %s1856_s29 = smov (!%p239_p4, %s1219_s29), 31  ;;  %vm1018_vm0 = vcmask 130048   ;;  %s1858_s15 = smov (!%p261_p5, %s1539_s15), 1 }
   0xd   : > { %v1446_v1 = vld [vmem:[%s1847_s1 + $0xf8] sm:$0xff]   ;;  %1293 = vmatprep.subr.bf16.mxu0 %v1445_v0  ;;  %v1450_v5 = vld [vmem:[%s1847_s1 + $0xf0] sm:$0xff]   ;;  %v1454_v9 = vld [vmem:[%s1847_s1 + $0xe8] sm:$0xff]   ;;  %s1292_s5 = sshll.u32 %s1856_s29, 4  ;;  %s1223_s23 = sshll.u32 %s1856_s29, 3  ;;  %vm1093_vm1 = vcmask 1040384  }
   0xe   : > { %v1447_v2 = vld [vmem:[%s1847_s1 + $0x38] sm:$0xff]   ;;  %1357 = vmatprep.subr.bf16.mxu1 %v1446_v1  ;;  %v1451_v6 = vld [vmem:[%s1847_s1 + $0x30] sm:$0xff]   ;;  %v1455_v10 = vld [vmem:[%s1847_s1 + $0x28] sm:$0xff]   ;;  %s1691_s14 = scalar_lea.vmem %s1846_s0, %s1292_s5  ;;  %s1740_s28 = scalar_lea.vmem %s1849_s3, %s1223_s23 }
   0xf   : > { %v1448_v3 = vld [vmem:[%s1847_s1 + $0xb8] sm:$0xff]   ;;  %1294 = vmatpush3.bf16.msra.mxu0 %v1447_v2  ;;  %v1452_v7 = vld [vmem:[%s1847_s1 + $0xb0] sm:$0xff]   ;;  %v1456_v11 = vld [vmem:[%s1847_s1 + $0xa8] sm:$0xff]   ;;  %s1224_s29 = sshll.u32 %s1858_s15, 1 }
  0x10   : > { %1358 = vmatpush3.bf16.msra.mxu1 %v1448_v3  ;;  %1295 = vmatprep.subr.bf16.mxu0 %v1449_v4  ;;  %v1457_v12 = vld [vmem:[%s1847_s1 + $0x60] sm:$0xff]   ;;  %v1461_v16 = vld [vmem:[%s1847_s1 + $0x58] sm:$0xff]   ;;  %v1465_v20 = vld [vmem:[%s1847_s1 + $0x50] sm:$0xff]   ;;  %s264_s6 = scalar_lea.vmem %s1850_s4, %s1224_s29 }
  0x11   : > { %1359 = vmatprep.subr.bf16.mxu1 %v1450_v5  ;;  %v1458_v13 = vld [vmem:[%s1847_s1 + $0xe0] sm:$0xff]   ;;  %v1462_v17 = vld [vmem:[%s1847_s1 + $0xd8] sm:$0xff]   ;;  %v1466_v21 = vld [vmem:[%s1847_s1 + $0xd0] sm:$0xff]  }
  0x12   : > { %v1459_v14 = vld [vmem:[%s1847_s1 + $0x20] sm:$0xff]   ;;  %v1463_v18 = vld [vmem:[%s1847_s1 + $0x18] sm:$0xff]   ;;  %v1467_v22 = vld [vmem:[%s1847_s1 + $0x10] sm:$0xff]  }
  0x13   : > { %1296 = vmatpush3.bf16.msra.mxu0 %v1451_v6  ;;  %v1460_v15 = vld [vmem:[%s1847_s1 + $0xa0] sm:$0xff]   ;;  %v1464_v19 = vld [vmem:[%s1847_s1 + $0x98] sm:$0xff]   ;;  %v1468_v23 = vld [vmem:[%s1847_s1 + $0x90] sm:$0xff]  }
  0x14   : > { %1360 = vmatpush3.bf16.msra.mxu1 %v1452_v7  ;;  %1297 = vmatprep.subr.bf16.mxu0 %v1453_v8  ;;  %v1469_v24 = vld [vmem:[%s1847_s1 + $0x48] sm:$0xff]   ;;  %v1473_v28 = vld [vmem:[%s1847_s1 + $0x40] sm:$0xff]  }
  0x15   : > { %1361 = vmatprep.subr.bf16.mxu1 %v1454_v9  ;;  %v1470_v25 = vld [vmem:[%s1847_s1 + $0xc8] sm:$0xff]   ;;  %v1474_v29 = vld [vmem:[%s1847_s1 + $0xc0] sm:$0xff]  }
  0x16   : > { %v1471_v26 = vld [vmem:[%s1847_s1 + $0x8] sm:$0xff]   ;;  %v1475_v30 = vld [vmem:[%s1847_s1] sm:$0xff]  }
  0x17   : > { %1298 = vmatpush3.bf16.msra.mxu0 %v1455_v10  ;;  %v1472_v27 = vld [vmem:[%s1847_s1 + $0x88] sm:$0xff]   ;;  %v1476_v31 = vld [vmem:[%s1847_s1 + $0x80] sm:$0xff]  }
  0x18   : > { %1362 = vmatpush3.bf16.msra.mxu1 %v1456_v11  ;;  %1299 = vmatprep.subr.bf16.mxu0 %v1457_v12  ;;  %v1477_v32 = vld [vmem:[%s1691_s14] ss:$16 sps:$4 sm:$0xff]   ;;  %v1479_v33 = vld [vmem:[%s1691_s14 + $0x4] ss:$16 sps:$4 sm:$0xff]   ;;  %v1480_v34 = vld [vmem:[%s1691_s14 + $0x8] ss:$16 sps:$4 sm:$0xff]  }
  0x19   : > { %1363 = vmatprep.subr.bf16.mxu1 %v1458_v13  ;;  %v1482_v35 = vld [vmem:[%s1691_s14 + $0xc] ss:$16 sps:$4 sm:$0xff]   ;;  %782 = vmatprep.mubr.bf16.mxu0 %v1479_v33  ;;  %v1483_v36 = vld [vmem:[%s1691_s14 + $0x24] ss:$16 sps:$4 sm:$0xff]   ;;  %v1487_v38 = vld [vmem:[%s1691_s14 + $0x20] ss:$16 sps:$4 sm:$0xff]  }
  0x1a   : > { %879 = vmatprep.mubr.bf16.mxu1 %v1482_v35  ;;  %v1485_v37 = vld [vmem:[%s1691_s14 + $0x2c] ss:$16 sps:$4 sm:$0xff]   ;;  %v1488_v39 = vld [vmem:[%s1691_s14 + $0x28] ss:$16 sps:$4 sm:$0xff]   ;;  %v1489_v40 = vld [vmem:[%s1691_s14 + $0x44] ss:$16 sps:$4 sm:$0xff]  }
  0x1b   : > { %1300 = vmatpush3.bf16.msra.mxu0 %v1459_v14  ;;  %v1491_v41 = vld [vmem:[%s1691_s14 + $0x4c] ss:$16 sps:$4 sm:$0xff]   ;;  %v1493_v42 = vld [vmem:[%s1691_s14 + $0x40] ss:$16 sps:$4 sm:$0xff]   ;;  %v1494_v43 = vld [vmem:[%s1691_s14 + $0x48] ss:$16 sps:$4 sm:$0xff]  }
  0x1c   : > { %1364 = vmatpush3.bf16.msra.mxu1 %v1460_v15  ;;  %1301 = vmatprep.subr.bf16.mxu0 %v1461_v16  ;;  %v1495_v44 = vld [vmem:[%s1691_s14 + $0x64] ss:$16 sps:$4 sm:$0xff]   ;;  %v1497_v45 = vld [vmem:[%s1691_s14 + $0x6c] ss:$16 sps:$4 sm:$0xff]   ;;  %v1499_v46 = vld [vmem:[%s1691_s14 + $0x60] ss:$16 sps:$4 sm:$0xff]  }
  0x1d   : > { %1365 = vmatprep.subr.bf16.mxu1 %v1462_v17  ;;  %v1500_v47 = vld [vmem:[%s1691_s14 + $0x68] ss:$16 sps:$4 sm:$0xff]   ;;  %v1501_v48 = vld [vmem:[%s1691_s14 + $0x84] ss:$16 sps:$4 sm:$0xff]   ;;  %v1503_v49 = vld [vmem:[%s1691_s14 + $0x8c] ss:$16 sps:$4 sm:$0xff]  }
  0x1e   : > { %v1505_v50 = vld [vmem:[%s1691_s14 + $0x80] ss:$16 sps:$4 sm:$0xff]   ;;  %v1506_v51 = vld [vmem:[%s1691_s14 + $0x88] ss:$16 sps:$4 sm:$0xff]   ;;  %v1507_v52 = vld [vmem:[%s1691_s14 + $0xa4] ss:$16 sps:$4 sm:$0xff]  }
  0x1f   : > { %1302 = vmatpush3.bf16.msra.mxu0 %v1463_v18  ;;  %v1509_v53 = vld [vmem:[%s1691_s14 + $0xac] ss:$16 sps:$4 sm:$0xff]   ;;  %v1511_v54 = vld [vmem:[%s1691_s14 + $0xa0] ss:$16 sps:$4 sm:$0xff]   ;;  %v1512_v55 = vld [vmem:[%s1691_s14 + $0xa8] ss:$16 sps:$4 sm:$0xff]  }
  0x20   : > { %1366 = vmatpush3.bf16.msra.mxu1 %v1464_v19  ;;  %1303 = vmatprep.subr.bf16.mxu0 %v1465_v20  ;;  %v1513_v56 = vld [vmem:[%s1691_s14 + $0xc4] ss:$16 sps:$4 sm:$0xff]   ;;  %v1515_v57 = vld [vmem:[%s1691_s14 + $0xcc] ss:$16 sps:$4 sm:$0xff]   ;;  %v1517_v58 = vld [vmem:[%s1691_s14 + $0xc0] ss:$16 sps:$4 sm:$0xff]  }
  0x21   : > { %1367 = vmatprep.subr.bf16.mxu1 %v1466_v21  ;;  %v1518_v59 = vld [vmem:[%s1691_s14 + $0xc8] ss:$16 sps:$4 sm:$0xff]   ;;  %v1519_v60 = vld [vmem:[%s1691_s14 + $0xe4] ss:$16 sps:$4 sm:$0xff]   ;;  %v1521_v61 = vld [vmem:[%s1691_s14 + $0xec] ss:$16 sps:$4 sm:$0xff]  }
  0x22   : > { %v1523_v62 = vld [vmem:[%s1691_s14 + $0xe0] ss:$16 sps:$4 sm:$0xff]   ;;  %v1524_v63 = vld [vmem:[%s1691_s14 + $0xe8] ss:$16 sps:$4 sm:$0xff]  }
  0x23   : > { %1304 = vmatpush3.bf16.msra.mxu0 %v1467_v22  ;;  %v1735_v7 = vld [vmem:[%s1848_s2] ss:$0 sm:$0xff] }
  0x24   : > { %1368 = vmatpush3.bf16.msra.mxu1 %v1468_v23  ;;  %1305 = vmatprep.subr.bf16.mxu0 %v1469_v24 }
  0x25   : > { %1369 = vmatprep.subr.bf16.mxu1 %v1470_v25 }
  0x27   : > { %1306 = vmatpush3.bf16.msra.mxu0 %v1471_v26 }
  0x28   : > { %1370 = vmatpush3.bf16.msra.mxu1 %v1472_v27  ;;  %1307 = vmatprep.subr.bf16.mxu0 %v1473_v28 }
  0x29   : > { %1371 = vmatprep.subr.bf16.mxu1 %v1474_v29 }
  0x2b   : > { %1308 = vmatpush3.bf16.msra.mxu0 %v1475_v30 }
  0x2c   : > { %1372 = vmatpush3.bf16.msra.mxu1 %v1476_v31 }
  0x2e   : > { %783 = vmatmul.mubr.bf16.vlgmr.msra.gmra.mxu0 %v1477_v32 }
  0x2f   : > { %880 = vmatmul.mubr.bf16.vlgmr.msra.gmra.mxu1 %v1480_v34  ;;  %790 = vmatprep.mubr.bf16.mxu0 %v1483_v36 }
  0x30   : > { %887 = vmatprep.mubr.bf16.mxu1 %v1485_v37 }
  0x36   : > { %791 = vmatmul.mubr.bf16.gmra.mxu0 %v1487_v38 }
  0x37   : > { %888 = vmatmul.mubr.bf16.gmra.mxu1 %v1488_v39  ;;  %798 = vmatprep.mubr.bf16.mxu0 %v1489_v40 }
  0x38   : > { %895 = vmatprep.mubr.bf16.mxu1 %v1491_v41 }
  0x3e   : > { %799 = vmatmul.mubr.bf16.gmra.mxu0 %v1493_v42 }
  0x3f   : > { %896 = vmatmul.mubr.bf16.gmra.mxu1 %v1494_v43  ;;  %806 = vmatprep.mubr.bf16.mxu0 %v1495_v44 }
  0x40   : > { %903 = vmatprep.mubr.bf16.mxu1 %v1497_v45 }
  0x46   : > { %807 = vmatmul.mubr.bf16.gmra.mxu0 %v1499_v46 }
  0x47   : > { %904 = vmatmul.mubr.bf16.gmra.mxu1 %v1500_v47  ;;  %814 = vmatprep.mubr.bf16.mxu0 %v1501_v48 }
  0x48   : > { %911 = vmatprep.mubr.bf16.mxu1 %v1503_v49 }
  0x4e   : > { %815 = vmatmul.mubr.bf16.gmra.mxu0 %v1505_v50 }
  0x4f   : > { %912 = vmatmul.mubr.bf16.gmra.mxu1 %v1506_v51  ;;  %822 = vmatprep.mubr.bf16.mxu0 %v1507_v52 }
  0x50   : > { %919 = vmatprep.mubr.bf16.mxu1 %v1509_v53 }
  0x56   : > { %823 = vmatmul.mubr.bf16.gmra.mxu0 %v1511_v54 }
  0x57   : > { %920 = vmatmul.mubr.bf16.gmra.mxu1 %v1512_v55  ;;  %830 = vmatprep.mubr.bf16.mxu0 %v1513_v56 }
  0x58   : > { %927 = vmatprep.mubr.bf16.mxu1 %v1515_v57 }
  0x5e   : > { %831 = vmatmul.mubr.bf16.gmra.mxu0 %v1517_v58 }
  0x5f   : > { %928 = vmatmul.mubr.bf16.gmra.mxu1 %v1518_v59  ;;  %838 = vmatprep.mubr.bf16.mxu0 %v1519_v60 }
  0x60   : > { %935 = vmatprep.mubr.bf16.mxu1 %v1521_v61 }
  0x66   : > { %839 = vmatmul.mubr.bf16.gmra.mxu0 %v1523_v62 }
  0x67   : > { %936 = vmatmul.mubr.bf16.gmra.mxu1 %v1524_v63 }
  0xee   : > { %v1309_v0 = vpop.f32.mrf.mxu0 }
  0xef   : > { %v1373_v1 = vpop.f32.mrf.mxu1 }
  0xf0   : > { %v1310_v2 = vpop.f32.mrf.mxu0 }
  0xf1   : > { %v1311_v3 = vadd.f32 %v1310_v2, %v1309_v0  ;;  %v1374_v4 = vpop.f32.mrf.mxu1 }
  0xf2   : > { %v1375_v5 = vadd.f32 %v1374_v4, %v1373_v1  ;;  %v1312_v6 = vpop.f32.mrf.mxu0 }
  0xf3   : > { %v1376_v8 = vpop.f32.mrf.mxu1 }
  0xf4   : > { %v882_v9 = vadd.f32 %v1375_v5, %v1311_v3  ;;  %v1313_v10 = vpop.f32.mrf.mxu0 }
  0xf5   : > { %v1314_v11 = vadd.f32 %v1313_v10, %v1312_v6  ;;  %v1377_v12 = vpop.f32.mrf.mxu1 }
  0xf6   : > { %v1743_v13 = vadd.f32 %v1735_v7, %v882_v9  ;;  %v1378_v14 = vadd.f32 %v1377_v12, %v1376_v8  ;;  %v1315_v15 = vpop.f32.mrf.mxu0 }
  0xf7   : > { %v1379_v16 = vpop.f32.mrf.mxu1 }
  0xf8   : > { %1019 = vst.msk [vmem:[%s1740_s28] sm:$0xff] %vm1018_vm0, %v1743_v13  ;;  %v885_v17 = vadd.f32 %v1378_v14, %v1314_v11  ;;  %v1316_v18 = vpop.f32.mrf.mxu0 }
  0xf9   : > { %v1317_v19 = vadd.f32 %v1316_v18, %v1315_v15  ;;  %v1380_v20 = vpop.f32.mrf.mxu1 }
  0xfa   : > { %v1749_v21 = vadd.f32 %v1735_v7, %v885_v17  ;;  %v1381_v22 = vadd.f32 %v1380_v20, %v1379_v16  ;;  %v1318_v23 = vpop.f32.mrf.mxu0 }
  0xfb   : > { %v1382_v24 = vpop.f32.mrf.mxu1 }
  0xfc   : > { %1020 = vst.msk [vmem:[%s1740_s28 + $0x8] sm:$0xff] %vm1018_vm0, %v1749_v21  ;;  %v890_v25 = vadd.f32 %v1381_v22, %v1317_v19  ;;  %v1319_v26 = vpop.f32.mrf.mxu0  ;;  %v1057_v12 = vmul.f32 %v1749_v21, %v1749_v21  ;;  %v1056_v19 = vmul.f32 %v1743_v13, %v1743_v13 }
  0xfd   : > { %v1320_v27 = vadd.f32 %v1319_v26, %v1318_v23  ;;  %v1383_v28 = vpop.f32.mrf.mxu1  ;;  %v1035_v23 = vadd.f32 %v1749_v21, %v1743_v13 }
  0xfe   : > { %v1755_v29 = vadd.f32 %v1735_v7, %v890_v25  ;;  %v1384_v30 = vadd.f32 %v1383_v28, %v1382_v24  ;;  %v1321_v31 = vpop.f32.mrf.mxu0  ;;  %v1072_v26 = vadd.f32 %v1057_v12, %v1056_v19 }
  0xff   : > { %v1385_v32 = vpop.f32.mrf.mxu1 }
 0x100   : > { %1021 = vst.msk [vmem:[%s1740_s28 + $0x10] sm:$0xff] %vm1018_vm0, %v1755_v29  ;;  %v893_v33 = vadd.f32 %v1384_v30, %v1320_v27  ;;  %v1322_v34 = vpop.f32.mrf.mxu0  ;;  %v1058_v20 = vmul.f32 %v1755_v29, %v1755_v29 }
 0x101   : > { %v1323_v35 = vadd.f32 %v1322_v34, %v1321_v31  ;;  %v1386_v36 = vpop.f32.mrf.mxu1  ;;  %v1036_v31 = vadd.f32 %v1035_v23, %v1755_v29 }
 0x102   : > { %v1761_v37 = vadd.f32 %v1735_v7, %v893_v33  ;;  %v1387_v38 = vadd.f32 %v1386_v36, %v1385_v32  ;;  %v1324_v39 = vpop.f32.mrf.mxu0 }
 0x103   : > { %v1388_v40 = vpop.f32.mrf.mxu1 }
 0x104   : > { %1022 = vst.msk [vmem:[%s1740_s28 + $0x18] sm:$0xff] %vm1018_vm0, %v1761_v37  ;;  %v898_v41 = vadd.f32 %v1387_v38, %v1323_v35  ;;  %v1325_v42 = vpop.f32.mrf.mxu0  ;;  %v1059_v27 = vmul.f32 %v1761_v37, %v1761_v37  ;;  %v1073_v35 = vadd.f32 %v1072_v26, %v1058_v20  ;;  %v1037_v36 = vadd.f32 %v1036_v31, %v1761_v37 }
 0x105   : > { %v1326_v43 = vadd.f32 %v1325_v42, %v1324_v39  ;;  %v1389_v44 = vpop.f32.mrf.mxu1 }
 0x106   : > { %v1767_v45 = vadd.f32 %v1735_v7, %v898_v41  ;;  %v1390_v46 = vadd.f32 %v1389_v44, %v1388_v40  ;;  %v1327_v47 = vpop.f32.mrf.mxu0  ;;  %v1074_v40 = vadd.f32 %v1073_v35, %v1059_v27 }
 0x107   : > { %v1391_v48 = vpop.f32.mrf.mxu1 }
 0x108   : > { %1023 = vst.msk [vmem:[%s1740_s28 + $0x20] sm:$0xff] %vm1018_vm0, %v1767_v45  ;;  %v901_v49 = vadd.f32 %v1390_v46, %v1326_v43  ;;  %v1328_v50 = vpop.f32.mrf.mxu0  ;;  %v1060_v13 = vmul.f32 %v1767_v45, %v1767_v45  ;;  %v1038_v43 = vadd.f32 %v1037_v36, %v1767_v45 }
 0x109   : > { %v1329_v51 = vadd.f32 %v1328_v50, %v1327_v47  ;;  %v1392_v52 = vpop.f32.mrf.mxu1 }
 0x10a   : > { %v1773_v53 = vadd.f32 %v1735_v7, %v901_v49  ;;  %v1393_v54 = vadd.f32 %v1392_v52, %v1391_v48  ;;  %v1330_v55 = vpop.f32.mrf.mxu0  ;;  %v1075_v48 = vadd.f32 %v1074_v40, %v1060_v13 }
 0x10b   : > { %v1394_v56 = vpop.f32.mrf.mxu1 }
 0x10c   : > { %1024 = vst.msk [vmem:[%s1740_s28 + $0x28] sm:$0xff] %vm1018_vm0, %v1773_v53  ;;  %v906_v57 = vadd.f32 %v1393_v54, %v1329_v51  ;;  %v1331_v58 = vpop.f32.mrf.mxu0  ;;  %v1061_v29 = vmul.f32 %v1773_v53, %v1773_v53  ;;  %v1039_v50 = vadd.f32 %v1038_v43, %v1773_v53 }
 0x10d   : > { %v1332_v59 = vadd.f32 %v1331_v58, %v1330_v55  ;;  %v1395_v60 = vpop.f32.mrf.mxu1 }
 0x10e   : > { %v1779_v61 = vadd.f32 %v1735_v7, %v906_v57  ;;  %v1396_v62 = vadd.f32 %v1395_v60, %v1394_v56  ;;  %v1333_v63 = vpop.f32.mrf.mxu0  ;;  %v1076_v54 = vadd.f32 %v1075_v48, %v1061_v29 }
 0x10f   : > { %v1397_v0 = vpop.f32.mrf.mxu1 }
 0x110   : > { %1025 = vst.msk [vmem:[%s1740_s28 + $0x30] sm:$0xff] %vm1018_vm0, %v1779_v61  ;;  %v909_v1 = vadd.f32 %v1396_v62, %v1332_v59  ;;  %v1334_v2 = vpop.f32.mrf.mxu0  ;;  %v1062_v37 = vmul.f32 %v1779_v61, %v1779_v61  ;;  %v1040_v57 = vadd.f32 %v1039_v50, %v1779_v61 }
 0x111   : > { %v1335_v3 = vadd.f32 %v1334_v2, %v1333_v63  ;;  %v1398_v4 = vpop.f32.mrf.mxu1 }
 0x112   : > { %v1009_v5 = vadd.f32 %v1735_v7, %v909_v1  ;;  %v1399_v6 = vadd.f32 %v1398_v4, %v1397_v0  ;;  %v1336_v8 = vpop.f32.mrf.mxu0  ;;  %v1077_v62 = vadd.f32 %v1076_v54, %v1062_v37 }
 0x113   : > { %v1400_v9 = vpop.f32.mrf.mxu1 }
 0x114   : > { %1026 = vst.msk [vmem:[%s1740_s28 + $0x38] sm:$0xff] %vm1018_vm0, %v1009_v5  ;;  %v914_v10 = vadd.f32 %v1399_v6, %v1335_v3  ;;  %v1337_v11 = vpop.f32.mrf.mxu0  ;;  %v1063_v55 = vmul.f32 %v1009_v5, %v1009_v5  ;;  %v1041_v1 = vadd.f32 %v1040_v57, %v1009_v5 }
 0x115   : > { %v1338_v14 = vadd.f32 %v1337_v11, %v1336_v8  ;;  %v1401_v15 = vpop.f32.mrf.mxu1 }
 0x116   : > { %v1010_v16 = vadd.f32 %v1735_v7, %v914_v10  ;;  %v1402_v17 = vadd.f32 %v1401_v15, %v1400_v9  ;;  %v1339_v18 = vpop.f32.mrf.mxu0  ;;  %v1078_v3 = vadd.f32 %v1077_v62, %v1063_v55 }
 0x117   : > { %v1403_v22 = vpop.f32.mrf.mxu1 }
 0x118   : > { %1027 = vst.msk [vmem:[%s1740_s28 + $0x40] sm:$0xff] %vm1018_vm0, %v1010_v16  ;;  %v917_v24 = vadd.f32 %v1402_v17, %v1338_v14  ;;  %v1340_v25 = vpop.f32.mrf.mxu0  ;;  %v1064_v63 = vmul.f32 %v1010_v16, %v1010_v16  ;;  %v1042_v9 = vadd.f32 %v1041_v1, %v1010_v16 }
 0x119   : > { %v1341_v28 = vadd.f32 %v1340_v25, %v1339_v18  ;;  %v1404_v30 = vpop.f32.mrf.mxu1 }
 0x11a   : > { %v1011_v32 = vadd.f32 %v1735_v7, %v917_v24  ;;  %v1405_v33 = vadd.f32 %v1404_v30, %v1403_v22  ;;  %v1342_v34 = vpop.f32.mrf.mxu0  ;;  %v1079_v12 = vadd.f32 %v1078_v3, %v1064_v63 }
 0x11b   : > { %v1406_v21 = vpop.f32.mrf.mxu1 }
 0x11c   : > { %1028 = vst.msk [vmem:[%s1740_s28 + $0x48] sm:$0xff] %vm1018_vm0, %v1011_v32  ;;  %v922_v38 = vadd.f32 %v1405_v33, %v1341_v28  ;;  %v1343_v39 = vpop.f32.mrf.mxu0  ;;  %v1065_v4 = vmul.f32 %v1011_v32, %v1011_v32  ;;  %v1043_v17 = vadd.f32 %v1042_v9, %v1011_v32 }
 0x11d   : > { %v1344_v41 = vadd.f32 %v1343_v39, %v1342_v34  ;;  %v1407_v42 = vpop.f32.mrf.mxu1 }
 0x11e   : > { %v1012_v44 = vadd.f32 %v1735_v7, %v922_v38  ;;  %v1408_v46 = vadd.f32 %v1407_v42, %v1406_v21  ;;  %v1345_v47 = vpop.f32.mrf.mxu0  ;;  %v1080_v19 = vadd.f32 %v1079_v12, %v1065_v4 }
 0x11f   : > { %v1409_v49 = vpop.f32.mrf.mxu1 }
 0x120   : > { %1029 = vst.msk [vmem:[%s1740_s28 + $0x50] sm:$0xff] %vm1018_vm0, %v1012_v44  ;;  %v925_v51 = vadd.f32 %v1408_v46, %v1344_v41  ;;  %v1346_v52 = vpop.f32.mrf.mxu0  ;;  %v1066_v14 = vmul.f32 %v1012_v44, %v1012_v44  ;;  %v1044_v24 = vadd.f32 %v1043_v17, %v1012_v44 }
 0x121   : > { %v1347_v56 = vadd.f32 %v1346_v52, %v1345_v47  ;;  %v1410_v45 = vpop.f32.mrf.mxu1 }
 0x122   : > { %v1013_v58 = vadd.f32 %v1735_v7, %v925_v51  ;;  %v1411_v59 = vadd.f32 %v1410_v45, %v1409_v49  ;;  %v1348_v60 = vpop.f32.mrf.mxu0  ;;  %v1081_v27 = vadd.f32 %v1080_v19, %v1066_v14 }
 0x123   : > { %v1412_v0 = vpop.f32.mrf.mxu1 }
 0x124   : > { %1030 = vst.msk [vmem:[%s1740_s28 + $0x58] sm:$0xff] %vm1018_vm0, %v1013_v58  ;;  %v930_v53 = vadd.f32 %v1411_v59, %v1347_v56  ;;  %v1349_v2 = vpop.f32.mrf.mxu0  ;;  %v1067_v20 = vmul.f32 %v1013_v58, %v1013_v58  ;;  %v1045_v30 = vadd.f32 %v1044_v24, %v1013_v58 }
 0x125   : > { %v1350_v6 = vadd.f32 %v1349_v2, %v1348_v60  ;;  %v1413_v8 = vpop.f32.mrf.mxu1 }
 0x126   : > { %v1014_v61 = vadd.f32 %v1735_v7, %v930_v53  ;;  %v1414_v10 = vadd.f32 %v1413_v8, %v1412_v0  ;;  %v1351_v11 = vpop.f32.mrf.mxu0  ;;  %v1082_v34 = vadd.f32 %v1081_v27, %v1067_v20 }
 0x127   : > { %v1415_v15 = vpop.f32.mrf.mxu1 }
 0x128   : > { %1031 = vst.msk [vmem:[%s1740_s28 + $0x60] sm:$0xff] %vm1018_vm0, %v1014_v61  ;;  %v933_v5 = vadd.f32 %v1414_v10, %v1350_v6  ;;  %v1352_v18 = vpop.f32.mrf.mxu0  ;;  %v1068_v31 = vmul.f32 %v1014_v61, %v1014_v61  ;;  %v1046_v21 = vadd.f32 %v1045_v30, %v1014_v61 }
 0x129   : > { %v1353_v22 = vadd.f32 %v1352_v18, %v1351_v11  ;;  %v1416_v23 = vpop.f32.mrf.mxu1 }
 0x12a   : > { %v1015_v16 = vadd.f32 %v1735_v7, %v933_v5  ;;  %v1417_v25 = vadd.f32 %v1416_v23, %v1415_v15  ;;  %v1354_v26 = vpop.f32.mrf.mxu0  ;;  %v1083_v40 = vadd.f32 %v1082_v34, %v1068_v31 }
 0x12b   : > { %v1418_v28 = vpop.f32.mrf.mxu1 }
 0x12c   : > { %1032 = vst.msk [vmem:[%s1740_s28 + $0x68] sm:$0xff] %vm1018_vm0, %v1015_v16  ;;  %v938_v32 = vadd.f32 %v1417_v25, %v1353_v22  ;;  %v1355_v33 = vpop.f32.mrf.mxu0  ;;  %v1069_v36 = vmul.f32 %v1015_v16, %v1015_v16  ;;  %v1047_v29 = vadd.f32 %v1046_v21, %v1015_v16 }
 0x12d   : > { %v1356_v35 = vadd.f32 %v1355_v33, %v1354_v26  ;;  %v1419_v13 = vpop.f32.mrf.mxu1 }
 0x12e   : > { %v1016_v38 = vadd.f32 %v1735_v7, %v938_v32  ;;  %v1420_v39 = vadd.f32 %v1419_v13, %v1418_v28  ;;  %v1084_v43 = vadd.f32 %v1083_v40, %v1069_v36 }
 0x130   : > { %1033 = vst.msk [vmem:[%s1740_s28 + $0x70] sm:$0xff] %vm1018_vm0, %v1016_v38  ;;  %v1070_v41 = vmul.f32 %v1016_v38, %v1016_v38  ;;  %v941_v42 = vadd.f32 %v1420_v39, %v1356_v35  ;;  %v1048_v44 = vadd.f32 %v1047_v29, %v1016_v38 }
 0x132   : > { %v1017_v46 = vadd.f32 %v1735_v7, %v941_v42  ;;  %v1085_v47 = vadd.f32 %v1084_v43, %v1070_v41 }
 0x134   : > { %1034 = vst.msk [vmem:[%s1740_s28 + $0x78] sm:$0xff] %vm1018_vm0, %v1017_v46  ;;  %v1049_v48 = vadd.f32 %v1048_v44, %v1017_v46  ;;  %v1071_v37 = vmul.f32 %v1017_v46, %v1017_v46 }
 0x136   : > { %v1050_v49 = vrot.slane %v1049_v48, 4  ;;  %v1086_v50 = vadd.f32 %v1085_v47, %v1071_v37 }
 0x138   : > { %v1051_v51 = vadd.f32 %v1050_v49, %v1049_v48  ;;  %v1087_v52 = vrot.slane %v1086_v50, 4 }
 0x13a   : > { %v1052_v54 = vrot.slane %v1051_v51, 2  ;;  %v1088_v55 = vadd.f32 %v1087_v52, %v1086_v50 }
 0x13c   : > { %v1053_v56 = vadd.f32 %v1052_v54, %v1051_v51  ;;  %v1089_v45 = vrot.slane %v1088_v55, 2 }
 0x13e   : > { %v1054_v57 = vrot.slane %v1053_v56, 1  ;;  %v1090_v58 = vadd.f32 %v1089_v45, %v1088_v55 }
 0x140   : > { %v1091_v59 = vrot.slane %v1090_v58, 1  ;;  %v1055_v7 = vadd.f32 %v1054_v57, %v1053_v56 }
 0x142   : > { %v1092_v60 = vadd.f32 %v1091_v59, %v1090_v58 }
 0x144   : > { %v1094_v62 = vsel %vm1093_vm1, %v1055_v7, %v1092_v60 }
 0x145   : > { %1095 = vst [vmem:[%s264_s6] sm:$0x3] %v1094_v62 }
 0x146 PF: > { %s15_s17 = sadd.s32 1, %s1547_s17   ;;  %s1851_s15 = smov %s1543_s16 }
 0x147   : > { %p12_p6 = scmp.ge.s32.totalorder %s15_s17, 4   ;;  %s1852_s16 = smov %s1854_s18 }
 0x149   :  { %14 = sbr.rel (!%p12_p6) target bundleno = 2 (0x2), region = 85 }

// kernel: discriminator_forward.12
= control target key start
LH: loop header
LB: loop body
LE: loop exit
PB: predicated region body
PF: predicated region fallthrough
CT: control target
= control target key end

     0   :  { %vm124_vm0 = vcmask 261120   ;;  %s322_s0 = inlined_call_operand.vmem [shape: f32[128,32], index: 0, kind: input, shape index: {}]   ;;  %s323_s1 = inlined_call_operand.vmem [shape: f32[1,32], index: 1, kind: input, shape index: {}]   ;;  %s324_s2 = inlined_call_operand.vmem [shape: f32[1,32], index: 2, kind: input, shape index: {}]   ;;  %s325_s3 = inlined_call_operand.vmem [shape: f32[128,32], index: 3, kind: output, shape index: {}]  }
   0x1   :  { %v14_v0 = vld [vmem:[%s322_s0] sm:$0xff]  ;;  %v15_v4 = vld [vmem:[%s322_s0 + $0x8] sm:$0xff]  ;;  %v16_v5 = vld [vmem:[%s322_s0 + $0x10] sm:$0xff] }
   0x2   :  { %v173_v1 = vld [vmem:[%s323_s1] ss:$0 sm:$0xff]  ;;  %v17_v6 = vld [vmem:[%s322_s0 + $0x18] sm:$0xff]  ;;  %v19_v11 = vld [vmem:[%s322_s0 + $0x28] sm:$0xff] }
   0x3   :  { %v178_v2 = vld [vmem:[%s324_s2] ss:$0 sm:$0xff]  ;;  %v37_v3 = vmul.f32 %v173_v1, %v14_v0  ;;  %v38_v7 = vmul.f32 %v173_v1, %v15_v4  ;;  %v39_v8 = vmul.f32 %v173_v1, %v16_v5  ;;  %v40_v9 = vmul.f32 %v173_v1, %v17_v6  ;;  %v20_v12 = vld [vmem:[%s322_s0 + $0x30] sm:$0xff]  ;;  %v21_v17 = vld [vmem:[%s322_s0 + $0x38] sm:$0xff] }
   0x4   :  { %v18_v10 = vld [vmem:[%s322_s0 + $0x20] sm:$0xff]  ;;  %v42_v15 = vmul.f32 %v173_v1, %v19_v11  ;;  %v43_v16 = vmul.f32 %v173_v1, %v20_v12  ;;  %v44_v21 = vmul.f32 %v173_v1, %v21_v17  ;;  %v23_v30 = vld [vmem:[%s322_s0 + $0x48] sm:$0xff]  ;;  %v24_v31 = vld [vmem:[%s322_s0 + $0x50] sm:$0xff] }
   0x5   :  { %v60_v13 = vadd.f32 %v178_v2, %v37_v3  ;;  %v41_v14 = vmul.f32 %v173_v1, %v18_v10  ;;  %v61_v18 = vadd.f32 %v178_v2, %v38_v7  ;;  %v62_v19 = vadd.f32 %v178_v2, %v39_v8  ;;  %v22_v25 = vld [vmem:[%s322_s0 + $0x40] sm:$0xff]  ;;  %v25_v43 = vld [vmem:[%s322_s0 + $0x58] sm:$0xff]  ;;  %v27_v45 = vld [vmem:[%s322_s0 + $0x68] sm:$0xff] }
   0x6   :  { %v63_v20 = vadd.f32 %v178_v2, %v40_v9  ;;  %v65_v24 = vadd.f32 %v178_v2, %v42_v15  ;;  %v66_v37 = vadd.f32 %v178_v2, %v43_v16  ;;  %v67_v38 = vadd.f32 %v178_v2, %v44_v21  ;;  %v26_v44 = vld [vmem:[%s322_s0 + $0x60] sm:$0xff]  ;;  %v28_v56 = vld [vmem:[%s322_s0 + $0x70] sm:$0xff]  ;;  %v29_v4 = vld [vmem:[%s322_s0 + $0x78] sm:$0xff] }
   0x7   :  { %vm76_vm1 = vcmp.gt.f32.partialorder %v60_v13, 0.0  ;;  %v92_v22 = vmul.f32 0.2, %v60_v13  ;;  %v64_v23 = vadd.f32 %v178_v2, %v41_v14  ;;  %vm77_vm2 = vcmp.gt.f32.partialorder %v61_v18, 0.0 }
   0x8   :  { %v93_v26 = vmul.f32 0.2, %v61_v18  ;;  %vm78_vm3 = vcmp.gt.f32.partialorder %v62_v19, 0.0  ;;  %v94_v27 = vmul.f32 0.2, %v62_v19  ;;  %vm79_vm4 = vcmp.gt.f32.partialorder %v63_v20, 0.0 }
   0x9   :  { %v108_v28 = vsel %vm76_vm1, %v60_v13, %v92_v22  ;;  %v95_v29 = vmul.f32 0.2, %v63_v20  ;;  %vm80_vm5 = vcmp.gt.f32.partialorder %v64_v23, 0.0  ;;  %v96_v34 = vmul.f32 0.2, %v64_v23 }
   0xa   :  { %125 = vst.msk [vmem:[%s325_s3] sm:$0xff] %vm124_vm0, %v108_v28  ;;  %v109_v32 = vsel %vm77_vm2, %v61_v18, %v93_v26  ;;  %v110_v33 = vsel %vm78_vm3, %v62_v19, %v94_v27  ;;  %vm81_vm6 = vcmp.gt.f32.partialorder %v65_v24, 0.0  ;;  %v97_v36 = vmul.f32 0.2, %v65_v24 }
   0xb   :  { %126 = vst.msk [vmem:[%s325_s3 + $0x8] sm:$0xff] %vm124_vm0, %v109_v32  ;;  %127 = vst.msk [vmem:[%s325_s3 + $0x10] sm:$0xff] %vm124_vm0, %v110_v33  ;;  %v111_v35 = vsel %vm79_vm4, %v63_v20, %v95_v29  ;;  %v112_v39 = vsel %vm80_vm5, %v64_v23, %v96_v34  ;;  %v45_v40 = vmul.f32 %v173_v1, %v22_v25  ;;  %vm82_vm7 = vcmp.gt.f32.partialorder %v66_v37, 0.0 }
   0xc   :  { %128 = vst.msk [vmem:[%s325_s3 + $0x18] sm:$0xff] %vm124_vm0, %v111_v35  ;;  %v46_v41 = vmul.f32 %v173_v1, %v23_v30  ;;  %v47_v42 = vmul.f32 %v173_v1, %v24_v31  ;;  %129 = vst.msk [vmem:[%s325_s3 + $0x20] sm:$0xff] %vm124_vm0, %v112_v39  ;;  %v113_v46 = vsel %vm81_vm6, %v65_v24, %v97_v36  ;;  %v98_v47 = vmul.f32 0.2, %v66_v37 }
   0xd   :  { %vm83_vm8 = vcmp.gt.f32.partialorder %v67_v38, 0.0  ;;  %130 = vst.msk [vmem:[%s325_s3 + $0x28] sm:$0xff] %vm124_vm0, %v113_v46  ;;  %v99_v48 = vmul.f32 0.2, %v67_v38  ;;  %v68_v49 = vadd.f32 %v178_v2, %v45_v40  ;;  %v48_v53 = vmul.f32 %v173_v1, %v25_v43 }
   0xe   :  { %v69_v50 = vadd.f32 %v178_v2, %v46_v41  ;;  %v70_v51 = vadd.f32 %v178_v2, %v47_v42  ;;  %v114_v52 = vsel %vm82_vm7, %v66_v37, %v98_v47  ;;  %v49_v54 = vmul.f32 %v173_v1, %v26_v44 }
   0xf   :  { %v50_v55 = vmul.f32 %v173_v1, %v27_v45  ;;  %131 = vst.msk [vmem:[%s325_s3 + $0x30] sm:$0xff] %vm124_vm0, %v114_v52  ;;  %v115_v57 = vsel %vm83_vm8, %v67_v38, %v99_v48  ;;  %vm84_vm9 = vcmp.gt.f32.partialorder %v68_v49, 0.0  ;;  %v100_v58 = vmul.f32 0.2, %v68_v49 }
  0x10   :  { %vm85_vm10 = vcmp.gt.f32.partialorder %v69_v50, 0.0  ;;  %132 = vst.msk [vmem:[%s325_s3 + $0x38] sm:$0xff] %vm124_vm0, %v115_v57  ;;  %v101_v59 = vmul.f32 0.2, %v69_v50  ;;  %vm86_vm11 = vcmp.gt.f32.partialorder %v70_v51, 0.0  ;;  %v71_v61 = vadd.f32 %v178_v2, %v48_v53 }
  0x11   :  { %v102_v60 = vmul.f32 0.2, %v70_v51  ;;  %v116_v62 = vsel %vm84_vm9, %v68_v49, %v100_v58  ;;  %v72_v63 = vadd.f32 %v178_v2, %v49_v54  ;;  %v73_v0 = vadd.f32 %v178_v2, %v50_v55 }
  0x12   :  { %v51_v3 = vmul.f32 %v173_v1, %v28_v56  ;;  %133 = vst.msk [vmem:[%s325_s3 + $0x40] sm:$0xff] %vm124_vm0, %v116_v62  ;;  %v117_v5 = vsel %vm85_vm10, %v69_v50, %v101_v59  ;;  %vm87_vm12 = vcmp.gt.f32.partialorder %v71_v61, 0.0  ;;  %v103_v7 = vmul.f32 0.2, %v71_v61 }
  0x13   :  { %v118_v6 = vsel %vm86_vm11, %v70_v51, %v102_v60  ;;  %134 = vst.msk [vmem:[%s325_s3 + $0x48] sm:$0xff] %vm124_vm0, %v117_v5  ;;  %vm88_vm13 = vcmp.gt.f32.partialorder %v72_v63, 0.0  ;;  %v104_v8 = vmul.f32 0.2, %v72_v63  ;;  %vm89_vm14 = vcmp.gt.f32.partialorder %v73_v0, 0.0 }
  0x14   :  { %135 = vst.msk [vmem:[%s325_s3 + $0x50] sm:$0xff] %vm124_vm0, %v118_v6  ;;  %v105_v9 = vmul.f32 0.2, %v73_v0  ;;  %v119_v10 = vsel %vm87_vm12, %v71_v61, %v103_v7  ;;  %v74_v11 = vadd.f32 %v178_v2, %v51_v3  ;;  %v52_v12 = vmul.f32 %v173_v1, %v29_v4 }
  0x15   :  { %136 = vst.msk [vmem:[%s325_s3 + $0x58] sm:$0xff] %vm124_vm0, %v119_v10  ;;  %v120_v13 = vsel %vm88_vm13, %v72_v63, %v104_v8 }
  0x16   :  { %v121_v14 = vsel %vm89_vm14, %v73_v0, %v105_v9  ;;  %137 = vst.msk [vmem:[%s325_s3 + $0x60] sm:$0xff] %vm124_vm0, %v120_v13  ;;  %vm90_vm15 = vcmp.gt.f32.partialorder %v74_v11, 0.0  ;;  %v106_v15 = vmul.f32 0.2, %v74_v11  ;;  %v75_v1 = vadd.f32 %v178_v2, %v52_v12 }
  0x17   :  { %138 = vst.msk [vmem:[%s325_s3 + $0x68] sm:$0xff] %vm124_vm0, %v121_v14 }
  0x18   :  { %v122_v16 = vsel %vm90_vm15, %v74_v11, %v106_v15  ;;  %vm91_vm1 = vcmp.gt.f32.partialorder %v75_v1, 0.0  ;;  %v107_v17 = vmul.f32 0.2, %v75_v1 }
  0x19   :  { %139 = vst.msk [vmem:[%s325_s3 + $0x70] sm:$0xff] %vm124_vm0, %v122_v16 }
  0x1a   :  { %v123_v18 = vsel %vm91_vm1, %v75_v1, %v107_v17 }
  0x1b   :  { %140 = vst.msk [vmem:[%s325_s3 + $0x78] sm:$0xff] %vm124_vm0, %v123_v18 }

// kernel: discriminator_forward.11
= control target key start
LH: loop header
LB: loop body
LE: loop exit
PB: predicated region body
PF: predicated region fallthrough
CT: control target
= control target key end

     0   :  { %s1674_s15 = smov 0   ;;  %s1676_s16 = smov 0   ;;  %s1947_s0 = inlined_call_operand.vmem [shape: bf16[128,1024], index: 0, kind: input, shape index: {}]   ;;  %s1948_s1 = inlined_call_operand.vmem [shape: bf16[1024,128], index: 1, kind: input, shape index: {}]   ;;  %s1949_s2 = inlined_call_operand.vmem [shape: f32[1,128], index: 2, kind: input, shape index: {}]   ;;  %s1950_s3 = inlined_call_operand.vmem [shape: f32[128,32], index: 3, kind: output, shape index: {0}]   ;;  %s1951_s4 = inlined_call_operand.vmem [shape: f32[1,2,128], index: 4, kind: output, shape index: {1}]  }
   0x1   :  { %s1678_s17 = smov 0   ;;  %s1680_s18 = smov 0  }
   0x2   :  { %s1682_s19 = smov 0  }
   0x3 LB: > { %s24_s20 = sadd.s32 1, %s1642_s18  ;;  %p43_p1 = scmp.ne.s32.totalorder %s1634_s16, %s1630_s15  ;;  %s1646_s19 = sphi %s1682_s19, %s15_s19   ;;  %s1642_s18 = sphi %s1680_s18, %s1955_s18   ;;  %s1638_s17 = sphi %s1678_s17, %s1954_s17   ;;  %s1634_s16 = sphi %s1676_s16, %s1953_s16   ;;  %s1630_s15 = sphi %s1674_s15, %s1952_s15  }
   0x4   : > { %p25_p0 = scmp.ge.s32.totalorder %s24_s20, 2  ;;  %p44_p2 = scmp.eq.s32.totalorder %s1646_s19, 0 }
   0x5   : > { %s36_s22 = sadd.s32 1, %s1634_s16  ;;  %p1278_p5 = scmp.ge.s32.totalorder %s1646_s19, 2 }
   0x6   : > { %s1957_s20 = smov (%p25_p0, %s24_s20), 0  ;;  %p45_p3 = por %p44_p2, %p43_p1 }
   0x7   : > { %s32_s21 = ssub.s32 %s1642_s18, %s1957_s20  ;;  %171 = sbr.rel (%p1278_p5) target bundleno = 32 (0x20), region = 20 }
   0x8   : > { %p34_p4 = scmp.eq.s32.totalorder %s32_s21, 0 }
   0xa   : > { %s1709_s23 = scalar_select %p34_p4, %s1634_s16, %s36_s22  }
   0xc   : > { %174 = sbr.rel (!%p45_p3) target bundleno = 32 (0x20), region = 24  ;;  %s176_s24 = sand.u32 (%p45_p3), 1, %s1634_s16  }
   0xd   : > { %s1358_s25 = sshll.u32 (%p45_p3), %s1642_s18, 4  ;;  %s1279_s26 = sshll.u32 (%p45_p3), %s176_s24, 8 }
   0xe   : > { %s1717_s29 = scalar_lea.vmem (%p45_p3), %s1947_s0, %s1358_s25  ;;  %s1722_s30 = scalar_lea.vmem (%p45_p3), [#allocation3], %s1279_s26 }
   0xf   : > { %v197_v0 = vld [vmem:[%s1717_s29] sm:$0xff] (%p45_p3)  ;;  %v199_v1 = vld [vmem:[%s1717_s29 + $0x8] sm:$0xff] (%p45_p3) }
  0x10   : > { %v201_v2 = vld [vmem:[%s1717_s29 + $0x20] sm:$0xff] (%p45_p3)  ;;  %198 = vst [vmem:[%s1722_s30] sm:$0xff] (%p45_p3), %v197_v0  ;;  %200 = vst [vmem:[%s1722_s30 + $0x8] sm:$0xff] (%p45_p3), %v199_v1  ;;  %v203_v3 = vld [vmem:[%s1717_s29 + $0x28] sm:$0xff] (%p45_p3) }
  0x11   : > { %202 = vst [vmem:[%s1722_s30 + $0x10] sm:$0xff] %v201_v2  ;;  %v205_v4 = vld [vmem:[%s1717_s29 + $0x40] sm:$0xff]  ;;  %v207_v5 = vld [vmem:[%s1717_s29 + $0x48] sm:$0xff]  ;;  %204 = vst [vmem:[%s1722_s30 + $0x18] sm:$0xff] %v203_v3 }
  0x12   : > { %206 = vst [vmem:[%s1722_s30 + $0x20] sm:$0xff] %v205_v4  ;;  %208 = vst [vmem:[%s1722_s30 + $0x28] sm:$0xff] %v207_v5  ;;  %v209_v6 = vld [vmem:[%s1717_s29 + $0x60] sm:$0xff]  ;;  %v211_v7 = vld [vmem:[%s1717_s29 + $0x68] sm:$0xff] }
  0x13   : > { %v213_v8 = vld [vmem:[%s1717_s29 + $0x80] sm:$0xff]  ;;  %210 = vst [vmem:[%s1722_s30 + $0x30] sm:$0xff] %v209_v6  ;;  %212 = vst [vmem:[%s1722_s30 + $0x38] sm:$0xff] %v211_v7  ;;  %v215_v9 = vld [vmem:[%s1717_s29 + $0x88] sm:$0xff] }
  0x14   : > { %214 = vst [vmem:[%s1722_s30 + $0x40] sm:$0xff] %v213_v8  ;;  %v217_v10 = vld [vmem:[%s1717_s29 + $0xa0] sm:$0xff]  ;;  %v219_v11 = vld [vmem:[%s1717_s29 + $0xa8] sm:$0xff]  ;;  %216 = vst [vmem:[%s1722_s30 + $0x48] sm:$0xff] %v215_v9 }
  0x15   : > { %218 = vst [vmem:[%s1722_s30 + $0x50] sm:$0xff] %v217_v10  ;;  %220 = vst [vmem:[%s1722_s30 + $0x58] sm:$0xff] %v219_v11  ;;  %v221_v12 = vld [vmem:[%s1717_s29 + $0xc0] sm:$0xff]  ;;  %v223_v13 = vld [vmem:[%s1717_s29 + $0xc8] sm:$0xff] }
  0x16   : > { %v225_v14 = vld [vmem:[%s1717_s29 + $0xe0] sm:$0xff]  ;;  %222 = vst [vmem:[%s1722_s30 + $0x60] sm:$0xff] %v221_v12  ;;  %224 = vst [vmem:[%s1722_s30 + $0x68] sm:$0xff] %v223_v13  ;;  %v227_v15 = vld [vmem:[%s1717_s29 + $0xe8] sm:$0xff] }
  0x17   : > { %226 = vst [vmem:[%s1722_s30 + $0x70] sm:$0xff] %v225_v14  ;;  %v229_v16 = vld [vmem:[%s1717_s29 + $0x100] sm:$0xff]  ;;  %v231_v17 = vld [vmem:[%s1717_s29 + $0x108] sm:$0xff]  ;;  %228 = vst [vmem:[%s1722_s30 + $0x78] sm:$0xff] %v227_v15 }
  0x18   : > { %230 = vst [vmem:[%s1722_s30 + $0x80] sm:$0xff] %v229_v16  ;;  %232 = vst [vmem:[%s1722_s30 + $0x88] sm:$0xff] %v231_v17  ;;  %v233_v18 = vld [vmem:[%s1717_s29 + $0x120] sm:$0xff]  ;;  %v235_v19 = vld [vmem:[%s1717_s29 + $0x128] sm:$0xff] }
  0x19   : > { %v237_v20 = vld [vmem:[%s1717_s29 + $0x140] sm:$0xff]  ;;  %234 = vst [vmem:[%s1722_s30 + $0x90] sm:$0xff] %v233_v18  ;;  %236 = vst [vmem:[%s1722_s30 + $0x98] sm:$0xff] %v235_v19  ;;  %v239_v21 = vld [vmem:[%s1717_s29 + $0x148] sm:$0xff] }
  0x1a   : > { %238 = vst [vmem:[%s1722_s30 + $0xa0] sm:$0xff] %v237_v20  ;;  %v241_v22 = vld [vmem:[%s1717_s29 + $0x160] sm:$0xff]  ;;  %v243_v23 = vld [vmem:[%s1717_s29 + $0x168] sm:$0xff]  ;;  %240 = vst [vmem:[%s1722_s30 + $0xa8] sm:$0xff] %v239_v21 }
  0x1b   : > { %242 = vst [vmem:[%s1722_s30 + $0xb0] sm:$0xff] %v241_v22  ;;  %244 = vst [vmem:[%s1722_s30 + $0xb8] sm:$0xff] %v243_v23  ;;  %v245_v24 = vld [vmem:[%s1717_s29 + $0x180] sm:$0xff]  ;;  %v247_v25 = vld [vmem:[%s1717_s29 + $0x188] sm:$0xff] }
  0x1c   : > { %v249_v26 = vld [vmem:[%s1717_s29 + $0x1a0] sm:$0xff]  ;;  %246 = vst [vmem:[%s1722_s30 + $0xc0] sm:$0xff] %v245_v24  ;;  %248 = vst [vmem:[%s1722_s30 + $0xc8] sm:$0xff] %v247_v25  ;;  %v251_v27 = vld [vmem:[%s1717_s29 + $0x1a8] sm:$0xff] }
  0x1d   : > { %250 = vst [vmem:[%s1722_s30 + $0xd0] sm:$0xff] %v249_v26  ;;  %v253_v28 = vld [vmem:[%s1717_s29 + $0x1c0] sm:$0xff]  ;;  %v255_v29 = vld [vmem:[%s1717_s29 + $0x1c8] sm:$0xff]  ;;  %252 = vst [vmem:[%s1722_s30 + $0xd8] sm:$0xff] %v251_v27 }
  0x1e   : > { %254 = vst [vmem:[%s1722_s30 + $0xe0] sm:$0xff] %v253_v28  ;;  %256 = vst [vmem:[%s1722_s30 + $0xe8] sm:$0xff] %v255_v29  ;;  %v257_v30 = vld [vmem:[%s1717_s29 + $0x1e0] sm:$0xff]  ;;  %v259_v31 = vld [vmem:[%s1717_s29 + $0x1e8] sm:$0xff] }
  0x1f   : > { %258 = vst [vmem:[%s1722_s30 + $0xf0] sm:$0xff] %v257_v30  ;;  %260 = vst [vmem:[%s1722_s30 + $0xf8] sm:$0xff] %v259_v31 }
  0x20 PF: > { %p1282_p6 = scmp.ge.s32.totalorder %s1646_s19, 1  ;;  %p274_p7 = scmp.lt.s32.totalorder %s1646_s19, 3 }
  0x22   : > { %p275_p8 = pnand %p1282_p6, %p274_p7 }
  0x23   : > { %s281_s5 = sand.u32 (!%p275_p8), 1, %s1630_s15   ;;  %s1284_s6 = sshll.u32 (!%p275_p8), %s1638_s17, 6 }
  0x24   : > { %278 = sbr.rel (%p275_p8) target bundleno = 402 (0x192), region = 51  ;;  %s1283_s7 = sshll.u32 (!%p275_p8), %s281_s5, 8 }
  0x25   : > { %p318_p9 = scmp.lt.s32.totalorder (!%p275_p8), %s1284_s6, 127  ;;  %s1794_s12 = scalar_lea.vmem (!%p275_p8), [#allocation3], %s1283_s7 }
  0x26   : > { %p1286_p10 = scmp.ne.s32.totalorder (!%p275_p8), %s1638_s17, 0 }
  0x29   : > { %s1959_s6 = smov (!%p318_p9, %s1284_s6), 127  ;;  %337 = sbr.rel (%p1286_p10) target bundleno = 55 (0x37), region = 59 }
  0x2a   : > { %s1285_s8 = sshll.u32 %s1959_s6, 2 }
  0x2b   : > { %s1792_s11 = scalar_lea.vmem %s1948_s1, %s1285_s8 }
  0x2e   : > { %v1648_v32 = vmov 0.0  }
  0x2f   : > { %338 = vst [vmem:[#allocation2 + $0x30] sm:$0xff] %v1648_v32  ;;  %339 = vst [vmem:[#allocation2] sm:$0xff] %v1648_v32 }
  0x30   : > { %340 = vst [vmem:[#allocation2 + $0x58] sm:$0xff] %v1648_v32  ;;  %341 = vst [vmem:[#allocation2 + $0x18] sm:$0xff] %v1648_v32 }
  0x31   : > { %342 = vst [vmem:[#allocation2 + $0x50] sm:$0xff] %v1648_v32  ;;  %343 = vst [vmem:[#allocation2 + $0x68] sm:$0xff] %v1648_v32 }
  0x32   : > { %344 = vst [vmem:[#allocation2 + $0x8] sm:$0xff] %v1648_v32  ;;  %345 = vst [vmem:[#allocation2 + $0x48] sm:$0xff] %v1648_v32 }
  0x33   : > { %346 = vst [vmem:[#allocation2 + $0x40] sm:$0xff] %v1648_v32  ;;  %347 = vst [vmem:[#allocation2 + $0x20] sm:$0xff] %v1648_v32 }
  0x34   : > { %348 = vst [vmem:[#allocation2 + $0x10] sm:$0xff] %v1648_v32  ;;  %349 = vst [vmem:[#allocation2 + $0x38] sm:$0xff] %v1648_v32 }
  0x35   : > { %350 = vst [vmem:[#allocation2 + $0x60] sm:$0xff] %v1648_v32  ;;  %351 = vst [vmem:[#allocation2 + $0x70] sm:$0xff] %v1648_v32 }
  0x36   : > { %352 = vst [vmem:[#allocation2 + $0x78] sm:$0xff] %v1648_v32  ;;  %353 = vst [vmem:[#allocation2 + $0x28] sm:$0xff] %v1648_v32 }
  0x37 PF: > { %v1528_v33 = vld [vmem:[%s1792_s11 + $0x78] sm:$0xff]   ;;  %v1532_v37 = vld [vmem:[%s1792_s11 + $0x70] sm:$0xff]   ;;  %v1536_v41 = vld [vmem:[%s1792_s11 + $0x68] sm:$0xff]   ;;  %p1351_p11 = scmp.ne.s32.totalorder %s1638_s17, 1 }
  0x38   : > { %v1529_v34 = vld [vmem:[%s1792_s11 + $0xf8] sm:$0xff]   ;;  %1359 = vmatprep.subr.bf16.mxu0 %v1528_v33  ;;  %v1533_v38 = vld [vmem:[%s1792_s11 + $0xf0] sm:$0xff]   ;;  %v1537_v42 = vld [vmem:[%s1792_s11 + $0xe8] sm:$0xff]  }
  0x39   : > { %v1530_v35 = vld [vmem:[%s1792_s11 + $0x38] sm:$0xff]   ;;  %1423 = vmatprep.subr.bf16.mxu1 %v1529_v34  ;;  %v1534_v39 = vld [vmem:[%s1792_s11 + $0x30] sm:$0xff]   ;;  %v1538_v43 = vld [vmem:[%s1792_s11 + $0x28] sm:$0xff]  }
  0x3a   : > { %v1531_v36 = vld [vmem:[%s1792_s11 + $0xb8] sm:$0xff]   ;;  %1360 = vmatpush3.bf16.msra.mxu0 %v1530_v35  ;;  %v1535_v40 = vld [vmem:[%s1792_s11 + $0xb0] sm:$0xff]   ;;  %v1539_v44 = vld [vmem:[%s1792_s11 + $0xa8] sm:$0xff]  }
  0x3b   : > { %1424 = vmatpush3.bf16.msra.mxu1 %v1531_v36  ;;  %1361 = vmatprep.subr.bf16.mxu0 %v1532_v37  ;;  %v1540_v45 = vld [vmem:[%s1792_s11 + $0x60] sm:$0xff]   ;;  %v1544_v49 = vld [vmem:[%s1792_s11 + $0x58] sm:$0xff]   ;;  %v1548_v53 = vld [vmem:[%s1792_s11 + $0x50] sm:$0xff]  }
  0x3c   : > { %1425 = vmatprep.subr.bf16.mxu1 %v1533_v38  ;;  %v1541_v46 = vld [vmem:[%s1792_s11 + $0xe0] sm:$0xff]   ;;  %v1545_v50 = vld [vmem:[%s1792_s11 + $0xd8] sm:$0xff]   ;;  %v1549_v54 = vld [vmem:[%s1792_s11 + $0xd0] sm:$0xff]  }
  0x3d   : > { %v1542_v47 = vld [vmem:[%s1792_s11 + $0x20] sm:$0xff]   ;;  %v1546_v51 = vld [vmem:[%s1792_s11 + $0x18] sm:$0xff]   ;;  %v1550_v55 = vld [vmem:[%s1792_s11 + $0x10] sm:$0xff]  }
  0x3e   : > { %1362 = vmatpush3.bf16.msra.mxu0 %v1534_v39  ;;  %v1543_v48 = vld [vmem:[%s1792_s11 + $0xa0] sm:$0xff]   ;;  %v1547_v52 = vld [vmem:[%s1792_s11 + $0x98] sm:$0xff]   ;;  %v1551_v56 = vld [vmem:[%s1792_s11 + $0x90] sm:$0xff]  }
  0x3f   : > { %1426 = vmatpush3.bf16.msra.mxu1 %v1535_v40  ;;  %1363 = vmatprep.subr.bf16.mxu0 %v1536_v41  ;;  %v1552_v57 = vld [vmem:[%s1792_s11 + $0x48] sm:$0xff]   ;;  %v1556_v61 = vld [vmem:[%s1792_s11 + $0x40] sm:$0xff]   ;;  %v354_v40 = vld [vmem:[#allocation2 + $0x30] sm:$0xff] }
  0x40   : > { %1427 = vmatprep.subr.bf16.mxu1 %v1537_v42  ;;  %v1553_v58 = vld [vmem:[%s1792_s11 + $0xc8] sm:$0xff]   ;;  %v1557_v62 = vld [vmem:[%s1792_s11 + $0xc0] sm:$0xff]  }
  0x41   : > { %v1554_v59 = vld [vmem:[%s1792_s11 + $0x8] sm:$0xff]   ;;  %v1558_v63 = vld [vmem:[%s1792_s11] sm:$0xff]  }
  0x42   : > { %1364 = vmatpush3.bf16.msra.mxu0 %v1538_v43  ;;  %v1555_v60 = vld [vmem:[%s1792_s11 + $0x88] sm:$0xff]   ;;  %v1559_v0 = vld [vmem:[%s1792_s11 + $0x80] sm:$0xff]  }
  0x43   : > { %1428 = vmatpush3.bf16.msra.mxu1 %v1539_v44  ;;  %1365 = vmatprep.subr.bf16.mxu0 %v1540_v45  ;;  %v1560_v1 = vld [vmem:[%s1794_s12] ss:$16 sps:$4 sm:$0xff]   ;;  %v1562_v2 = vld [vmem:[%s1794_s12 + $0x4] ss:$16 sps:$4 sm:$0xff]   ;;  %v1563_v3 = vld [vmem:[%s1794_s12 + $0x8] ss:$16 sps:$4 sm:$0xff]  }
  0x44   : > { %1429 = vmatprep.subr.bf16.mxu1 %v1541_v46  ;;  %v1565_v4 = vld [vmem:[%s1794_s12 + $0xc] ss:$16 sps:$4 sm:$0xff]   ;;  %850 = vmatprep.mubr.bf16.mxu0 %v1562_v2  ;;  %v1566_v5 = vld [vmem:[%s1794_s12 + $0x24] ss:$16 sps:$4 sm:$0xff]   ;;  %v1570_v7 = vld [vmem:[%s1794_s12 + $0x20] ss:$16 sps:$4 sm:$0xff]  }
  0x45   : > { %947 = vmatprep.mubr.bf16.mxu1 %v1565_v4  ;;  %v1568_v6 = vld [vmem:[%s1794_s12 + $0x2c] ss:$16 sps:$4 sm:$0xff]   ;;  %v1571_v8 = vld [vmem:[%s1794_s12 + $0x28] ss:$16 sps:$4 sm:$0xff]   ;;  %v1572_v9 = vld [vmem:[%s1794_s12 + $0x44] ss:$16 sps:$4 sm:$0xff]  }
  0x46   : > { %1366 = vmatpush3.bf16.msra.mxu0 %v1542_v47  ;;  %v1574_v10 = vld [vmem:[%s1794_s12 + $0x4c] ss:$16 sps:$4 sm:$0xff]   ;;  %v1576_v11 = vld [vmem:[%s1794_s12 + $0x40] ss:$16 sps:$4 sm:$0xff]   ;;  %v1577_v12 = vld [vmem:[%s1794_s12 + $0x48] ss:$16 sps:$4 sm:$0xff]  }
  0x47   : > { %1430 = vmatpush3.bf16.msra.mxu1 %v1543_v48  ;;  %1367 = vmatprep.subr.bf16.mxu0 %v1544_v49  ;;  %v1578_v13 = vld [vmem:[%s1794_s12 + $0x64] ss:$16 sps:$4 sm:$0xff]   ;;  %v1580_v14 = vld [vmem:[%s1794_s12 + $0x6c] ss:$16 sps:$4 sm:$0xff]   ;;  %v1582_v15 = vld [vmem:[%s1794_s12 + $0x60] ss:$16 sps:$4 sm:$0xff]  }
  0x48   : > { %1431 = vmatprep.subr.bf16.mxu1 %v1545_v50  ;;  %v1583_v16 = vld [vmem:[%s1794_s12 + $0x68] ss:$16 sps:$4 sm:$0xff]   ;;  %v1584_v17 = vld [vmem:[%s1794_s12 + $0x84] ss:$16 sps:$4 sm:$0xff]   ;;  %v1586_v18 = vld [vmem:[%s1794_s12 + $0x8c] ss:$16 sps:$4 sm:$0xff]  }
  0x49   : > { %v1588_v19 = vld [vmem:[%s1794_s12 + $0x80] ss:$16 sps:$4 sm:$0xff]   ;;  %v1589_v20 = vld [vmem:[%s1794_s12 + $0x88] ss:$16 sps:$4 sm:$0xff]   ;;  %v1590_v21 = vld [vmem:[%s1794_s12 + $0xa4] ss:$16 sps:$4 sm:$0xff]  }
  0x4a   : > { %1368 = vmatpush3.bf16.msra.mxu0 %v1546_v51  ;;  %v1592_v22 = vld [vmem:[%s1794_s12 + $0xac] ss:$16 sps:$4 sm:$0xff]   ;;  %v1594_v23 = vld [vmem:[%s1794_s12 + $0xa0] ss:$16 sps:$4 sm:$0xff]   ;;  %v1595_v24 = vld [vmem:[%s1794_s12 + $0xa8] ss:$16 sps:$4 sm:$0xff]  }
  0x4b   : > { %1432 = vmatpush3.bf16.msra.mxu1 %v1547_v52  ;;  %1369 = vmatprep.subr.bf16.mxu0 %v1548_v53  ;;  %v1596_v25 = vld [vmem:[%s1794_s12 + $0xc4] ss:$16 sps:$4 sm:$0xff]   ;;  %v1598_v26 = vld [vmem:[%s1794_s12 + $0xcc] ss:$16 sps:$4 sm:$0xff]   ;;  %v1600_v27 = vld [vmem:[%s1794_s12 + $0xc0] ss:$16 sps:$4 sm:$0xff]  }
  0x4c   : > { %1433 = vmatprep.subr.bf16.mxu1 %v1549_v54  ;;  %v1601_v28 = vld [vmem:[%s1794_s12 + $0xc8] ss:$16 sps:$4 sm:$0xff]   ;;  %v1602_v29 = vld [vmem:[%s1794_s12 + $0xe4] ss:$16 sps:$4 sm:$0xff]   ;;  %v1604_v30 = vld [vmem:[%s1794_s12 + $0xec] ss:$16 sps:$4 sm:$0xff]  }
  0x4d   : > { %v1606_v31 = vld [vmem:[%s1794_s12 + $0xe0] ss:$16 sps:$4 sm:$0xff]   ;;  %v1607_v32 = vld [vmem:[%s1794_s12 + $0xe8] ss:$16 sps:$4 sm:$0xff]  }
  0x4e   : > { %1370 = vmatpush3.bf16.msra.mxu0 %v1550_v55  ;;  %v355_v49 = vld [vmem:[#allocation2] sm:$0xff] }
  0x4f   : > { %1434 = vmatpush3.bf16.msra.mxu1 %v1551_v56  ;;  %1371 = vmatprep.subr.bf16.mxu0 %v1552_v57 }
  0x50   : > { %1435 = vmatprep.subr.bf16.mxu1 %v1553_v58  ;;  %v356_v58 = vld [vmem:[#allocation2 + $0x58] sm:$0xff] }
  0x52   : > { %1372 = vmatpush3.bf16.msra.mxu0 %v1554_v59 }
  0x53   : > { %1436 = vmatpush3.bf16.msra.mxu1 %v1555_v60  ;;  %1373 = vmatprep.subr.bf16.mxu0 %v1556_v61 }
  0x54   : > { %1437 = vmatprep.subr.bf16.mxu1 %v1557_v62 }
  0x56   : > { %1374 = vmatpush3.bf16.msra.mxu0 %v1558_v63 }
  0x57   : > { %1438 = vmatpush3.bf16.msra.mxu1 %v1559_v0 }
  0x59   : > { %851 = vmatmul.mubr.bf16.vlgmr.msra.gmra.mxu0 %v1560_v1 }
  0x5a   : > { %948 = vmatmul.mubr.bf16.vlgmr.msra.gmra.mxu1 %v1563_v3  ;;  %858 = vmatprep.mubr.bf16.mxu0 %v1566_v5  ;;  %v357_v3 = vld [vmem:[#allocation2 + $0x18] sm:$0xff] }
  0x5b   : > { %955 = vmatprep.mubr.bf16.mxu1 %v1568_v6 }
  0x61   : > { %859 = vmatmul.mubr.bf16.gmra.mxu0 %v1570_v7 }
  0x62   : > { %956 = vmatmul.mubr.bf16.gmra.mxu1 %v1571_v8  ;;  %866 = vmatprep.mubr.bf16.mxu0 %v1572_v9 }
  0x63   : > { %963 = vmatprep.mubr.bf16.mxu1 %v1574_v10 }
  0x69   : > { %867 = vmatmul.mubr.bf16.gmra.mxu0 %v1576_v11 }
  0x6a   : > { %964 = vmatmul.mubr.bf16.gmra.mxu1 %v1577_v12  ;;  %874 = vmatprep.mubr.bf16.mxu0 %v1578_v13  ;;  %v358_v12 = vld [vmem:[#allocation2 + $0x50] sm:$0xff] }
  0x6b   : > { %971 = vmatprep.mubr.bf16.mxu1 %v1580_v14 }
  0x71   : > { %875 = vmatmul.mubr.bf16.gmra.mxu0 %v1582_v15 }
  0x72   : > { %972 = vmatmul.mubr.bf16.gmra.mxu1 %v1583_v16  ;;  %882 = vmatprep.mubr.bf16.mxu0 %v1584_v17 }
  0x73   : > { %979 = vmatprep.mubr.bf16.mxu1 %v1586_v18 }
  0x79   : > { %883 = vmatmul.mubr.bf16.gmra.mxu0 %v1588_v19 }
  0x7a   : > { %980 = vmatmul.mubr.bf16.gmra.mxu1 %v1589_v20  ;;  %890 = vmatprep.mubr.bf16.mxu0 %v1590_v21  ;;  %v359_v21 = vld [vmem:[#allocation2 + $0x68] sm:$0xff] }
  0x7b   : > { %987 = vmatprep.mubr.bf16.mxu1 %v1592_v22 }
  0x81   : > { %891 = vmatmul.mubr.bf16.gmra.mxu0 %v1594_v23 }
  0x82   : > { %988 = vmatmul.mubr.bf16.gmra.mxu1 %v1595_v24  ;;  %898 = vmatprep.mubr.bf16.mxu0 %v1596_v25 }
  0x83   : > { %995 = vmatprep.mubr.bf16.mxu1 %v1598_v26 }
  0x89   : > { %899 = vmatmul.mubr.bf16.gmra.mxu0 %v1600_v27 }
  0x8a   : > { %996 = vmatmul.mubr.bf16.gmra.mxu1 %v1601_v28  ;;  %906 = vmatprep.mubr.bf16.mxu0 %v1602_v29 }
  0x8b   : > { %1003 = vmatprep.mubr.bf16.mxu1 %v1604_v30  ;;  %v360_v30 = vld [vmem:[#allocation2 + $0x8] sm:$0xff] }
  0x91   : > { %907 = vmatmul.mubr.bf16.gmra.mxu0 %v1606_v31 }
  0x92   : > { %1004 = vmatmul.mubr.bf16.gmra.mxu1 %v1607_v32 }
 0x119   : > { %v1375_v33 = vpop.f32.mrf.mxu0 }
 0x11a   : > { %v1439_v34 = vpop.f32.mrf.mxu1 }
 0x11b   : > { %v1376_v35 = vpop.f32.mrf.mxu0 }
 0x11c   : > { %v1377_v36 = vadd.f32 %v1376_v35, %v1375_v33  ;;  %v1440_v37 = vpop.f32.mrf.mxu1 }
 0x11d   : > { %v1441_v38 = vadd.f32 %v1440_v37, %v1439_v34  ;;  %v1378_v39 = vpop.f32.mrf.mxu0 }
 0x11e   : > { %v1442_v41 = vpop.f32.mrf.mxu1 }
 0x11f   : > { %v950_v42 = vadd.f32 %v1441_v38, %v1377_v36  ;;  %v1379_v43 = vpop.f32.mrf.mxu0 }
 0x120   : > { %v1380_v44 = vadd.f32 %v1379_v43, %v1378_v39  ;;  %v1443_v45 = vpop.f32.mrf.mxu1  ;;  %v361_v39 = vld [vmem:[#allocation2 + $0x48] sm:$0xff] }
 0x121   : > { %v1012_v46 = vadd.f32 %v950_v42, %v354_v40  ;;  %v1444_v47 = vadd.f32 %v1443_v45, %v1442_v41  ;;  %v1381_v48 = vpop.f32.mrf.mxu0 }
 0x122   : > { %v1445_v50 = vpop.f32.mrf.mxu1 }
 0x123   : > { %1028 = vst [vmem:[#allocation2 + $0x30] sm:$0xff] %v1012_v46  ;;  %v953_v51 = vadd.f32 %v1444_v47, %v1380_v44  ;;  %v1382_v52 = vpop.f32.mrf.mxu0 }
 0x124   : > { %v1383_v53 = vadd.f32 %v1382_v52, %v1381_v48  ;;  %v1446_v54 = vpop.f32.mrf.mxu1  ;;  %v362_v48 = vld [vmem:[#allocation2 + $0x40] sm:$0xff] }
 0x125   : > { %v1013_v55 = vadd.f32 %v953_v51, %v355_v49  ;;  %v1447_v56 = vadd.f32 %v1446_v54, %v1445_v50  ;;  %v1384_v57 = vpop.f32.mrf.mxu0 }
 0x126   : > { %v1448_v59 = vpop.f32.mrf.mxu1 }
 0x127   : > { %1029 = vst [vmem:[#allocation2] sm:$0xff] %v1013_v55  ;;  %v958_v60 = vadd.f32 %v1447_v56, %v1383_v53  ;;  %v1385_v61 = vpop.f32.mrf.mxu0 }
 0x128   : > { %v1386_v62 = vadd.f32 %v1385_v61, %v1384_v57  ;;  %v1449_v63 = vpop.f32.mrf.mxu1  ;;  %v363_v57 = vld [vmem:[#allocation2 + $0x20] sm:$0xff] }
 0x129   : > { %v1014_v0 = vadd.f32 %v958_v60, %v356_v58  ;;  %v1450_v1 = vadd.f32 %v1449_v63, %v1448_v59  ;;  %v1387_v2 = vpop.f32.mrf.mxu0 }
 0x12a   : > { %v1451_v4 = vpop.f32.mrf.mxu1 }
 0x12b   : > { %1030 = vst [vmem:[#allocation2 + $0x58] sm:$0xff] %v1014_v0  ;;  %v961_v5 = vadd.f32 %v1450_v1, %v1386_v62  ;;  %v1388_v6 = vpop.f32.mrf.mxu0 }
 0x12c   : > { %v1389_v7 = vadd.f32 %v1388_v6, %v1387_v2  ;;  %v1452_v8 = vpop.f32.mrf.mxu1  ;;  %v364_v2 = vld [vmem:[#allocation2 + $0x10] sm:$0xff] }
 0x12d   : > { %v1015_v9 = vadd.f32 %v961_v5, %v357_v3  ;;  %v1453_v10 = vadd.f32 %v1452_v8, %v1451_v4  ;;  %v1390_v11 = vpop.f32.mrf.mxu0 }
 0x12e   : > { %v1454_v13 = vpop.f32.mrf.mxu1 }
 0x12f   : > { %1031 = vst [vmem:[#allocation2 + $0x18] sm:$0xff] %v1015_v9  ;;  %v966_v14 = vadd.f32 %v1453_v10, %v1389_v7  ;;  %v1391_v15 = vpop.f32.mrf.mxu0 }
 0x130   : > { %v1392_v16 = vadd.f32 %v1391_v15, %v1390_v11  ;;  %v1455_v17 = vpop.f32.mrf.mxu1  ;;  %v365_v11 = vld [vmem:[#allocation2 + $0x38] sm:$0xff] }
 0x131   : > { %v1016_v18 = vadd.f32 %v966_v14, %v358_v12  ;;  %v1456_v19 = vadd.f32 %v1455_v17, %v1454_v13  ;;  %v1393_v20 = vpop.f32.mrf.mxu0 }
 0x132   : > { %v1457_v22 = vpop.f32.mrf.mxu1 }
 0x133   : > { %1032 = vst [vmem:[#allocation2 + $0x50] sm:$0xff] %v1016_v18  ;;  %v969_v23 = vadd.f32 %v1456_v19, %v1392_v16  ;;  %v1394_v24 = vpop.f32.mrf.mxu0 }
 0x134   : > { %v1395_v25 = vadd.f32 %v1394_v24, %v1393_v20  ;;  %v1458_v26 = vpop.f32.mrf.mxu1  ;;  %v366_v20 = vld [vmem:[#allocation2 + $0x60] sm:$0xff] }
 0x135   : > { %v1017_v27 = vadd.f32 %v969_v23, %v359_v21  ;;  %v1459_v28 = vadd.f32 %v1458_v26, %v1457_v22  ;;  %v1396_v29 = vpop.f32.mrf.mxu0 }
 0x136   : > { %v1460_v31 = vpop.f32.mrf.mxu1 }
 0x137   : > { %1033 = vst [vmem:[#allocation2 + $0x68] sm:$0xff] %v1017_v27  ;;  %v974_v32 = vadd.f32 %v1459_v28, %v1395_v25  ;;  %v1397_v33 = vpop.f32.mrf.mxu0 }
 0x138   : > { %v1398_v34 = vadd.f32 %v1397_v33, %v1396_v29  ;;  %v1461_v35 = vpop.f32.mrf.mxu1  ;;  %v367_v29 = vld [vmem:[#allocation2 + $0x70] sm:$0xff] }
 0x139   : > { %v1018_v36 = vadd.f32 %v974_v32, %v360_v30  ;;  %v1462_v37 = vadd.f32 %v1461_v35, %v1460_v31  ;;  %v1399_v38 = vpop.f32.mrf.mxu0 }
 0x13a   : > { %v1463_v40 = vpop.f32.mrf.mxu1 }
 0x13b   : > { %1034 = vst [vmem:[#allocation2 + $0x8] sm:$0xff] %v1018_v36  ;;  %v977_v41 = vadd.f32 %v1462_v37, %v1398_v34  ;;  %v1400_v42 = vpop.f32.mrf.mxu0 }
 0x13c   : > { %v1401_v43 = vadd.f32 %v1400_v42, %v1399_v38  ;;  %v1464_v44 = vpop.f32.mrf.mxu1  ;;  %v368_v38 = vld [vmem:[#allocation2 + $0x78] sm:$0xff] }
 0x13d   : > { %v1019_v45 = vadd.f32 %v977_v41, %v361_v39  ;;  %v1465_v46 = vadd.f32 %v1464_v44, %v1463_v40  ;;  %v1402_v47 = vpop.f32.mrf.mxu0 }
 0x13e   : > { %v1466_v49 = vpop.f32.mrf.mxu1 }
 0x13f   : > { %1035 = vst [vmem:[#allocation2 + $0x48] sm:$0xff] %v1019_v45  ;;  %v982_v50 = vadd.f32 %v1465_v46, %v1401_v43  ;;  %v1403_v51 = vpop.f32.mrf.mxu0  ;;  %v369_v46 = vld [vmem:[#allocation2 + $0x28] sm:$0xff] }
 0x140   : > { %v1404_v52 = vadd.f32 %v1403_v51, %v1402_v47  ;;  %v1467_v53 = vpop.f32.mrf.mxu1 }
 0x141   : > { %v1020_v54 = vadd.f32 %v982_v50, %v362_v48  ;;  %v1468_v55 = vadd.f32 %v1467_v53, %v1466_v49  ;;  %v1405_v56 = vpop.f32.mrf.mxu0 }
 0x142   : > { %v1469_v58 = vpop.f32.mrf.mxu1 }
 0x143   : > { %1036 = vst [vmem:[#allocation2 + $0x40] sm:$0xff] %v1020_v54  ;;  %v985_v59 = vadd.f32 %v1468_v55, %v1404_v52  ;;  %v1406_v60 = vpop.f32.mrf.mxu0 }
 0x144   : > { %v1407_v61 = vadd.f32 %v1406_v60, %v1405_v56  ;;  %v1470_v62 = vpop.f32.mrf.mxu1 }
 0x145   : > { %v1021_v63 = vadd.f32 %v985_v59, %v363_v57  ;;  %v1471_v0 = vadd.f32 %v1470_v62, %v1469_v58  ;;  %v1408_v1 = vpop.f32.mrf.mxu0 }
 0x146   : > { %v1472_v3 = vpop.f32.mrf.mxu1 }
 0x147   : > { %1037 = vst [vmem:[#allocation2 + $0x20] sm:$0xff] %v1021_v63  ;;  %v990_v4 = vadd.f32 %v1471_v0, %v1407_v61  ;;  %v1409_v5 = vpop.f32.mrf.mxu0 }
 0x148   : > { %v1410_v6 = vadd.f32 %v1409_v5, %v1408_v1  ;;  %v1473_v7 = vpop.f32.mrf.mxu1 }
 0x149   : > { %v1022_v8 = vadd.f32 %v990_v4, %v364_v2  ;;  %v1474_v9 = vadd.f32 %v1473_v7, %v1472_v3  ;;  %v1411_v10 = vpop.f32.mrf.mxu0 }
 0x14a   : > { %v1475_v12 = vpop.f32.mrf.mxu1 }
 0x14b   : > { %1038 = vst [vmem:[#allocation2 + $0x10] sm:$0xff] %v1022_v8  ;;  %v993_v13 = vadd.f32 %v1474_v9, %v1410_v6  ;;  %v1412_v14 = vpop.f32.mrf.mxu0 }
 0x14c   : > { %v1413_v15 = vadd.f32 %v1412_v14, %v1411_v10  ;;  %v1476_v16 = vpop.f32.mrf.mxu1 }
 0x14d   : > { %v1023_v17 = vadd.f32 %v993_v13, %v365_v11  ;;  %v1477_v18 = vadd.f32 %v1476_v16, %v1475_v12  ;;  %v1414_v19 = vpop.f32.mrf.mxu0 }
 0x14e   : > { %v1478_v21 = vpop.f32.mrf.mxu1 }
 0x14f   : > { %1039 = vst [vmem:[#allocation2 + $0x38] sm:$0xff] %v1023_v17  ;;  %v998_v22 = vadd.f32 %v1477_v18, %v1413_v15  ;;  %v1415_v23 = vpop.f32.mrf.mxu0 }
 0x150   : > { %v1416_v24 = vadd.f32 %v1415_v23, %v1414_v19  ;;  %v1479_v25 = vpop.f32.mrf.mxu1 }
 0x151   : > { %v1024_v26 = vadd.f32 %v998_v22, %v366_v20  ;;  %v1480_v27 = vadd.f32 %v1479_v25, %v1478_v21  ;;  %v1417_v28 = vpop.f32.mrf.mxu0 }
 0x152   : > { %v1481_v30 = vpop.f32.mrf.mxu1 }
 0x153   : > { %1040 = vst [vmem:[#allocation2 + $0x60] sm:$0xff] %v1024_v26  ;;  %v1001_v31 = vadd.f32 %v1480_v27, %v1416_v24  ;;  %v1418_v32 = vpop.f32.mrf.mxu0 }
 0x154   : > { %v1419_v33 = vadd.f32 %v1418_v32, %v1417_v28  ;;  %v1482_v34 = vpop.f32.mrf.mxu1 }
 0x155   : > { %v1025_v35 = vadd.f32 %v1001_v31, %v367_v29  ;;  %v1483_v36 = vadd.f32 %v1482_v34, %v1481_v30  ;;  %v1420_v37 = vpop.f32.mrf.mxu0 }
 0x156   : > { %v1484_v39 = vpop.f32.mrf.mxu1 }
 0x157   : > { %1041 = vst [vmem:[#allocation2 + $0x70] sm:$0xff] %v1025_v35  ;;  %v1006_v40 = vadd.f32 %v1483_v36, %v1419_v33  ;;  %v1421_v41 = vpop.f32.mrf.mxu0 }
 0x158   : > { %v1422_v42 = vadd.f32 %v1421_v41, %v1420_v37  ;;  %v1485_v43 = vpop.f32.mrf.mxu1 }
 0x159   : > { %v1026_v44 = vadd.f32 %v1006_v40, %v368_v38  ;;  %v1486_v45 = vadd.f32 %v1485_v43, %v1484_v39 }
 0x15b   : > { %1042 = vst [vmem:[#allocation2 + $0x78] sm:$0xff] %v1026_v44  ;;  %v1009_v47 = vadd.f32 %v1486_v45, %v1422_v42  ;;  %1047 = sbr.rel (%p1351_p11) target bundleno = 402 (0x192), region = 63 }
 0x15d   : > { %v1027_v48 = vadd.f32 %v1009_v47, %v369_v46 }
 0x15f   : > { %1043 = vst [vmem:[#allocation2 + $0x28] sm:$0xff] %v1027_v48 }
 0x160   : > { %v1048_v49 = vld [vmem:[#allocation2 + $0x30] sm:$0xff]  ;;  %v1352_v50 = vld [vmem:[%s1949_s2] ss:$0 sm:$0xff]  ;;  %vm1087_vm0 = vcmask 261120   ;;  %v1050_v54 = vld [vmem:[#allocation2 + $0x58] sm:$0xff]  ;;  %vm1162_vm1 = vcmask 1040384  }
 0x161   : > { %v1049_v51 = vld [vmem:[#allocation2] sm:$0xff]  ;;  %v1071_v52 = vadd.f32 %v1352_v50, %v1048_v49  ;;  %v1051_v55 = vld [vmem:[#allocation2 + $0x18] sm:$0xff]  ;;  %v1052_v56 = vld [vmem:[#allocation2 + $0x50] sm:$0xff]  ;;  %v1073_v57 = vadd.f32 %v1352_v50, %v1050_v54 }
 0x162   : > { %v1072_v53 = vadd.f32 %v1352_v50, %v1049_v51  ;;  %v1074_v58 = vadd.f32 %v1352_v50, %v1051_v55  ;;  %v1075_v59 = vadd.f32 %v1352_v50, %v1052_v56  ;;  %v1053_v60 = vld [vmem:[#allocation2 + $0x68] sm:$0xff]  ;;  %v1056_v3 = vld [vmem:[#allocation2 + $0x40] sm:$0xff]  ;;  %v1058_v5 = vld [vmem:[#allocation2 + $0x10] sm:$0xff] }
 0x163   : > { %v1054_v61 = vld [vmem:[#allocation2 + $0x8] sm:$0xff]  ;;  %1088 = vst.msk [vmem:[%s1950_s3] sm:$0xff] %vm1087_vm0, %v1071_v52  ;;  %v1125_v63 = vmul.f32 %v1071_v52, %v1071_v52  ;;  %v1076_v2 = vadd.f32 %v1352_v50, %v1053_v60  ;;  %v1057_v4 = vld [vmem:[#allocation2 + $0x20] sm:$0xff]  ;;  %1090 = vst.msk [vmem:[%s1950_s3 + $0x10] sm:$0xff] %vm1087_vm0, %v1073_v57  ;;  %v1127_v6 = vmul.f32 %v1073_v57, %v1073_v57 }
 0x164   : > { %v1055_v62 = vld [vmem:[#allocation2 + $0x48] sm:$0xff]  ;;  %1089 = vst.msk [vmem:[%s1950_s3 + $0x8] sm:$0xff] %vm1087_vm0, %v1072_v53  ;;  %v1104_v0 = vadd.f32 %v1072_v53, %v1071_v52  ;;  %v1126_v1 = vmul.f32 %v1072_v53, %v1072_v53  ;;  %1091 = vst.msk [vmem:[%s1950_s3 + $0x18] sm:$0xff] %vm1087_vm0, %v1074_v58  ;;  %v1077_v7 = vadd.f32 %v1352_v50, %v1054_v61  ;;  %v1059_v8 = vld [vmem:[#allocation2 + $0x38] sm:$0xff] }
 0x165   : > { %1092 = vst.msk [vmem:[%s1950_s3 + $0x20] sm:$0xff] %vm1087_vm0, %v1075_v59  ;;  %v1128_v11 = vmul.f32 %v1074_v58, %v1074_v58  ;;  %1093 = vst.msk [vmem:[%s1950_s3 + $0x28] sm:$0xff] %vm1087_vm0, %v1076_v2  ;;  %v1078_v12 = vadd.f32 %v1352_v50, %v1055_v62  ;;  %v1060_v13 = vld [vmem:[#allocation2 + $0x60] sm:$0xff]  ;;  %v1079_v14 = vadd.f32 %v1352_v50, %v1056_v3  ;;  %v1061_v17 = vld [vmem:[#allocation2 + $0x70] sm:$0xff] }
 0x166   : > { %v1141_v9 = vadd.f32 %v1126_v1, %v1125_v63  ;;  %v1105_v10 = vadd.f32 %v1104_v0, %v1073_v57  ;;  %1094 = vst.msk [vmem:[%s1950_s3 + $0x30] sm:$0xff] %vm1087_vm0, %v1077_v7  ;;  %v1080_v15 = vadd.f32 %v1352_v50, %v1057_v4  ;;  %v1081_v16 = vadd.f32 %v1352_v50, %v1058_v5  ;;  %v1062_v22 = vld [vmem:[#allocation2 + $0x78] sm:$0xff]  ;;  %v1063_v23 = vld [vmem:[#allocation2 + $0x28] sm:$0xff] }
 0x167   : > { %v1129_v20 = vmul.f32 %v1075_v59, %v1075_v59  ;;  %1095 = vst.msk [vmem:[%s1950_s3 + $0x38] sm:$0xff] %vm1087_vm0, %v1078_v12  ;;  %v1082_v21 = vadd.f32 %v1352_v50, %v1059_v8  ;;  %1096 = vst.msk [vmem:[%s1950_s3 + $0x40] sm:$0xff] %vm1087_vm0, %v1079_v14  ;;  %v1083_v24 = vadd.f32 %v1352_v50, %v1060_v13 }
 0x168   : > { %v1142_v18 = vadd.f32 %v1141_v9, %v1127_v6  ;;  %v1106_v19 = vadd.f32 %v1105_v10, %v1074_v58  ;;  %1097 = vst.msk [vmem:[%s1950_s3 + $0x48] sm:$0xff] %vm1087_vm0, %v1080_v15  ;;  %1098 = vst.msk [vmem:[%s1950_s3 + $0x50] sm:$0xff] %vm1087_vm0, %v1081_v16  ;;  %v1130_v27 = vmul.f32 %v1076_v2, %v1076_v2 }
 0x169   : > { %1099 = vst.msk [vmem:[%s1950_s3 + $0x58] sm:$0xff] %vm1087_vm0, %v1082_v21  ;;  %v1084_v28 = vadd.f32 %v1352_v50, %v1061_v17  ;;  %1100 = vst.msk [vmem:[%s1950_s3 + $0x60] sm:$0xff] %vm1087_vm0, %v1083_v24  ;;  %v1085_v29 = vadd.f32 %v1352_v50, %v1062_v22  ;;  %v1086_v30 = vadd.f32 %v1352_v50, %v1063_v23 }
 0x16a   : > { %v1143_v25 = vadd.f32 %v1142_v18, %v1128_v11  ;;  %v1107_v26 = vadd.f32 %v1106_v19, %v1075_v59  ;;  %v1131_v33 = vmul.f32 %v1077_v7, %v1077_v7  ;;  %v1132_v36 = vmul.f32 %v1078_v12, %v1078_v12 }
 0x16b   : > { %1101 = vst.msk [vmem:[%s1950_s3 + $0x68] sm:$0xff] %vm1087_vm0, %v1084_v28  ;;  %1102 = vst.msk [vmem:[%s1950_s3 + $0x70] sm:$0xff] %vm1087_vm0, %v1085_v29  ;;  %v1133_v39 = vmul.f32 %v1079_v14, %v1079_v14  ;;  %v1134_v42 = vmul.f32 %v1080_v15, %v1080_v15  ;;  %v1135_v45 = vmul.f32 %v1081_v16, %v1081_v16 }
 0x16c   : > { %v1144_v31 = vadd.f32 %v1143_v25, %v1129_v20  ;;  %v1108_v32 = vadd.f32 %v1107_v26, %v1076_v2  ;;  %1103 = vst.msk [vmem:[%s1950_s3 + $0x78] sm:$0xff] %vm1087_vm0, %v1086_v30  ;;  %v1136_v48 = vmul.f32 %v1082_v21, %v1082_v21  ;;  %v1137_v51 = vmul.f32 %v1083_v24, %v1083_v24 }
 0x16d   : > { %v1138_v54 = vmul.f32 %v1084_v28, %v1084_v28  ;;  %v1139_v57 = vmul.f32 %v1085_v29, %v1085_v29  ;;  %v1140_v60 = vmul.f32 %v1086_v30, %v1086_v30 }
 0x16e   : > { %v1145_v34 = vadd.f32 %v1144_v31, %v1130_v27  ;;  %v1109_v35 = vadd.f32 %v1108_v32, %v1077_v7 }
 0x170   : > { %v1146_v37 = vadd.f32 %v1145_v34, %v1131_v33  ;;  %v1110_v38 = vadd.f32 %v1109_v35, %v1078_v12 }
 0x172   : > { %v1147_v40 = vadd.f32 %v1146_v37, %v1132_v36  ;;  %v1111_v41 = vadd.f32 %v1110_v38, %v1079_v14 }
 0x174   : > { %v1148_v43 = vadd.f32 %v1147_v40, %v1133_v39  ;;  %v1112_v44 = vadd.f32 %v1111_v41, %v1080_v15 }
 0x176   : > { %v1149_v46 = vadd.f32 %v1148_v43, %v1134_v42  ;;  %v1113_v47 = vadd.f32 %v1112_v44, %v1081_v16 }
 0x178   : > { %v1150_v49 = vadd.f32 %v1149_v46, %v1135_v45  ;;  %v1114_v50 = vadd.f32 %v1113_v47, %v1082_v21 }
 0x17a   : > { %v1151_v52 = vadd.f32 %v1150_v49, %v1136_v48  ;;  %v1115_v53 = vadd.f32 %v1114_v50, %v1083_v24 }
 0x17c   : > { %v1152_v55 = vadd.f32 %v1151_v52, %v1137_v51  ;;  %v1116_v56 = vadd.f32 %v1115_v53, %v1084_v28 }
 0x17e   : > { %v1153_v58 = vadd.f32 %v1152_v55, %v1138_v54  ;;  %v1117_v59 = vadd.f32 %v1116_v56, %v1085_v29 }
 0x180   : > { %v1154_v61 = vadd.f32 %v1153_v58, %v1139_v57  ;;  %v1118_v62 = vadd.f32 %v1117_v59, %v1086_v30 }
 0x182   : > { %v1119_v63 = vrot.slane %v1118_v62, 4  ;;  %v1155_v0 = vadd.f32 %v1154_v61, %v1140_v60 }
 0x184   : > { %v1120_v1 = vadd.f32 %v1119_v63, %v1118_v62  ;;  %v1156_v2 = vrot.slane %v1155_v0, 4 }
 0x186   : > { %v1121_v3 = vrot.slane %v1120_v1, 2  ;;  %v1157_v4 = vadd.f32 %v1156_v2, %v1155_v0 }
 0x188   : > { %v1122_v5 = vadd.f32 %v1121_v3, %v1120_v1  ;;  %v1158_v6 = vrot.slane %v1157_v4, 2 }
 0x18a   : > { %v1123_v7 = vrot.slane %v1122_v5, 1  ;;  %v1159_v8 = vadd.f32 %v1158_v6, %v1157_v4 }
 0x18c   : > { %v1124_v9 = vadd.f32 %v1123_v7, %v1122_v5  ;;  %v1160_v10 = vrot.slane %v1159_v8, 1 }
 0x18e   : > { %v1161_v11 = vadd.f32 %v1160_v10, %v1159_v8 }
 0x190   : > { %v1163_v12 = vsel %vm1162_vm1, %v1124_v9, %v1161_v11 }
 0x191   : > { %1164 = vst [vmem:[%s1951_s4] sm:$0x3] %v1163_v12 }
 0x192 PF: > { %s15_s19 = sadd.s32 1, %s1646_s19   ;;  %s1952_s15 = smov %s1634_s16 }
 0x193   : > { %p12_p12 = scmp.ge.s32.totalorder %s15_s19, 4   ;;  %s1953_s16 = smov %s1709_s23 }
 0x194   : > { %s1954_s17 = smov %s1642_s18  ;;  %s1955_s18 = smov %s1957_s20 }
 0x195   :  { %14 = sbr.rel (!%p12_p12) target bundleno = 3 (0x3), region = 113 }

// kernel: discriminator_forward.14
= control target key start
LH: loop header
LB: loop body
LE: loop exit
PB: predicated region body
PF: predicated region fallthrough
CT: control target
= control target key end

     0   :  { %vm124_vm0 = vcmask 523264   ;;  %s322_s0 = inlined_call_operand.vmem [shape: f32[128,64], index: 0, kind: input, shape index: {}]   ;;  %s323_s1 = inlined_call_operand.vmem [shape: f32[1,64], index: 1, kind: input, shape index: {}]   ;;  %s324_s2 = inlined_call_operand.vmem [shape: f32[1,64], index: 2, kind: input, shape index: {}]   ;;  %s325_s3 = inlined_call_operand.vmem [shape: f32[128,64], index: 3, kind: output, shape index: {}]  }
   0x1   :  { %v14_v0 = vld [vmem:[%s322_s0] sm:$0xff]  ;;  %v15_v4 = vld [vmem:[%s322_s0 + $0x8] sm:$0xff]  ;;  %v16_v5 = vld [vmem:[%s322_s0 + $0x10] sm:$0xff] }
   0x2   :  { %v173_v1 = vld [vmem:[%s323_s1] ss:$0 sm:$0xff]  ;;  %v17_v6 = vld [vmem:[%s322_s0 + $0x18] sm:$0xff]  ;;  %v19_v11 = vld [vmem:[%s322_s0 + $0x28] sm:$0xff] }
   0x3   :  { %v178_v2 = vld [vmem:[%s324_s2] ss:$0 sm:$0xff]  ;;  %v37_v3 = vmul.f32 %v173_v1, %v14_v0  ;;  %v38_v7 = vmul.f32 %v173_v1, %v15_v4  ;;  %v39_v8 = vmul.f32 %v173_v1, %v16_v5  ;;  %v40_v9 = vmul.f32 %v173_v1, %v17_v6  ;;  %v20_v12 = vld [vmem:[%s322_s0 + $0x30] sm:$0xff]  ;;  %v21_v17 = vld [vmem:[%s322_s0 + $0x38] sm:$0xff] }
   0x4   :  { %v18_v10 = vld [vmem:[%s322_s0 + $0x20] sm:$0xff]  ;;  %v42_v15 = vmul.f32 %v173_v1, %v19_v11  ;;  %v43_v16 = vmul.f32 %v173_v1, %v20_v12  ;;  %v44_v21 = vmul.f32 %v173_v1, %v21_v17  ;;  %v23_v30 = vld [vmem:[%s322_s0 + $0x48] sm:$0xff]  ;;  %v24_v31 = vld [vmem:[%s322_s0 + $0x50] sm:$0xff] }
   0x5   :  { %v60_v13 = vadd.f32 %v178_v2, %v37_v3  ;;  %v41_v14 = vmul.f32 %v173_v1, %v18_v10  ;;  %v61_v18 = vadd.f32 %v178_v2, %v38_v7  ;;  %v62_v19 = vadd.f32 %v178_v2, %v39_v8  ;;  %v22_v25 = vld [vmem:[%s322_s0 + $0x40] sm:$0xff]  ;;  %v25_v43 = vld [vmem:[%s322_s0 + $0x58] sm:$0xff]  ;;  %v27_v45 = vld [vmem:[%s322_s0 + $0x68] sm:$0xff] }
   0x6   :  { %v63_v20 = vadd.f32 %v178_v2, %v40_v9  ;;  %v65_v24 = vadd.f32 %v178_v2, %v42_v15  ;;  %v66_v37 = vadd.f32 %v178_v2, %v43_v16  ;;  %v67_v38 = vadd.f32 %v178_v2, %v44_v21  ;;  %v26_v44 = vld [vmem:[%s322_s0 + $0x60] sm:$0xff]  ;;  %v28_v56 = vld [vmem:[%s322_s0 + $0x70] sm:$0xff]  ;;  %v29_v4 = vld [vmem:[%s322_s0 + $0x78] sm:$0xff] }
   0x7   :  { %vm76_vm1 = vcmp.gt.f32.partialorder %v60_v13, 0.0  ;;  %v92_v22 = vmul.f32 0.2, %v60_v13  ;;  %v64_v23 = vadd.f32 %v178_v2, %v41_v14  ;;  %vm77_vm2 = vcmp.gt.f32.partialorder %v61_v18, 0.0 }
   0x8   :  { %v93_v26 = vmul.f32 0.2, %v61_v18  ;;  %vm78_vm3 = vcmp.gt.f32.partialorder %v62_v19, 0.0  ;;  %v94_v27 = vmul.f32 0.2, %v62_v19  ;;  %vm79_vm4 = vcmp.gt.f32.partialorder %v63_v20, 0.0 }
   0x9   :  { %v108_v28 = vsel %vm76_vm1, %v60_v13, %v92_v22  ;;  %v95_v29 = vmul.f32 0.2, %v63_v20  ;;  %vm80_vm5 = vcmp.gt.f32.partialorder %v64_v23, 0.0  ;;  %v96_v34 = vmul.f32 0.2, %v64_v23 }
   0xa   :  { %125 = vst.msk [vmem:[%s325_s3] sm:$0xff] %vm124_vm0, %v108_v28  ;;  %v109_v32 = vsel %vm77_vm2, %v61_v18, %v93_v26  ;;  %v110_v33 = vsel %vm78_vm3, %v62_v19, %v94_v27  ;;  %vm81_vm6 = vcmp.gt.f32.partialorder %v65_v24, 0.0  ;;  %v97_v36 = vmul.f32 0.2, %v65_v24 }
   0xb   :  { %126 = vst.msk [vmem:[%s325_s3 + $0x8] sm:$0xff] %vm124_vm0, %v109_v32  ;;  %127 = vst.msk [vmem:[%s325_s3 + $0x10] sm:$0xff] %vm124_vm0, %v110_v33  ;;  %v111_v35 = vsel %vm79_vm4, %v63_v20, %v95_v29  ;;  %v112_v39 = vsel %vm80_vm5, %v64_v23, %v96_v34  ;;  %v45_v40 = vmul.f32 %v173_v1, %v22_v25  ;;  %vm82_vm7 = vcmp.gt.f32.partialorder %v66_v37, 0.0 }
   0xc   :  { %128 = vst.msk [vmem:[%s325_s3 + $0x18] sm:$0xff] %vm124_vm0, %v111_v35  ;;  %v46_v41 = vmul.f32 %v173_v1, %v23_v30  ;;  %v47_v42 = vmul.f32 %v173_v1, %v24_v31  ;;  %129 = vst.msk [vmem:[%s325_s3 + $0x20] sm:$0xff] %vm124_vm0, %v112_v39  ;;  %v113_v46 = vsel %vm81_vm6, %v65_v24, %v97_v36  ;;  %v98_v47 = vmul.f32 0.2, %v66_v37 }
   0xd   :  { %vm83_vm8 = vcmp.gt.f32.partialorder %v67_v38, 0.0  ;;  %130 = vst.msk [vmem:[%s325_s3 + $0x28] sm:$0xff] %vm124_vm0, %v113_v46  ;;  %v99_v48 = vmul.f32 0.2, %v67_v38  ;;  %v68_v49 = vadd.f32 %v178_v2, %v45_v40  ;;  %v48_v53 = vmul.f32 %v173_v1, %v25_v43 }
   0xe   :  { %v69_v50 = vadd.f32 %v178_v2, %v46_v41  ;;  %v70_v51 = vadd.f32 %v178_v2, %v47_v42  ;;  %v114_v52 = vsel %vm82_vm7, %v66_v37, %v98_v47  ;;  %v49_v54 = vmul.f32 %v173_v1, %v26_v44 }
   0xf   :  { %v50_v55 = vmul.f32 %v173_v1, %v27_v45  ;;  %131 = vst.msk [vmem:[%s325_s3 + $0x30] sm:$0xff] %vm124_vm0, %v114_v52  ;;  %v115_v57 = vsel %vm83_vm8, %v67_v38, %v99_v48  ;;  %vm84_vm9 = vcmp.gt.f32.partialorder %v68_v49, 0.0  ;;  %v100_v58 = vmul.f32 0.2, %v68_v49 }
  0x10   :  { %vm85_vm10 = vcmp.gt.f32.partialorder %v69_v50, 0.0  ;;  %132 = vst.msk [vmem:[%s325_s3 + $0x38] sm:$0xff] %vm124_vm0, %v115_v57  ;;  %v101_v59 = vmul.f32 0.2, %v69_v50  ;;  %vm86_vm11 = vcmp.gt.f32.partialorder %v70_v51, 0.0  ;;  %v71_v61 = vadd.f32 %v178_v2, %v48_v53 }
  0x11   :  { %v102_v60 = vmul.f32 0.2, %v70_v51  ;;  %v116_v62 = vsel %vm84_vm9, %v68_v49, %v100_v58  ;;  %v72_v63 = vadd.f32 %v178_v2, %v49_v54  ;;  %v73_v0 = vadd.f32 %v178_v2, %v50_v55 }
  0x12   :  { %v51_v3 = vmul.f32 %v173_v1, %v28_v56  ;;  %133 = vst.msk [vmem:[%s325_s3 + $0x40] sm:$0xff] %vm124_vm0, %v116_v62  ;;  %v117_v5 = vsel %vm85_vm10, %v69_v50, %v101_v59  ;;  %vm87_vm12 = vcmp.gt.f32.partialorder %v71_v61, 0.0  ;;  %v103_v7 = vmul.f32 0.2, %v71_v61 }
  0x13   :  { %v118_v6 = vsel %vm86_vm11, %v70_v51, %v102_v60  ;;  %134 = vst.msk [vmem:[%s325_s3 + $0x48] sm:$0xff] %vm124_vm0, %v117_v5  ;;  %vm88_vm13 = vcmp.gt.f32.partialorder %v72_v63, 0.0  ;;  %v104_v8 = vmul.f32 0.2, %v72_v63  ;;  %vm89_vm14 = vcmp.gt.f32.partialorder %v73_v0, 0.0 }
  0x14   :  { %135 = vst.msk [vmem:[%s325_s3 + $0x50] sm:$0xff] %vm124_vm0, %v118_v6  ;;  %v105_v9 = vmul.f32 0.2, %v73_v0  ;;  %v119_v10 = vsel %vm87_vm12, %v71_v61, %v103_v7  ;;  %v74_v11 = vadd.f32 %v178_v2, %v51_v3  ;;  %v52_v12 = vmul.f32 %v173_v1, %v29_v4 }
  0x15   :  { %136 = vst.msk [vmem:[%s325_s3 + $0x58] sm:$0xff] %vm124_vm0, %v119_v10  ;;  %v120_v13 = vsel %vm88_vm13, %v72_v63, %v104_v8 }
  0x16   :  { %v121_v14 = vsel %vm89_vm14, %v73_v0, %v105_v9  ;;  %137 = vst.msk [vmem:[%s325_s3 + $0x60] sm:$0xff] %vm124_vm0, %v120_v13  ;;  %vm90_vm15 = vcmp.gt.f32.partialorder %v74_v11, 0.0  ;;  %v106_v15 = vmul.f32 0.2, %v74_v11  ;;  %v75_v1 = vadd.f32 %v178_v2, %v52_v12 }
  0x17   :  { %138 = vst.msk [vmem:[%s325_s3 + $0x68] sm:$0xff] %vm124_vm0, %v121_v14 }
  0x18   :  { %v122_v16 = vsel %vm90_vm15, %v74_v11, %v106_v15  ;;  %vm91_vm1 = vcmp.gt.f32.partialorder %v75_v1, 0.0  ;;  %v107_v17 = vmul.f32 0.2, %v75_v1 }
  0x19   :  { %139 = vst.msk [vmem:[%s325_s3 + $0x70] sm:$0xff] %vm124_vm0, %v122_v16 }
  0x1a   :  { %v123_v18 = vsel %vm91_vm1, %v75_v1, %v107_v17 }
  0x1b   :  { %140 = vst.msk [vmem:[%s325_s3 + $0x78] sm:$0xff] %vm124_vm0, %v123_v18 }

// kernel: discriminator_forward.13
= control target key start
LH: loop header
LB: loop body
LE: loop exit
PB: predicated region body
PF: predicated region fallthrough
CT: control target
= control target key end

     0   :  { %s1674_s15 = smov 0   ;;  %s1676_s16 = smov 0   ;;  %s1947_s0 = inlined_call_operand.vmem [shape: bf16[128,2048], index: 0, kind: input, shape index: {}]   ;;  %s1948_s1 = inlined_call_operand.vmem [shape: bf16[2048,128], index: 1, kind: input, shape index: {}]   ;;  %s1949_s2 = inlined_call_operand.vmem [shape: f32[1,128], index: 2, kind: input, shape index: {}]   ;;  %s1950_s3 = inlined_call_operand.vmem [shape: f32[128,64], index: 3, kind: output, shape index: {0}]   ;;  %s1951_s4 = inlined_call_operand.vmem [shape: f32[1,2,128], index: 4, kind: output, shape index: {1}]  }
   0x1   :  { %s1678_s17 = smov 0   ;;  %s1680_s18 = smov 0  }
   0x2   :  { %s1682_s19 = smov 0  }
   0x3 LB: > { %s24_s20 = sadd.s32 1, %s1642_s18  ;;  %p43_p1 = scmp.ne.s32.totalorder %s1634_s16, %s1630_s15  ;;  %s1646_s19 = sphi %s1682_s19, %s15_s19   ;;  %s1642_s18 = sphi %s1680_s18, %s1955_s18   ;;  %s1638_s17 = sphi %s1678_s17, %s1954_s17   ;;  %s1634_s16 = sphi %s1676_s16, %s1953_s16   ;;  %s1630_s15 = sphi %s1674_s15, %s1952_s15  }
   0x4   : > { %p25_p0 = scmp.ge.s32.totalorder %s24_s20, 4  ;;  %p44_p2 = scmp.eq.s32.totalorder %s1646_s19, 0 }
   0x5   : > { %s36_s22 = sadd.s32 1, %s1634_s16  ;;  %p1278_p5 = scmp.ge.s32.totalorder %s1646_s19, 4 }
   0x6   : > { %s1957_s20 = smov (%p25_p0, %s24_s20), 0  ;;  %p45_p3 = por %p44_p2, %p43_p1 }
   0x7   : > { %s32_s21 = ssub.s32 %s1642_s18, %s1957_s20  ;;  %171 = sbr.rel (%p1278_p5) target bundleno = 32 (0x20), region = 20 }
   0x8   : > { %p34_p4 = scmp.eq.s32.totalorder %s32_s21, 0 }
   0xa   : > { %s1709_s23 = scalar_select %p34_p4, %s1634_s16, %s36_s22  }
   0xc   : > { %174 = sbr.rel (!%p45_p3) target bundleno = 32 (0x20), region = 24  ;;  %s176_s24 = sand.u32 (%p45_p3), 1, %s1634_s16  }
   0xd   : > { %s1358_s25 = sshll.u32 (%p45_p3), %s1642_s18, 4  ;;  %s1279_s26 = sshll.u32 (%p45_p3), %s176_s24, 8 }
   0xe   : > { %s1717_s29 = scalar_lea.vmem (%p45_p3), %s1947_s0, %s1358_s25  ;;  %s1722_s30 = scalar_lea.vmem (%p45_p3), [#allocation3], %s1279_s26 }
   0xf   : > { %v197_v0 = vld [vmem:[%s1717_s29] sm:$0xff] (%p45_p3)  ;;  %v199_v1 = vld [vmem:[%s1717_s29 + $0x8] sm:$0xff] (%p45_p3) }
  0x10   : > { %v201_v2 = vld [vmem:[%s1717_s29 + $0x40] sm:$0xff] (%p45_p3)  ;;  %198 = vst [vmem:[%s1722_s30] sm:$0xff] (%p45_p3), %v197_v0  ;;  %200 = vst [vmem:[%s1722_s30 + $0x8] sm:$0xff] (%p45_p3), %v199_v1  ;;  %v203_v3 = vld [vmem:[%s1717_s29 + $0x48] sm:$0xff] (%p45_p3) }
  0x11   : > { %202 = vst [vmem:[%s1722_s30 + $0x10] sm:$0xff] %v201_v2  ;;  %v205_v4 = vld [vmem:[%s1717_s29 + $0x80] sm:$0xff]  ;;  %v207_v5 = vld [vmem:[%s1717_s29 + $0x88] sm:$0xff]  ;;  %204 = vst [vmem:[%s1722_s30 + $0x18] sm:$0xff] %v203_v3 }
  0x12   : > { %206 = vst [vmem:[%s1722_s30 + $0x20] sm:$0xff] %v205_v4  ;;  %208 = vst [vmem:[%s1722_s30 + $0x28] sm:$0xff] %v207_v5  ;;  %v209_v6 = vld [vmem:[%s1717_s29 + $0xc0] sm:$0xff]  ;;  %v211_v7 = vld [vmem:[%s1717_s29 + $0xc8] sm:$0xff] }
  0x13   : > { %v213_v8 = vld [vmem:[%s1717_s29 + $0x100] sm:$0xff]  ;;  %210 = vst [vmem:[%s1722_s30 + $0x30] sm:$0xff] %v209_v6  ;;  %212 = vst [vmem:[%s1722_s30 + $0x38] sm:$0xff] %v211_v7  ;;  %v215_v9 = vld [vmem:[%s1717_s29 + $0x108] sm:$0xff] }
  0x14   : > { %214 = vst [vmem:[%s1722_s30 + $0x40] sm:$0xff] %v213_v8  ;;  %v217_v10 = vld [vmem:[%s1717_s29 + $0x140] sm:$0xff]  ;;  %v219_v11 = vld [vmem:[%s1717_s29 + $0x148] sm:$0xff]  ;;  %216 = vst [vmem:[%s1722_s30 + $0x48] sm:$0xff] %v215_v9 }
  0x15   : > { %218 = vst [vmem:[%s1722_s30 + $0x50] sm:$0xff] %v217_v10  ;;  %220 = vst [vmem:[%s1722_s30 + $0x58] sm:$0xff] %v219_v11  ;;  %v221_v12 = vld [vmem:[%s1717_s29 + $0x180] sm:$0xff]  ;;  %v223_v13 = vld [vmem:[%s1717_s29 + $0x188] sm:$0xff] }
  0x16   : > { %v225_v14 = vld [vmem:[%s1717_s29 + $0x1c0] sm:$0xff]  ;;  %222 = vst [vmem:[%s1722_s30 + $0x60] sm:$0xff] %v221_v12  ;;  %224 = vst [vmem:[%s1722_s30 + $0x68] sm:$0xff] %v223_v13  ;;  %v227_v15 = vld [vmem:[%s1717_s29 + $0x1c8] sm:$0xff] }
  0x17   : > { %226 = vst [vmem:[%s1722_s30 + $0x70] sm:$0xff] %v225_v14  ;;  %v229_v16 = vld [vmem:[%s1717_s29 + $0x200] sm:$0xff]  ;;  %v231_v17 = vld [vmem:[%s1717_s29 + $0x208] sm:$0xff]  ;;  %228 = vst [vmem:[%s1722_s30 + $0x78] sm:$0xff] %v227_v15 }
  0x18   : > { %230 = vst [vmem:[%s1722_s30 + $0x80] sm:$0xff] %v229_v16  ;;  %232 = vst [vmem:[%s1722_s30 + $0x88] sm:$0xff] %v231_v17  ;;  %v233_v18 = vld [vmem:[%s1717_s29 + $0x240] sm:$0xff]  ;;  %v235_v19 = vld [vmem:[%s1717_s29 + $0x248] sm:$0xff] }
  0x19   : > { %v237_v20 = vld [vmem:[%s1717_s29 + $0x280] sm:$0xff]  ;;  %234 = vst [vmem:[%s1722_s30 + $0x90] sm:$0xff] %v233_v18  ;;  %236 = vst [vmem:[%s1722_s30 + $0x98] sm:$0xff] %v235_v19  ;;  %v239_v21 = vld [vmem:[%s1717_s29 + $0x288] sm:$0xff] }
  0x1a   : > { %238 = vst [vmem:[%s1722_s30 + $0xa0] sm:$0xff] %v237_v20  ;;  %v241_v22 = vld [vmem:[%s1717_s29 + $0x2c0] sm:$0xff]  ;;  %v243_v23 = vld [vmem:[%s1717_s29 + $0x2c8] sm:$0xff]  ;;  %240 = vst [vmem:[%s1722_s30 + $0xa8] sm:$0xff] %v239_v21 }
  0x1b   : > { %242 = vst [vmem:[%s1722_s30 + $0xb0] sm:$0xff] %v241_v22  ;;  %244 = vst [vmem:[%s1722_s30 + $0xb8] sm:$0xff] %v243_v23  ;;  %v245_v24 = vld [vmem:[%s1717_s29 + $0x300] sm:$0xff]  ;;  %v247_v25 = vld [vmem:[%s1717_s29 + $0x308] sm:$0xff] }
  0x1c   : > { %v249_v26 = vld [vmem:[%s1717_s29 + $0x340] sm:$0xff]  ;;  %246 = vst [vmem:[%s1722_s30 + $0xc0] sm:$0xff] %v245_v24  ;;  %248 = vst [vmem:[%s1722_s30 + $0xc8] sm:$0xff] %v247_v25  ;;  %v251_v27 = vld [vmem:[%s1717_s29 + $0x348] sm:$0xff] }
  0x1d   : > { %250 = vst [vmem:[%s1722_s30 + $0xd0] sm:$0xff] %v249_v26  ;;  %v253_v28 = vld [vmem:[%s1717_s29 + $0x380] sm:$0xff]  ;;  %v255_v29 = vld [vmem:[%s1717_s29 + $0x388] sm:$0xff]  ;;  %252 = vst [vmem:[%s1722_s30 + $0xd8] sm:$0xff] %v251_v27 }
  0x1e   : > { %254 = vst [vmem:[%s1722_s30 + $0xe0] sm:$0xff] %v253_v28  ;;  %256 = vst [vmem:[%s1722_s30 + $0xe8] sm:$0xff] %v255_v29  ;;  %v257_v30 = vld [vmem:[%s1717_s29 + $0x3c0] sm:$0xff]  ;;  %v259_v31 = vld [vmem:[%s1717_s29 + $0x3c8] sm:$0xff] }
  0x1f   : > { %258 = vst [vmem:[%s1722_s30 + $0xf0] sm:$0xff] %v257_v30  ;;  %260 = vst [vmem:[%s1722_s30 + $0xf8] sm:$0xff] %v259_v31 }
  0x20 PF: > { %p1282_p6 = scmp.ge.s32.totalorder %s1646_s19, 1  ;;  %p274_p7 = scmp.lt.s32.totalorder %s1646_s19, 5 }
  0x22   : > { %p275_p8 = pnand %p1282_p6, %p274_p7 }
  0x23   : > { %s281_s5 = sand.u32 (!%p275_p8), 1, %s1630_s15   ;;  %s1284_s6 = sshll.u32 (!%p275_p8), %s1638_s17, 6 }
  0x24   : > { %278 = sbr.rel (%p275_p8) target bundleno = 402 (0x192), region = 51  ;;  %s1283_s7 = sshll.u32 (!%p275_p8), %s281_s5, 8 }
  0x25   : > { %p318_p9 = scmp.lt.s32.totalorder (!%p275_p8), %s1284_s6, 255  ;;  %s1794_s12 = scalar_lea.vmem (!%p275_p8), [#allocation3], %s1283_s7 }
  0x26   : > { %p1286_p10 = scmp.ne.s32.totalorder (!%p275_p8), %s1638_s17, 0 }
  0x29   : > { %s1959_s6 = smov (!%p318_p9, %s1284_s6), 255  ;;  %337 = sbr.rel (%p1286_p10) target bundleno = 55 (0x37), region = 59 }
  0x2a   : > { %s1285_s8 = sshll.u32 %s1959_s6, 2 }
  0x2b   : > { %s1792_s11 = scalar_lea.vmem %s1948_s1, %s1285_s8 }
  0x2e   : > { %v1648_v32 = vmov 0.0  }
  0x2f   : > { %338 = vst [vmem:[#allocation2 + $0x30] sm:$0xff] %v1648_v32  ;;  %339 = vst [vmem:[#allocation2] sm:$0xff] %v1648_v32 }
  0x30   : > { %340 = vst [vmem:[#allocation2 + $0x58] sm:$0xff] %v1648_v32  ;;  %341 = vst [vmem:[#allocation2 + $0x18] sm:$0xff] %v1648_v32 }
  0x31   : > { %342 = vst [vmem:[#allocation2 + $0x50] sm:$0xff] %v1648_v32  ;;  %343 = vst [vmem:[#allocation2 + $0x68] sm:$0xff] %v1648_v32 }
  0x32   : > { %344 = vst [vmem:[#allocation2 + $0x8] sm:$0xff] %v1648_v32  ;;  %345 = vst [vmem:[#allocation2 + $0x48] sm:$0xff] %v1648_v32 }
  0x33   : > { %346 = vst [vmem:[#allocation2 + $0x40] sm:$0xff] %v1648_v32  ;;  %347 = vst [vmem:[#allocation2 + $0x20] sm:$0xff] %v1648_v32 }
  0x34   : > { %348 = vst [vmem:[#allocation2 + $0x10] sm:$0xff] %v1648_v32  ;;  %349 = vst [vmem:[#allocation2 + $0x38] sm:$0xff] %v1648_v32 }
  0x35   : > { %350 = vst [vmem:[#allocation2 + $0x60] sm:$0xff] %v1648_v32  ;;  %351 = vst [vmem:[#allocation2 + $0x70] sm:$0xff] %v1648_v32 }
  0x36   : > { %352 = vst [vmem:[#allocation2 + $0x78] sm:$0xff] %v1648_v32  ;;  %353 = vst [vmem:[#allocation2 + $0x28] sm:$0xff] %v1648_v32 }
  0x37 PF: > { %v1528_v33 = vld [vmem:[%s1792_s11 + $0x78] sm:$0xff]   ;;  %v1532_v37 = vld [vmem:[%s1792_s11 + $0x70] sm:$0xff]   ;;  %v1536_v41 = vld [vmem:[%s1792_s11 + $0x68] sm:$0xff]   ;;  %p1351_p11 = scmp.ne.s32.totalorder %s1638_s17, 3 }
  0x38   : > { %v1529_v34 = vld [vmem:[%s1792_s11 + $0xf8] sm:$0xff]   ;;  %1359 = vmatprep.subr.bf16.mxu0 %v1528_v33  ;;  %v1533_v38 = vld [vmem:[%s1792_s11 + $0xf0] sm:$0xff]   ;;  %v1537_v42 = vld [vmem:[%s1792_s11 + $0xe8] sm:$0xff]  }
  0x39   : > { %v1530_v35 = vld [vmem:[%s1792_s11 + $0x38] sm:$0xff]   ;;  %1423 = vmatprep.subr.bf16.mxu1 %v1529_v34  ;;  %v1534_v39 = vld [vmem:[%s1792_s11 + $0x30] sm:$0xff]   ;;  %v1538_v43 = vld [vmem:[%s1792_s11 + $0x28] sm:$0xff]  }
  0x3a   : > { %v1531_v36 = vld [vmem:[%s1792_s11 + $0xb8] sm:$0xff]   ;;  %1360 = vmatpush3.bf16.msra.mxu0 %v1530_v35  ;;  %v1535_v40 = vld [vmem:[%s1792_s11 + $0xb0] sm:$0xff]   ;;  %v1539_v44 = vld [vmem:[%s1792_s11 + $0xa8] sm:$0xff]  }
  0x3b   : > { %1424 = vmatpush3.bf16.msra.mxu1 %v1531_v36  ;;  %1361 = vmatprep.subr.bf16.mxu0 %v1532_v37  ;;  %v1540_v45 = vld [vmem:[%s1792_s11 + $0x60] sm:$0xff]   ;;  %v1544_v49 = vld [vmem:[%s1792_s11 + $0x58] sm:$0xff]   ;;  %v1548_v53 = vld [vmem:[%s1792_s11 + $0x50] sm:$0xff]  }
  0x3c   : > { %1425 = vmatprep.subr.bf16.mxu1 %v1533_v38  ;;  %v1541_v46 = vld [vmem:[%s1792_s11 + $0xe0] sm:$0xff]   ;;  %v1545_v50 = vld [vmem:[%s1792_s11 + $0xd8] sm:$0xff]   ;;  %v1549_v54 = vld [vmem:[%s1792_s11 + $0xd0] sm:$0xff]  }
  0x3d   : > { %v1542_v47 = vld [vmem:[%s1792_s11 + $0x20] sm:$0xff]   ;;  %v1546_v51 = vld [vmem:[%s1792_s11 + $0x18] sm:$0xff]   ;;  %v1550_v55 = vld [vmem:[%s1792_s11 + $0x10] sm:$0xff]  }
  0x3e   : > { %1362 = vmatpush3.bf16.msra.mxu0 %v1534_v39  ;;  %v1543_v48 = vld [vmem:[%s1792_s11 + $0xa0] sm:$0xff]   ;;  %v1547_v52 = vld [vmem:[%s1792_s11 + $0x98] sm:$0xff]   ;;  %v1551_v56 = vld [vmem:[%s1792_s11 + $0x90] sm:$0xff]  }
  0x3f   : > { %1426 = vmatpush3.bf16.msra.mxu1 %v1535_v40  ;;  %1363 = vmatprep.subr.bf16.mxu0 %v1536_v41  ;;  %v1552_v57 = vld [vmem:[%s1792_s11 + $0x48] sm:$0xff]   ;;  %v1556_v61 = vld [vmem:[%s1792_s11 + $0x40] sm:$0xff]   ;;  %v354_v40 = vld [vmem:[#allocation2 + $0x30] sm:$0xff] }
  0x40   : > { %1427 = vmatprep.subr.bf16.mxu1 %v1537_v42  ;;  %v1553_v58 = vld [vmem:[%s1792_s11 + $0xc8] sm:$0xff]   ;;  %v1557_v62 = vld [vmem:[%s1792_s11 + $0xc0] sm:$0xff]  }
  0x41   : > { %v1554_v59 = vld [vmem:[%s1792_s11 + $0x8] sm:$0xff]   ;;  %v1558_v63 = vld [vmem:[%s1792_s11] sm:$0xff]  }
  0x42   : > { %1364 = vmatpush3.bf16.msra.mxu0 %v1538_v43  ;;  %v1555_v60 = vld [vmem:[%s1792_s11 + $0x88] sm:$0xff]   ;;  %v1559_v0 = vld [vmem:[%s1792_s11 + $0x80] sm:$0xff]  }
  0x43   : > { %1428 = vmatpush3.bf16.msra.mxu1 %v1539_v44  ;;  %1365 = vmatprep.subr.bf16.mxu0 %v1540_v45  ;;  %v1560_v1 = vld [vmem:[%s1794_s12] ss:$16 sps:$4 sm:$0xff]   ;;  %v1562_v2 = vld [vmem:[%s1794_s12 + $0x4] ss:$16 sps:$4 sm:$0xff]   ;;  %v1563_v3 = vld [vmem:[%s1794_s12 + $0x8] ss:$16 sps:$4 sm:$0xff]  }
  0x44   : > { %1429 = vmatprep.subr.bf16.mxu1 %v1541_v46  ;;  %v1565_v4 = vld [vmem:[%s1794_s12 + $0xc] ss:$16 sps:$4 sm:$0xff]   ;;  %850 = vmatprep.mubr.bf16.mxu0 %v1562_v2  ;;  %v1566_v5 = vld [vmem:[%s1794_s12 + $0x24] ss:$16 sps:$4 sm:$0xff]   ;;  %v1570_v7 = vld [vmem:[%s1794_s12 + $0x20] ss:$16 sps:$4 sm:$0xff]  }
  0x45   : > { %947 = vmatprep.mubr.bf16.mxu1 %v1565_v4  ;;  %v1568_v6 = vld [vmem:[%s1794_s12 + $0x2c] ss:$16 sps:$4 sm:$0xff]   ;;  %v1571_v8 = vld [vmem:[%s1794_s12 + $0x28] ss:$16 sps:$4 sm:$0xff]   ;;  %v1572_v9 = vld [vmem:[%s1794_s12 + $0x44] ss:$16 sps:$4 sm:$0xff]  }
  0x46   : > { %1366 = vmatpush3.bf16.msra.mxu0 %v1542_v47  ;;  %v1574_v10 = vld [vmem:[%s1794_s12 + $0x4c] ss:$16 sps:$4 sm:$0xff]   ;;  %v1576_v11 = vld [vmem:[%s1794_s12 + $0x40] ss:$16 sps:$4 sm:$0xff]   ;;  %v1577_v12 = vld [vmem:[%s1794_s12 + $0x48] ss:$16 sps:$4 sm:$0xff]  }
  0x47   : > { %1430 = vmatpush3.bf16.msra.mxu1 %v1543_v48  ;;  %1367 = vmatprep.subr.bf16.mxu0 %v1544_v49  ;;  %v1578_v13 = vld [vmem:[%s1794_s12 + $0x64] ss:$16 sps:$4 sm:$0xff]   ;;  %v1580_v14 = vld [vmem:[%s1794_s12 + $0x6c] ss:$16 sps:$4 sm:$0xff]   ;;  %v1582_v15 = vld [vmem:[%s1794_s12 + $0x60] ss:$16 sps:$4 sm:$0xff]  }
  0x48   : > { %1431 = vmatprep.subr.bf16.mxu1 %v1545_v50  ;;  %v1583_v16 = vld [vmem:[%s1794_s12 + $0x68] ss:$16 sps:$4 sm:$0xff]   ;;  %v1584_v17 = vld [vmem:[%s1794_s12 + $0x84] ss:$16 sps:$4 sm:$0xff]   ;;  %v1586_v18 = vld [vmem:[%s1794_s12 + $0x8c] ss:$16 sps:$4 sm:$0xff]  }
  0x49   : > { %v1588_v19 = vld [vmem:[%s1794_s12 + $0x80] ss:$16 sps:$4 sm:$0xff]   ;;  %v1589_v20 = vld [vmem:[%s1794_s12 + $0x88] ss:$16 sps:$4 sm:$0xff]   ;;  %v1590_v21 = vld [vmem:[%s1794_s12 + $0xa4] ss:$16 sps:$4 sm:$0xff]  }
  0x4a   : > { %1368 = vmatpush3.bf16.msra.mxu0 %v1546_v51  ;;  %v1592_v22 = vld [vmem:[%s1794_s12 + $0xac] ss:$16 sps:$4 sm:$0xff]   ;;  %v1594_v23 = vld [vmem:[%s1794_s12 + $0xa0] ss:$16 sps:$4 sm:$0xff]   ;;  %v1595_v24 = vld [vmem:[%s1794_s12 + $0xa8] ss:$16 sps:$4 sm:$0xff]  }
  0x4b   : > { %1432 = vmatpush3.bf16.msra.mxu1 %v1547_v52  ;;  %1369 = vmatprep.subr.bf16.mxu0 %v1548_v53  ;;  %v1596_v25 = vld [vmem:[%s1794_s12 + $0xc4] ss:$16 sps:$4 sm:$0xff]   ;;  %v1598_v26 = vld [vmem:[%s1794_s12 + $0xcc] ss:$16 sps:$4 sm:$0xff]   ;;  %v1600_v27 = vld [vmem:[%s1794_s12 + $0xc0] ss:$16 sps:$4 sm:$0xff]  }
  0x4c   : > { %1433 = vmatprep.subr.bf16.mxu1 %v1549_v54  ;;  %v1601_v28 = vld [vmem:[%s1794_s12 + $0xc8] ss:$16 sps:$4 sm:$0xff]   ;;  %v1602_v29 = vld [vmem:[%s1794_s12 + $0xe4] ss:$16 sps:$4 sm:$0xff]   ;;  %v1604_v30 = vld [vmem:[%s1794_s12 + $0xec] ss:$16 sps:$4 sm:$0xff]  }
  0x4d   : > { %v1606_v31 = vld [vmem:[%s1794_s12 + $0xe0] ss:$16 sps:$4 sm:$0xff]   ;;  %v1607_v32 = vld [vmem:[%s1794_s12 + $0xe8] ss:$16 sps:$4 sm:$0xff]  }
  0x4e   : > { %1370 = vmatpush3.bf16.msra.mxu0 %v1550_v55  ;;  %v355_v49 = vld [vmem:[#allocation2] sm:$0xff] }
  0x4f   : > { %1434 = vmatpush3.bf16.msra.mxu1 %v1551_v56  ;;  %1371 = vmatprep.subr.bf16.mxu0 %v1552_v57 }
  0x50   : > { %1435 = vmatprep.subr.bf16.mxu1 %v1553_v58  ;;  %v356_v58 = vld [vmem:[#allocation2 + $0x58] sm:$0xff] }
  0x52   : > { %1372 = vmatpush3.bf16.msra.mxu0 %v1554_v59 }
  0x53   : > { %1436 = vmatpush3.bf16.msra.mxu1 %v1555_v60  ;;  %1373 = vmatprep.subr.bf16.mxu0 %v1556_v61 }
  0x54   : > { %1437 = vmatprep.subr.bf16.mxu1 %v1557_v62 }
  0x56   : > { %1374 = vmatpush3.bf16.msra.mxu0 %v1558_v63 }
  0x57   : > { %1438 = vmatpush3.bf16.msra.mxu1 %v1559_v0 }
  0x59   : > { %851 = vmatmul.mubr.bf16.vlgmr.msra.gmra.mxu0 %v1560_v1 }
  0x5a   : > { %948 = vmatmul.mubr.bf16.vlgmr.msra.gmra.mxu1 %v1563_v3  ;;  %858 = vmatprep.mubr.bf16.mxu0 %v1566_v5  ;;  %v357_v3 = vld [vmem:[#allocation2 + $0x18] sm:$0xff] }
  0x5b   : > { %955 = vmatprep.mubr.bf16.mxu1 %v1568_v6 }
  0x61   : > { %859 = vmatmul.mubr.bf16.gmra.mxu0 %v1570_v7 }
  0x62   : > { %956 = vmatmul.mubr.bf16.gmra.mxu1 %v1571_v8  ;;  %866 = vmatprep.mubr.bf16.mxu0 %v1572_v9 }
  0x63   : > { %963 = vmatprep.mubr.bf16.mxu1 %v1574_v10 }
  0x69   : > { %867 = vmatmul.mubr.bf16.gmra.mxu0 %v1576_v11 }
  0x6a   : > { %964 = vmatmul.mubr.bf16.gmra.mxu1 %v1577_v12  ;;  %874 = vmatprep.mubr.bf16.mxu0 %v1578_v13  ;;  %v358_v12 = vld [vmem:[#allocation2 + $0x50] sm:$0xff] }
  0x6b   : > { %971 = vmatprep.mubr.bf16.mxu1 %v1580_v14 }
  0x71   : > { %875 = vmatmul.mubr.bf16.gmra.mxu0 %v1582_v15 }
  0x72   : > { %972 = vmatmul.mubr.bf16.gmra.mxu1 %v1583_v16  ;;  %882 = vmatprep.mubr.bf16.mxu0 %v1584_v17 }
  0x73   : > { %979 = vmatprep.mubr.bf16.mxu1 %v1586_v18 }
  0x79   : > { %883 = vmatmul.mubr.bf16.gmra.mxu0 %v1588_v19 }
  0x7a   : > { %980 = vmatmul.mubr.bf16.gmra.mxu1 %v1589_v20  ;;  %890 = vmatprep.mubr.bf16.mxu0 %v1590_v21  ;;  %v359_v21 = vld [vmem:[#allocation2 + $0x68] sm:$0xff] }
  0x7b   : > { %987 = vmatprep.mubr.bf16.mxu1 %v1592_v22 }
  0x81   : > { %891 = vmatmul.mubr.bf16.gmra.mxu0 %v1594_v23 }
  0x82   : > { %988 = vmatmul.mubr.bf16.gmra.mxu1 %v1595_v24  ;;  %898 = vmatprep.mubr.bf16.mxu0 %v1596_v25 }
  0x83   : > { %995 = vmatprep.mubr.bf16.mxu1 %v1598_v26 }
  0x89   : > { %899 = vmatmul.mubr.bf16.gmra.mxu0 %v1600_v27 }
  0x8a   : > { %996 = vmatmul.mubr.bf16.gmra.mxu1 %v1601_v28  ;;  %906 = vmatprep.mubr.bf16.mxu0 %v1602_v29 }
  0x8b   : > { %1003 = vmatprep.mubr.bf16.mxu1 %v1604_v30  ;;  %v360_v30 = vld [vmem:[#allocation2 + $0x8] sm:$0xff] }
  0x91   : > { %907 = vmatmul.mubr.bf16.gmra.mxu0 %v1606_v31 }
  0x92   : > { %1004 = vmatmul.mubr.bf16.gmra.mxu1 %v1607_v32 }
 0x119   : > { %v1375_v33 = vpop.f32.mrf.mxu0 }
 0x11a   : > { %v1439_v34 = vpop.f32.mrf.mxu1 }
 0x11b   : > { %v1376_v35 = vpop.f32.mrf.mxu0 }
 0x11c   : > { %v1377_v36 = vadd.f32 %v1376_v35, %v1375_v33  ;;  %v1440_v37 = vpop.f32.mrf.mxu1 }
 0x11d   : > { %v1441_v38 = vadd.f32 %v1440_v37, %v1439_v34  ;;  %v1378_v39 = vpop.f32.mrf.mxu0 }
 0x11e   : > { %v1442_v41 = vpop.f32.mrf.mxu1 }
 0x11f   : > { %v950_v42 = vadd.f32 %v1441_v38, %v1377_v36  ;;  %v1379_v43 = vpop.f32.mrf.mxu0 }
 0x120   : > { %v1380_v44 = vadd.f32 %v1379_v43, %v1378_v39  ;;  %v1443_v45 = vpop.f32.mrf.mxu1  ;;  %v361_v39 = vld [vmem:[#allocation2 + $0x48] sm:$0xff] }
 0x121   : > { %v1012_v46 = vadd.f32 %v950_v42, %v354_v40  ;;  %v1444_v47 = vadd.f32 %v1443_v45, %v1442_v41  ;;  %v1381_v48 = vpop.f32.mrf.mxu0 }
 0x122   : > { %v1445_v50 = vpop.f32.mrf.mxu1 }
 0x123   : > { %1028 = vst [vmem:[#allocation2 + $0x30] sm:$0xff] %v1012_v46  ;;  %v953_v51 = vadd.f32 %v1444_v47, %v1380_v44  ;;  %v1382_v52 = vpop.f32.mrf.mxu0 }
 0x124   : > { %v1383_v53 = vadd.f32 %v1382_v52, %v1381_v48  ;;  %v1446_v54 = vpop.f32.mrf.mxu1  ;;  %v362_v48 = vld [vmem:[#allocation2 + $0x40] sm:$0xff] }
 0x125   : > { %v1013_v55 = vadd.f32 %v953_v51, %v355_v49  ;;  %v1447_v56 = vadd.f32 %v1446_v54, %v1445_v50  ;;  %v1384_v57 = vpop.f32.mrf.mxu0 }
 0x126   : > { %v1448_v59 = vpop.f32.mrf.mxu1 }
 0x127   : > { %1029 = vst [vmem:[#allocation2] sm:$0xff] %v1013_v55  ;;  %v958_v60 = vadd.f32 %v1447_v56, %v1383_v53  ;;  %v1385_v61 = vpop.f32.mrf.mxu0 }
 0x128   : > { %v1386_v62 = vadd.f32 %v1385_v61, %v1384_v57  ;;  %v1449_v63 = vpop.f32.mrf.mxu1  ;;  %v363_v57 = vld [vmem:[#allocation2 + $0x20] sm:$0xff] }
 0x129   : > { %v1014_v0 = vadd.f32 %v958_v60, %v356_v58  ;;  %v1450_v1 = vadd.f32 %v1449_v63, %v1448_v59  ;;  %v1387_v2 = vpop.f32.mrf.mxu0 }
 0x12a   : > { %v1451_v4 = vpop.f32.mrf.mxu1 }
 0x12b   : > { %1030 = vst [vmem:[#allocation2 + $0x58] sm:$0xff] %v1014_v0  ;;  %v961_v5 = vadd.f32 %v1450_v1, %v1386_v62  ;;  %v1388_v6 = vpop.f32.mrf.mxu0 }
 0x12c   : > { %v1389_v7 = vadd.f32 %v1388_v6, %v1387_v2  ;;  %v1452_v8 = vpop.f32.mrf.mxu1  ;;  %v364_v2 = vld [vmem:[#allocation2 + $0x10] sm:$0xff] }
 0x12d   : > { %v1015_v9 = vadd.f32 %v961_v5, %v357_v3  ;;  %v1453_v10 = vadd.f32 %v1452_v8, %v1451_v4  ;;  %v1390_v11 = vpop.f32.mrf.mxu0 }
 0x12e   : > { %v1454_v13 = vpop.f32.mrf.mxu1 }
 0x12f   : > { %1031 = vst [vmem:[#allocation2 + $0x18] sm:$0xff] %v1015_v9  ;;  %v966_v14 = vadd.f32 %v1453_v10, %v1389_v7  ;;  %v1391_v15 = vpop.f32.mrf.mxu0 }
 0x130   : > { %v1392_v16 = vadd.f32 %v1391_v15, %v1390_v11  ;;  %v1455_v17 = vpop.f32.mrf.mxu1  ;;  %v365_v11 = vld [vmem:[#allocation2 + $0x38] sm:$0xff] }
 0x131   : > { %v1016_v18 = vadd.f32 %v966_v14, %v358_v12  ;;  %v1456_v19 = vadd.f32 %v1455_v17, %v1454_v13  ;;  %v1393_v20 = vpop.f32.mrf.mxu0 }
 0x132   : > { %v1457_v22 = vpop.f32.mrf.mxu1 }
 0x133   : > { %1032 = vst [vmem:[#allocation2 + $0x50] sm:$0xff] %v1016_v18  ;;  %v969_v23 = vadd.f32 %v1456_v19, %v1392_v16  ;;  %v1394_v24 = vpop.f32.mrf.mxu0 }
 0x134   : > { %v1395_v25 = vadd.f32 %v1394_v24, %v1393_v20  ;;  %v1458_v26 = vpop.f32.mrf.mxu1  ;;  %v366_v20 = vld [vmem:[#allocation2 + $0x60] sm:$0xff] }
 0x135   : > { %v1017_v27 = vadd.f32 %v969_v23, %v359_v21  ;;  %v1459_v28 = vadd.f32 %v1458_v26, %v1457_v22  ;;  %v1396_v29 = vpop.f32.mrf.mxu0 }
 0x136   : > { %v1460_v31 = vpop.f32.mrf.mxu1 }
 0x137   : > { %1033 = vst [vmem:[#allocation2 + $0x68] sm:$0xff] %v1017_v27  ;;  %v974_v32 = vadd.f32 %v1459_v28, %v1395_v25  ;;  %v1397_v33 = vpop.f32.mrf.mxu0 }
 0x138   : > { %v1398_v34 = vadd.f32 %v1397_v33, %v1396_v29  ;;  %v1461_v35 = vpop.f32.mrf.mxu1  ;;  %v367_v29 = vld [vmem:[#allocation2 + $0x70] sm:$0xff] }
 0x139   : > { %v1018_v36 = vadd.f32 %v974_v32, %v360_v30  ;;  %v1462_v37 = vadd.f32 %v1461_v35, %v1460_v31  ;;  %v1399_v38 = vpop.f32.mrf.mxu0 }
 0x13a   : > { %v1463_v40 = vpop.f32.mrf.mxu1 }
 0x13b   : > { %1034 = vst [vmem:[#allocation2 + $0x8] sm:$0xff] %v1018_v36  ;;  %v977_v41 = vadd.f32 %v1462_v37, %v1398_v34  ;;  %v1400_v42 = vpop.f32.mrf.mxu0 }
 0x13c   : > { %v1401_v43 = vadd.f32 %v1400_v42, %v1399_v38  ;;  %v1464_v44 = vpop.f32.mrf.mxu1  ;;  %v368_v38 = vld [vmem:[#allocation2 + $0x78] sm:$0xff] }
 0x13d   : > { %v1019_v45 = vadd.f32 %v977_v41, %v361_v39  ;;  %v1465_v46 = vadd.f32 %v1464_v44, %v1463_v40  ;;  %v1402_v47 = vpop.f32.mrf.mxu0 }
 0x13e   : > { %v1466_v49 = vpop.f32.mrf.mxu1 }
 0x13f   : > { %1035 = vst [vmem:[#allocation2 + $0x48] sm:$0xff] %v1019_v45  ;;  %v982_v50 = vadd.f32 %v1465_v46, %v1401_v43  ;;  %v1403_v51 = vpop.f32.mrf.mxu0  ;;  %v369_v46 = vld [vmem:[#allocation2 + $0x28] sm:$0xff] }
 0x140   : > { %v1404_v52 = vadd.f32 %v1403_v51, %v1402_v47  ;;  %v1467_v53 = vpop.f32.mrf.mxu1 }
 0x141   : > { %v1020_v54 = vadd.f32 %v982_v50, %v362_v48  ;;  %v1468_v55 = vadd.f32 %v1467_v53, %v1466_v49  ;;  %v1405_v56 = vpop.f32.mrf.mxu0 }
 0x142   : > { %v1469_v58 = vpop.f32.mrf.mxu1 }
 0x143   : > { %1036 = vst [vmem:[#allocation2 + $0x40] sm:$0xff] %v1020_v54  ;;  %v985_v59 = vadd.f32 %v1468_v55, %v1404_v52  ;;  %v1406_v60 = vpop.f32.mrf.mxu0 }
 0x144   : > { %v1407_v61 = vadd.f32 %v1406_v60, %v1405_v56  ;;  %v1470_v62 = vpop.f32.mrf.mxu1 }
 0x145   : > { %v1021_v63 = vadd.f32 %v985_v59, %v363_v57  ;;  %v1471_v0 = vadd.f32 %v1470_v62, %v1469_v58  ;;  %v1408_v1 = vpop.f32.mrf.mxu0 }
 0x146   : > { %v1472_v3 = vpop.f32.mrf.mxu1 }
 0x147   : > { %1037 = vst [vmem:[#allocation2 + $0x20] sm:$0xff] %v1021_v63  ;;  %v990_v4 = vadd.f32 %v1471_v0, %v1407_v61  ;;  %v1409_v5 = vpop.f32.mrf.mxu0 }
 0x148   : > { %v1410_v6 = vadd.f32 %v1409_v5, %v1408_v1  ;;  %v1473_v7 = vpop.f32.mrf.mxu1 }
 0x149   : > { %v1022_v8 = vadd.f32 %v990_v4, %v364_v2  ;;  %v1474_v9 = vadd.f32 %v1473_v7, %v1472_v3  ;;  %v1411_v10 = vpop.f32.mrf.mxu0 }
 0x14a   : > { %v1475_v12 = vpop.f32.mrf.mxu1 }
 0x14b   : > { %1038 = vst [vmem:[#allocation2 + $0x10] sm:$0xff] %v1022_v8  ;;  %v993_v13 = vadd.f32 %v1474_v9, %v1410_v6  ;;  %v1412_v14 = vpop.f32.mrf.mxu0 }
 0x14c   : > { %v1413_v15 = vadd.f32 %v1412_v14, %v1411_v10  ;;  %v1476_v16 = vpop.f32.mrf.mxu1 }
 0x14d   : > { %v1023_v17 = vadd.f32 %v993_v13, %v365_v11  ;;  %v1477_v18 = vadd.f32 %v1476_v16, %v1475_v12  ;;  %v1414_v19 = vpop.f32.mrf.mxu0 }
 0x14e   : > { %v1478_v21 = vpop.f32.mrf.mxu1 }
 0x14f   : > { %1039 = vst [vmem:[#allocation2 + $0x38] sm:$0xff] %v1023_v17  ;;  %v998_v22 = vadd.f32 %v1477_v18, %v1413_v15  ;;  %v1415_v23 = vpop.f32.mrf.mxu0 }
 0x150   : > { %v1416_v24 = vadd.f32 %v1415_v23, %v1414_v19  ;;  %v1479_v25 = vpop.f32.mrf.mxu1 }
 0x151   : > { %v1024_v26 = vadd.f32 %v998_v22, %v366_v20  ;;  %v1480_v27 = vadd.f32 %v1479_v25, %v1478_v21  ;;  %v1417_v28 = vpop.f32.mrf.mxu0 }
 0x152   : > { %v1481_v30 = vpop.f32.mrf.mxu1 }
 0x153   : > { %1040 = vst [vmem:[#allocation2 + $0x60] sm:$0xff] %v1024_v26  ;;  %v1001_v31 = vadd.f32 %v1480_v27, %v1416_v24  ;;  %v1418_v32 = vpop.f32.mrf.mxu0 }
 0x154   : > { %v1419_v33 = vadd.f32 %v1418_v32, %v1417_v28  ;;  %v1482_v34 = vpop.f32.mrf.mxu1 }
 0x155   : > { %v1025_v35 = vadd.f32 %v1001_v31, %v367_v29  ;;  %v1483_v36 = vadd.f32 %v1482_v34, %v1481_v30  ;;  %v1420_v37 = vpop.f32.mrf.mxu0 }
 0x156   : > { %v1484_v39 = vpop.f32.mrf.mxu1 }
 0x157   : > { %1041 = vst [vmem:[#allocation2 + $0x70] sm:$0xff] %v1025_v35  ;;  %v1006_v40 = vadd.f32 %v1483_v36, %v1419_v33  ;;  %v1421_v41 = vpop.f32.mrf.mxu0 }
 0x158   : > { %v1422_v42 = vadd.f32 %v1421_v41, %v1420_v37  ;;  %v1485_v43 = vpop.f32.mrf.mxu1 }
 0x159   : > { %v1026_v44 = vadd.f32 %v1006_v40, %v368_v38  ;;  %v1486_v45 = vadd.f32 %v1485_v43, %v1484_v39 }
 0x15b   : > { %1042 = vst [vmem:[#allocation2 + $0x78] sm:$0xff] %v1026_v44  ;;  %v1009_v47 = vadd.f32 %v1486_v45, %v1422_v42  ;;  %1047 = sbr.rel (%p1351_p11) target bundleno = 402 (0x192), region = 63 }
 0x15d   : > { %v1027_v48 = vadd.f32 %v1009_v47, %v369_v46 }
 0x15f   : > { %1043 = vst [vmem:[#allocation2 + $0x28] sm:$0xff] %v1027_v48 }
 0x160   : > { %v1048_v49 = vld [vmem:[#allocation2 + $0x30] sm:$0xff]  ;;  %v1352_v50 = vld [vmem:[%s1949_s2] ss:$0 sm:$0xff]  ;;  %vm1087_vm0 = vcmask 523264   ;;  %v1050_v54 = vld [vmem:[#allocation2 + $0x58] sm:$0xff]  ;;  %vm1162_vm1 = vcmask 1040384  }
 0x161   : > { %v1049_v51 = vld [vmem:[#allocation2] sm:$0xff]  ;;  %v1071_v52 = vadd.f32 %v1352_v50, %v1048_v49  ;;  %v1051_v55 = vld [vmem:[#allocation2 + $0x18] sm:$0xff]  ;;  %v1052_v56 = vld [vmem:[#allocation2 + $0x50] sm:$0xff]  ;;  %v1073_v57 = vadd.f32 %v1352_v50, %v1050_v54 }
 0x162   : > { %v1072_v53 = vadd.f32 %v1352_v50, %v1049_v51  ;;  %v1074_v58 = vadd.f32 %v1352_v50, %v1051_v55  ;;  %v1075_v59 = vadd.f32 %v1352_v50, %v1052_v56  ;;  %v1053_v60 = vld [vmem:[#allocation2 + $0x68] sm:$0xff]  ;;  %v1056_v3 = vld [vmem:[#allocation2 + $0x40] sm:$0xff]  ;;  %v1058_v5 = vld [vmem:[#allocation2 + $0x10] sm:$0xff] }
 0x163   : > { %v1054_v61 = vld [vmem:[#allocation2 + $0x8] sm:$0xff]  ;;  %1088 = vst.msk [vmem:[%s1950_s3] sm:$0xff] %vm1087_vm0, %v1071_v52  ;;  %v1125_v63 = vmul.f32 %v1071_v52, %v1071_v52  ;;  %v1076_v2 = vadd.f32 %v1352_v50, %v1053_v60  ;;  %v1057_v4 = vld [vmem:[#allocation2 + $0x20] sm:$0xff]  ;;  %1090 = vst.msk [vmem:[%s1950_s3 + $0x10] sm:$0xff] %vm1087_vm0, %v1073_v57  ;;  %v1127_v6 = vmul.f32 %v1073_v57, %v1073_v57 }
 0x164   : > { %v1055_v62 = vld [vmem:[#allocation2 + $0x48] sm:$0xff]  ;;  %1089 = vst.msk [vmem:[%s1950_s3 + $0x8] sm:$0xff] %vm1087_vm0, %v1072_v53  ;;  %v1104_v0 = vadd.f32 %v1072_v53, %v1071_v52  ;;  %v1126_v1 = vmul.f32 %v1072_v53, %v1072_v53  ;;  %1091 = vst.msk [vmem:[%s1950_s3 + $0x18] sm:$0xff] %vm1087_vm0, %v1074_v58  ;;  %v1077_v7 = vadd.f32 %v1352_v50, %v1054_v61  ;;  %v1059_v8 = vld [vmem:[#allocation2 + $0x38] sm:$0xff] }
 0x165   : > { %1092 = vst.msk [vmem:[%s1950_s3 + $0x20] sm:$0xff] %vm1087_vm0, %v1075_v59  ;;  %v1128_v11 = vmul.f32 %v1074_v58, %v1074_v58  ;;  %1093 = vst.msk [vmem:[%s1950_s3 + $0x28] sm:$0xff] %vm1087_vm0, %v1076_v2  ;;  %v1078_v12 = vadd.f32 %v1352_v50, %v1055_v62  ;;  %v1060_v13 = vld [vmem:[#allocation2 + $0x60] sm:$0xff]  ;;  %v1079_v14 = vadd.f32 %v1352_v50, %v1056_v3  ;;  %v1061_v17 = vld [vmem:[#allocation2 + $0x70] sm:$0xff] }
 0x166   : > { %v1141_v9 = vadd.f32 %v1126_v1, %v1125_v63  ;;  %v1105_v10 = vadd.f32 %v1104_v0, %v1073_v57  ;;  %1094 = vst.msk [vmem:[%s1950_s3 + $0x30] sm:$0xff] %vm1087_vm0, %v1077_v7  ;;  %v1080_v15 = vadd.f32 %v1352_v50, %v1057_v4  ;;  %v1081_v16 = vadd.f32 %v1352_v50, %v1058_v5  ;;  %v1062_v22 = vld [vmem:[#allocation2 + $0x78] sm:$0xff]  ;;  %v1063_v23 = vld [vmem:[#allocation2 + $0x28] sm:$0xff] }
 0x167   : > { %v1129_v20 = vmul.f32 %v1075_v59, %v1075_v59  ;;  %1095 = vst.msk [vmem:[%s1950_s3 + $0x38] sm:$0xff] %vm1087_vm0, %v1078_v12  ;;  %v1082_v21 = vadd.f32 %v1352_v50, %v1059_v8  ;;  %1096 = vst.msk [vmem:[%s1950_s3 + $0x40] sm:$0xff] %vm1087_vm0, %v1079_v14  ;;  %v1083_v24 = vadd.f32 %v1352_v50, %v1060_v13 }
 0x168   : > { %v1142_v18 = vadd.f32 %v1141_v9, %v1127_v6  ;;  %v1106_v19 = vadd.f32 %v1105_v10, %v1074_v58  ;;  %1097 = vst.msk [vmem:[%s1950_s3 + $0x48] sm:$0xff] %vm1087_vm0, %v1080_v15  ;;  %1098 = vst.msk [vmem:[%s1950_s3 + $0x50] sm:$0xff] %vm1087_vm0, %v1081_v16  ;;  %v1130_v27 = vmul.f32 %v1076_v2, %v1076_v2 }
 0x169   : > { %1099 = vst.msk [vmem:[%s1950_s3 + $0x58] sm:$0xff] %vm1087_vm0, %v1082_v21  ;;  %v1084_v28 = vadd.f32 %v1352_v50, %v1061_v17  ;;  %1100 = vst.msk [vmem:[%s1950_s3 + $0x60] sm:$0xff] %vm1087_vm0, %v1083_v24  ;;  %v1085_v29 = vadd.f32 %v1352_v50, %v1062_v22  ;;  %v1086_v30 = vadd.f32 %v1352_v50, %v1063_v23 }
 0x16a   : > { %v1143_v25 = vadd.f32 %v1142_v18, %v1128_v11  ;;  %v1107_v26 = vadd.f32 %v1106_v19, %v1075_v59  ;;  %v1131_v33 = vmul.f32 %v1077_v7, %v1077_v7  ;;  %v1132_v36 = vmul.f32 %v1078_v12, %v1078_v12 }
 0x16b   : > { %1101 = vst.msk [vmem:[%s1950_s3 + $0x68] sm:$0xff] %vm1087_vm0, %v1084_v28  ;;  %1102 = vst.msk [vmem:[%s1950_s3 + $0x70] sm:$0xff] %vm1087_vm0, %v1085_v29  ;;  %v1133_v39 = vmul.f32 %v1079_v14, %v1079_v14  ;;  %v1134_v42 = vmul.f32 %v1080_v15, %v1080_v15  ;;  %v1135_v45 = vmul.f32 %v1081_v16, %v1081_v16 }
 0x16c   : > { %v1144_v31 = vadd.f32 %v1143_v25, %v1129_v20  ;;  %v1108_v32 = vadd.f32 %v1107_v26, %v1076_v2  ;;  %1103 = vst.msk [vmem:[%s1950_s3 + $0x78] sm:$0xff] %vm1087_vm0, %v1086_v30  ;;  %v1136_v48 = vmul.f32 %v1082_v21, %v1082_v21  ;;  %v1137_v51 = vmul.f32 %v1083_v24, %v1083_v24 }
 0x16d   : > { %v1138_v54 = vmul.f32 %v1084_v28, %v1084_v28  ;;  %v1139_v57 = vmul.f32 %v1085_v29, %v1085_v29  ;;  %v1140_v60 = vmul.f32 %v1086_v30, %v1086_v30 }
 0x16e   : > { %v1145_v34 = vadd.f32 %v1144_v31, %v1130_v27  ;;  %v1109_v35 = vadd.f32 %v1108_v32, %v1077_v7 }
 0x170   : > { %v1146_v37 = vadd.f32 %v1145_v34, %v1131_v33  ;;  %v1110_v38 = vadd.f32 %v1109_v35, %v1078_v12 }
 0x172   : > { %v1147_v40 = vadd.f32 %v1146_v37, %v1132_v36  ;;  %v1111_v41 = vadd.f32 %v1110_v38, %v1079_v14 }
 0x174   : > { %v1148_v43 = vadd.f32 %v1147_v40, %v1133_v39  ;;  %v1112_v44 = vadd.f32 %v1111_v41, %v1080_v15 }
 0x176   : > { %v1149_v46 = vadd.f32 %v1148_v43, %v1134_v42  ;;  %v1113_v47 = vadd.f32 %v1112_v44, %v1081_v16 }
 0x178   : > { %v1150_v49 = vadd.f32 %v1149_v46, %v1135_v45  ;;  %v1114_v50 = vadd.f32 %v1113_v47, %v1082_v21 }
 0x17a   : > { %v1151_v52 = vadd.f32 %v1150_v49, %v1136_v48  ;;  %v1115_v53 = vadd.f32 %v1114_v50, %v1083_v24 }
 0x17c   : > { %v1152_v55 = vadd.f32 %v1151_v52, %v1137_v51  ;;  %v1116_v56 = vadd.f32 %v1115_v53, %v1084_v28 }
 0x17e   : > { %v1153_v58 = vadd.f32 %v1152_v55, %v1138_v54  ;;  %v1117_v59 = vadd.f32 %v1116_v56, %v1085_v29 }
 0x180   : > { %v1154_v61 = vadd.f32 %v1153_v58, %v1139_v57  ;;  %v1118_v62 = vadd.f32 %v1117_v59, %v1086_v30 }
 0x182   : > { %v1119_v63 = vrot.slane %v1118_v62, 4  ;;  %v1155_v0 = vadd.f32 %v1154_v61, %v1140_v60 }
 0x184   : > { %v1120_v1 = vadd.f32 %v1119_v63, %v1118_v62  ;;  %v1156_v2 = vrot.slane %v1155_v0, 4 }
 0x186   : > { %v1121_v3 = vrot.slane %v1120_v1, 2  ;;  %v1157_v4 = vadd.f32 %v1156_v2, %v1155_v0 }
 0x188   : > { %v1122_v5 = vadd.f32 %v1121_v3, %v1120_v1  ;;  %v1158_v6 = vrot.slane %v1157_v4, 2 }
 0x18a   : > { %v1123_v7 = vrot.slane %v1122_v5, 1  ;;  %v1159_v8 = vadd.f32 %v1158_v6, %v1157_v4 }
 0x18c   : > { %v1124_v9 = vadd.f32 %v1123_v7, %v1122_v5  ;;  %v1160_v10 = vrot.slane %v1159_v8, 1 }
 0x18e   : > { %v1161_v11 = vadd.f32 %v1160_v10, %v1159_v8 }
 0x190   : > { %v1163_v12 = vsel %vm1162_vm1, %v1124_v9, %v1161_v11 }
 0x191   : > { %1164 = vst [vmem:[%s1951_s4] sm:$0x3] %v1163_v12 }
 0x192 PF: > { %s15_s19 = sadd.s32 1, %s1646_s19   ;;  %s1952_s15 = smov %s1634_s16 }
 0x193   : > { %p12_p12 = scmp.ge.s32.totalorder %s15_s19, 6   ;;  %s1953_s16 = smov %s1709_s23 }
 0x194   : > { %s1954_s17 = smov %s1642_s18  ;;  %s1955_s18 = smov %s1957_s20 }
 0x195   :  { %14 = sbr.rel (!%p12_p12) target bundleno = 3 (0x3), region = 113 }

// kernel: discriminator_forward.15
= control target key start
LH: loop header
LB: loop body
LE: loop exit
PB: predicated region body
PF: predicated region fallthrough
CT: control target
= control target key end

     0   :  { %s2172_s0 = inlined_call_operand.vmem [shape: bf16[256,4096], index: 0, kind: input, shape index: {}]   ;;  %s2173_s1 = inlined_call_operand.vmem [shape: bf16[4096,128], index: 1, kind: input, shape index: {}]   ;;  %s2174_s2 = inlined_call_operand.vmem [shape: f32[1,128], index: 2, kind: input, shape index: {}]   ;;  %s2175_s3 = inlined_call_operand.vmem [shape: f32[256,1], index: 3, kind: output, shape index: {0}]   ;;  %s2176_s4 = inlined_call_operand.hbm [shape: f32[2,2,128], index: 4, kind: output, shape index: {1}]  }
   0x1   :  { %2180 = sst [smem:[#allocation9_spill]] %s2172_s0 }
   0x2   :  { %10 = vsyncpa [#allocation5], 0 }
   0x3   :  { %12 = vsyncpa [#allocation5 + $0x1], 0  ;;  %s1825_s15 = smov 0   ;;  %s1827_s16 = smov 0  }
   0x4   :  { %s1829_s17 = smov 0   ;;  %s1831_s18 = smov 0  }
   0x5   :  { %s1833_s19 = smov 0   ;;  %s1835_s20 = smov 0  }
   0x6   :  { %s1837_s21 = smov 0   ;;  %s1839_s22 = smov 0  }
   0x7   :  { %s1841_s23 = smov 0   ;;  %s1843_s24 = smov 0  }
   0x8 LB: > { %s1304_s25 = sadd.s32 4294967295, %s1796_s24   ;;  %s1305_s26 = sadd.s32 4294967294, %s1796_s24   ;;  %s1796_s24 = sphi %s1843_s24, %s18_s24   ;;  %s1792_s23 = sphi %s1841_s23, %s2198_s23   ;;  %s1788_s22 = sphi %s1839_s22, %s2197_s22   ;;  %s1784_s21 = sphi %s1837_s21, %s2196_s21   ;;  %s1780_s20 = sphi %s1835_s20, %s2195_s20   ;;  %s1776_s19 = sphi %s1833_s19, %s2194_s19   ;;  %s1772_s18 = sphi %s1831_s18, %s2193_s18   ;;  %s1768_s17 = sphi %s1829_s17, %s2192_s17   ;;  %s1764_s16 = sphi %s1827_s16, %s2191_s16   ;;  %s1760_s15 = sphi %s1825_s15, %s2190_s15  }
   0x9   : > { %s27_s27 = sadd.s32 1, %s1788_s22  ;;  %s30_s28 = sadd.s32 1, %s1792_s23 }
   0xa   : > { %p28_p0 = scmp.ge.s32.totalorder %s27_s27, 8  ;;  %s39_s29 = sadd.s32 1, %s1776_s19 }
   0xb   : > { %p46_p1 = scmp.ne.s32.totalorder %s1776_s19, %s1772_s18  ;;  %p47_p2 = scmp.eq.s32.totalorder %s1796_s24, 0 }
   0xc   : > { %s2200_s27 = smov (%p28_p0, %s27_s27), 0  ;;  %s2202_s28 = smov (!%p28_p0, %s30_s28), %s1792_s23 }
   0xd   : > { %2181 = sst [smem:[#allocation7_spill]] %s2200_s27  ;;  %s35_s30 = ssub.s32 %s1788_s22, %s2200_s27 }
   0xe   : > { %p1888_p3 = por %p47_p2, %p46_p1  ;;  %p32_p4 = scmp.ge.s32.totalorder %s2202_s28, 2 }
   0xf   : > { %s138_s6 = sadd.s32 1, %s1768_s17  ;;  %p148_p5 = scmp.ne.s32.totalorder %s1768_s17, %s1764_s16 }
  0x10   : > { %p149_p6 = scmp.eq.s32.totalorder %s1304_s25, 15  ;;  %s2204_s28 = smov (%p32_p4, %s2202_s28), 0 }
  0x11   : > { %2183 = sst [smem:[#allocation8_spill]] %s2204_s28  ;;  %p154_p8 = scmp.ne.s32.totalorder %s1764_s16, %s1760_s15 }
  0x12   : > { %p1897_p7 = por %p149_p6, %p148_p5  ;;  %s34_s8 = ssub.s32 %s1792_s23, %s2204_s28 }
  0x13   : > { %p155_p9 = scmp.eq.s32.totalorder %s1305_s26, 15  ;;  %s36_s9 = sor.u32 %s35_s30, %s34_s8 }
  0x14   : > { %p136_p10 = scmp.eq.s32.totalorder %s34_s8, 0  ;;  %p37_p11 = scmp.eq.s32.totalorder %s36_s9, 0 }
  0x15   : > { %p1905_p12 = por %p155_p9, %p154_p8  ;;  %p1307_p13 = scmp.ge.s32.totalorder %s1796_s24, 16 }
  0x16   : > { %s1910_s11 = scalar_select %p136_p10, %s1768_s17, %s138_s6  }
  0x17   : > { %s1913_s12 = scalar_select %p37_p11, %s1776_s19, %s39_s29  }
  0x18   : > { %174 = sbr.rel (%p1307_p13) target bundleno = 55 (0x37), region = 20 }
  0x1d   : > { %177 = sbr.rel (!%p1888_p3) target bundleno = 55 (0x37), region = 24  ;;  %s179_s13 = sand.u32 (%p1888_p3), 1, %s1776_s19  }
  0x1e   : > { %s1310_s14 = sshll.u32 (%p1888_p3), %s1788_s22, 2  ;;  %s1308_s25 = sshll.u32 (%p1888_p3), %s179_s13, 8 }
  0x1f   : > { %s1391_s26 = sshll.u32 (%p1888_p3), %s1792_s23, 9  ;;  %s2186_s0 = sld [smem:[#allocation9_spill]] (%p1888_p3) }
  0x20   : > { %s185_s30 = sadd.s32 (%p1888_p3), %s1391_s26, %s1310_s14  ;;  %s1929_s5 = scalar_lea.vmem (%p1888_p3), [#allocation3], %s1308_s25 }
  0x21   : > { %s1312_s8 = sshll.u32 (%p1888_p3), %s185_s30, 2 }
  0x25   : > { %s1924_s29 = scalar_lea.vmem %s2186_s0, %s1312_s8 }
  0x26   : > { %v200_v0 = vld [vmem:[%s1924_s29] sm:$0xff]  ;;  %v202_v1 = vld [vmem:[%s1924_s29 + $0x8] sm:$0xff] }
  0x27   : > { %v204_v2 = vld [vmem:[%s1924_s29 + $0x80] sm:$0xff]  ;;  %201 = vst [vmem:[%s1929_s5] sm:$0xff] %v200_v0  ;;  %203 = vst [vmem:[%s1929_s5 + $0x8] sm:$0xff] %v202_v1  ;;  %v206_v3 = vld [vmem:[%s1924_s29 + $0x88] sm:$0xff] }
  0x28   : > { %205 = vst [vmem:[%s1929_s5 + $0x10] sm:$0xff] %v204_v2  ;;  %v208_v4 = vld [vmem:[%s1924_s29 + $0x100] sm:$0xff]  ;;  %v210_v5 = vld [vmem:[%s1924_s29 + $0x108] sm:$0xff]  ;;  %207 = vst [vmem:[%s1929_s5 + $0x18] sm:$0xff] %v206_v3 }
  0x29   : > { %209 = vst [vmem:[%s1929_s5 + $0x20] sm:$0xff] %v208_v4  ;;  %211 = vst [vmem:[%s1929_s5 + $0x28] sm:$0xff] %v210_v5  ;;  %v212_v6 = vld [vmem:[%s1924_s29 + $0x180] sm:$0xff]  ;;  %v214_v7 = vld [vmem:[%s1924_s29 + $0x188] sm:$0xff] }
  0x2a   : > { %v216_v8 = vld [vmem:[%s1924_s29 + $0x200] sm:$0xff]  ;;  %213 = vst [vmem:[%s1929_s5 + $0x30] sm:$0xff] %v212_v6  ;;  %215 = vst [vmem:[%s1929_s5 + $0x38] sm:$0xff] %v214_v7  ;;  %v218_v9 = vld [vmem:[%s1924_s29 + $0x208] sm:$0xff] }
  0x2b   : > { %217 = vst [vmem:[%s1929_s5 + $0x40] sm:$0xff] %v216_v8  ;;  %v220_v10 = vld [vmem:[%s1924_s29 + $0x280] sm:$0xff]  ;;  %v222_v11 = vld [vmem:[%s1924_s29 + $0x288] sm:$0xff]  ;;  %219 = vst [vmem:[%s1929_s5 + $0x48] sm:$0xff] %v218_v9 }
  0x2c   : > { %221 = vst [vmem:[%s1929_s5 + $0x50] sm:$0xff] %v220_v10  ;;  %223 = vst [vmem:[%s1929_s5 + $0x58] sm:$0xff] %v222_v11  ;;  %v224_v12 = vld [vmem:[%s1924_s29 + $0x300] sm:$0xff]  ;;  %v226_v13 = vld [vmem:[%s1924_s29 + $0x308] sm:$0xff] }
  0x2d   : > { %v228_v14 = vld [vmem:[%s1924_s29 + $0x380] sm:$0xff]  ;;  %225 = vst [vmem:[%s1929_s5 + $0x60] sm:$0xff] %v224_v12  ;;  %227 = vst [vmem:[%s1929_s5 + $0x68] sm:$0xff] %v226_v13  ;;  %v230_v15 = vld [vmem:[%s1924_s29 + $0x388] sm:$0xff] }
  0x2e   : > { %229 = vst [vmem:[%s1929_s5 + $0x70] sm:$0xff] %v228_v14  ;;  %v232_v16 = vld [vmem:[%s1924_s29 + $0x400] sm:$0xff]  ;;  %v234_v17 = vld [vmem:[%s1924_s29 + $0x408] sm:$0xff]  ;;  %231 = vst [vmem:[%s1929_s5 + $0x78] sm:$0xff] %v230_v15 }
  0x2f   : > { %233 = vst [vmem:[%s1929_s5 + $0x80] sm:$0xff] %v232_v16  ;;  %235 = vst [vmem:[%s1929_s5 + $0x88] sm:$0xff] %v234_v17  ;;  %v236_v18 = vld [vmem:[%s1924_s29 + $0x480] sm:$0xff]  ;;  %v238_v19 = vld [vmem:[%s1924_s29 + $0x488] sm:$0xff] }
  0x30   : > { %v240_v20 = vld [vmem:[%s1924_s29 + $0x500] sm:$0xff]  ;;  %237 = vst [vmem:[%s1929_s5 + $0x90] sm:$0xff] %v236_v18  ;;  %239 = vst [vmem:[%s1929_s5 + $0x98] sm:$0xff] %v238_v19  ;;  %v242_v21 = vld [vmem:[%s1924_s29 + $0x508] sm:$0xff] }
  0x31   : > { %241 = vst [vmem:[%s1929_s5 + $0xa0] sm:$0xff] %v240_v20  ;;  %v244_v22 = vld [vmem:[%s1924_s29 + $0x580] sm:$0xff]  ;;  %v246_v23 = vld [vmem:[%s1924_s29 + $0x588] sm:$0xff]  ;;  %243 = vst [vmem:[%s1929_s5 + $0xa8] sm:$0xff] %v242_v21 }
  0x32   : > { %245 = vst [vmem:[%s1929_s5 + $0xb0] sm:$0xff] %v244_v22  ;;  %247 = vst [vmem:[%s1929_s5 + $0xb8] sm:$0xff] %v246_v23  ;;  %v248_v24 = vld [vmem:[%s1924_s29 + $0x600] sm:$0xff]  ;;  %v250_v25 = vld [vmem:[%s1924_s29 + $0x608] sm:$0xff] }
  0x33   : > { %v252_v26 = vld [vmem:[%s1924_s29 + $0x680] sm:$0xff]  ;;  %249 = vst [vmem:[%s1929_s5 + $0xc0] sm:$0xff] %v248_v24  ;;  %251 = vst [vmem:[%s1929_s5 + $0xc8] sm:$0xff] %v250_v25  ;;  %v254_v27 = vld [vmem:[%s1924_s29 + $0x688] sm:$0xff] }
  0x34   : > { %253 = vst [vmem:[%s1929_s5 + $0xd0] sm:$0xff] %v252_v26  ;;  %v256_v28 = vld [vmem:[%s1924_s29 + $0x700] sm:$0xff]  ;;  %v258_v29 = vld [vmem:[%s1924_s29 + $0x708] sm:$0xff]  ;;  %255 = vst [vmem:[%s1929_s5 + $0xd8] sm:$0xff] %v254_v27 }
  0x35   : > { %257 = vst [vmem:[%s1929_s5 + $0xe0] sm:$0xff] %v256_v28  ;;  %259 = vst [vmem:[%s1929_s5 + $0xe8] sm:$0xff] %v258_v29  ;;  %v260_v30 = vld [vmem:[%s1924_s29 + $0x780] sm:$0xff]  ;;  %v262_v31 = vld [vmem:[%s1924_s29 + $0x788] sm:$0xff] }
  0x36   : > { %261 = vst [vmem:[%s1929_s5 + $0xf0] sm:$0xff] %v260_v30  ;;  %263 = vst [vmem:[%s1929_s5 + $0xf8] sm:$0xff] %v262_v31 }
  0x37 PF: > { %p1313_p0 = scmp.ge.s32.totalorder %s1796_s24, 1  ;;  %p277_p1 = scmp.lt.s32.totalorder %s1796_s24, 17 }
  0x39   : > { %p278_p2 = pnand %p1313_p0, %p277_p1 }
  0x3a   : > { %s284_s13 = sand.u32 (!%p278_p2), 1, %s1772_s18   ;;  %s2178_s14 = sand.u32 (!%p278_p2), 1, %s1764_s16  }
  0x3b   : > { %281 = sbr.rel (%p278_p2) target bundleno = 452 (0x1c4), region = 51  ;;  %s1314_s25 = sshll.u32 (!%p278_p2), %s284_s13, 8 }
  0x3c   : > { %s1998_s26 = sshll.u32 (!%p278_p2), %s2178_s14, 1  ;;  %s1316_s30 = sshll.u32 (!%p278_p2), %s1780_s20, 6 }
  0x3d   : > { %s1318_s8 = sshll.u32 (!%p278_p2), %s1784_s21, 4  ;;  %p322_p3 = scmp.lt.s32.totalorder (!%p278_p2), %s1316_s30, 511 }
  0x3e   : > { %p328_p4 = scmp.lt.s32.totalorder (!%p278_p2), %s1318_s8, 31  ;;  %s2012_s14 = scalar_lea.vmem (!%p278_p2), [#allocation3], %s1314_s25 }
  0x3f   : > { %s318_s27 = scalar_lea.vmem (!%p278_p2), [#allocation4], %s1998_s26  ;;  %p1320_p5 = scmp.ne.s32.totalorder (!%p278_p2), %s1780_s20, 0 }
  0x40   : > { %s2206_s30 = smov (!%p322_p3, %s1316_s30), 511  ;;  %s2208_s8 = smov (!%p328_p4, %s1318_s8), 31 }
  0x41   : > { %s1317_s9 = sshll.u32 %s2206_s30, 2  ;;  %s1319_s0 = sshll.u32 %s2208_s8, 3 }
  0x42   : > { %s2005_s5 = scalar_lea.vmem %s2173_s1, %s1317_s9  ;;  %s2010_s13 = scalar_lea.vmem %s2175_s3, %s1319_s0 }
  0x43   : > { %337 = sbr.rel (%p1320_p5) target bundleno = 81 (0x51), region = 59 }
  0x48   : > { %v1798_v32 = vmov 0.0  }
  0x49   : > { %338 = vst [vmem:[#allocation2 + $0x30] sm:$0xff] %v1798_v32  ;;  %339 = vst [vmem:[#allocation2] sm:$0xff] %v1798_v32 }
  0x4a   : > { %340 = vst [vmem:[#allocation2 + $0x58] sm:$0xff] %v1798_v32  ;;  %341 = vst [vmem:[#allocation2 + $0x18] sm:$0xff] %v1798_v32 }
  0x4b   : > { %342 = vst [vmem:[#allocation2 + $0x50] sm:$0xff] %v1798_v32  ;;  %343 = vst [vmem:[#allocation2 + $0x68] sm:$0xff] %v1798_v32 }
  0x4c   : > { %344 = vst [vmem:[#allocation2 + $0x8] sm:$0xff] %v1798_v32  ;;  %345 = vst [vmem:[#allocation2 + $0x48] sm:$0xff] %v1798_v32 }
  0x4d   : > { %346 = vst [vmem:[#allocation2 + $0x40] sm:$0xff] %v1798_v32  ;;  %347 = vst [vmem:[#allocation2 + $0x20] sm:$0xff] %v1798_v32 }
  0x4e   : > { %348 = vst [vmem:[#allocation2 + $0x10] sm:$0xff] %v1798_v32  ;;  %349 = vst [vmem:[#allocation2 + $0x38] sm:$0xff] %v1798_v32 }
  0x4f   : > { %350 = vst [vmem:[#allocation2 + $0x60] sm:$0xff] %v1798_v32  ;;  %351 = vst [vmem:[#allocation2 + $0x70] sm:$0xff] %v1798_v32 }
  0x50   : > { %352 = vst [vmem:[#allocation2 + $0x78] sm:$0xff] %v1798_v32  ;;  %353 = vst [vmem:[#allocation2 + $0x28] sm:$0xff] %v1798_v32 }
  0x51 PF: > { %v1608_v33 = vld [vmem:[%s2005_s5 + $0x78] sm:$0xff]   ;;  %v1612_v37 = vld [vmem:[%s2005_s5 + $0x70] sm:$0xff]   ;;  %v1616_v41 = vld [vmem:[%s2005_s5 + $0x68] sm:$0xff]   ;;  %p1385_p6 = scmp.ne.s32.totalorder %s1780_s20, 7 }
  0x52   : > { %v1609_v34 = vld [vmem:[%s2005_s5 + $0xf8] sm:$0xff]   ;;  %1392 = vmatprep.subr.bf16.mxu0 %v1608_v33  ;;  %v1613_v38 = vld [vmem:[%s2005_s5 + $0xf0] sm:$0xff]   ;;  %v1617_v42 = vld [vmem:[%s2005_s5 + $0xe8] sm:$0xff]  }
  0x53   : > { %v1610_v35 = vld [vmem:[%s2005_s5 + $0x38] sm:$0xff]   ;;  %1456 = vmatprep.subr.bf16.mxu1 %v1609_v34  ;;  %v1614_v39 = vld [vmem:[%s2005_s5 + $0x30] sm:$0xff]   ;;  %v1618_v43 = vld [vmem:[%s2005_s5 + $0x28] sm:$0xff]  }
  0x54   : > { %v1611_v36 = vld [vmem:[%s2005_s5 + $0xb8] sm:$0xff]   ;;  %1393 = vmatpush3.bf16.msra.mxu0 %v1610_v35  ;;  %v1615_v40 = vld [vmem:[%s2005_s5 + $0xb0] sm:$0xff]   ;;  %v1619_v44 = vld [vmem:[%s2005_s5 + $0xa8] sm:$0xff]  }
  0x55   : > { %1457 = vmatpush3.bf16.msra.mxu1 %v1611_v36  ;;  %1394 = vmatprep.subr.bf16.mxu0 %v1612_v37  ;;  %v1620_v45 = vld [vmem:[%s2005_s5 + $0x60] sm:$0xff]   ;;  %v1624_v49 = vld [vmem:[%s2005_s5 + $0x58] sm:$0xff]   ;;  %v1628_v53 = vld [vmem:[%s2005_s5 + $0x50] sm:$0xff]  }
  0x56   : > { %1458 = vmatprep.subr.bf16.mxu1 %v1613_v38  ;;  %v1621_v46 = vld [vmem:[%s2005_s5 + $0xe0] sm:$0xff]   ;;  %v1625_v50 = vld [vmem:[%s2005_s5 + $0xd8] sm:$0xff]   ;;  %v1629_v54 = vld [vmem:[%s2005_s5 + $0xd0] sm:$0xff]  }
  0x57   : > { %v1622_v47 = vld [vmem:[%s2005_s5 + $0x20] sm:$0xff]   ;;  %v1626_v51 = vld [vmem:[%s2005_s5 + $0x18] sm:$0xff]   ;;  %v1630_v55 = vld [vmem:[%s2005_s5 + $0x10] sm:$0xff]  }
  0x58   : > { %1395 = vmatpush3.bf16.msra.mxu0 %v1614_v39  ;;  %v1623_v48 = vld [vmem:[%s2005_s5 + $0xa0] sm:$0xff]   ;;  %v1627_v52 = vld [vmem:[%s2005_s5 + $0x98] sm:$0xff]   ;;  %v1631_v56 = vld [vmem:[%s2005_s5 + $0x90] sm:$0xff]  }
  0x59   : > { %1459 = vmatpush3.bf16.msra.mxu1 %v1615_v40  ;;  %1396 = vmatprep.subr.bf16.mxu0 %v1616_v41  ;;  %v1632_v57 = vld [vmem:[%s2005_s5 + $0x48] sm:$0xff]   ;;  %v1636_v61 = vld [vmem:[%s2005_s5 + $0x40] sm:$0xff]   ;;  %v354_v40 = vld [vmem:[#allocation2 + $0x30] sm:$0xff] }
  0x5a   : > { %1460 = vmatprep.subr.bf16.mxu1 %v1617_v42  ;;  %v1633_v58 = vld [vmem:[%s2005_s5 + $0xc8] sm:$0xff]   ;;  %v1637_v62 = vld [vmem:[%s2005_s5 + $0xc0] sm:$0xff]  }
  0x5b   : > { %v1634_v59 = vld [vmem:[%s2005_s5 + $0x8] sm:$0xff]   ;;  %v1638_v63 = vld [vmem:[%s2005_s5] sm:$0xff]  }
  0x5c   : > { %1397 = vmatpush3.bf16.msra.mxu0 %v1618_v43  ;;  %v1635_v60 = vld [vmem:[%s2005_s5 + $0x88] sm:$0xff]   ;;  %v1639_v0 = vld [vmem:[%s2005_s5 + $0x80] sm:$0xff]  }
  0x5d   : > { %1461 = vmatpush3.bf16.msra.mxu1 %v1619_v44  ;;  %1398 = vmatprep.subr.bf16.mxu0 %v1620_v45  ;;  %v1640_v1 = vld [vmem:[%s2012_s14] ss:$16 sps:$4 sm:$0xff]   ;;  %v1642_v2 = vld [vmem:[%s2012_s14 + $0x4] ss:$16 sps:$4 sm:$0xff]   ;;  %v1643_v3 = vld [vmem:[%s2012_s14 + $0x8] ss:$16 sps:$4 sm:$0xff]  }
  0x5e   : > { %1462 = vmatprep.subr.bf16.mxu1 %v1621_v46  ;;  %v1645_v4 = vld [vmem:[%s2012_s14 + $0xc] ss:$16 sps:$4 sm:$0xff]   ;;  %850 = vmatprep.mubr.bf16.mxu0 %v1642_v2  ;;  %v1646_v5 = vld [vmem:[%s2012_s14 + $0x24] ss:$16 sps:$4 sm:$0xff]   ;;  %v1650_v7 = vld [vmem:[%s2012_s14 + $0x20] ss:$16 sps:$4 sm:$0xff]  }
  0x5f   : > { %947 = vmatprep.mubr.bf16.mxu1 %v1645_v4  ;;  %v1648_v6 = vld [vmem:[%s2012_s14 + $0x2c] ss:$16 sps:$4 sm:$0xff]   ;;  %v1651_v8 = vld [vmem:[%s2012_s14 + $0x28] ss:$16 sps:$4 sm:$0xff]   ;;  %v1652_v9 = vld [vmem:[%s2012_s14 + $0x44] ss:$16 sps:$4 sm:$0xff]  }
  0x60   : > { %1399 = vmatpush3.bf16.msra.mxu0 %v1622_v47  ;;  %v1654_v10 = vld [vmem:[%s2012_s14 + $0x4c] ss:$16 sps:$4 sm:$0xff]   ;;  %v1656_v11 = vld [vmem:[%s2012_s14 + $0x40] ss:$16 sps:$4 sm:$0xff]   ;;  %v1657_v12 = vld [vmem:[%s2012_s14 + $0x48] ss:$16 sps:$4 sm:$0xff]  }
  0x61   : > { %1463 = vmatpush3.bf16.msra.mxu1 %v1623_v48  ;;  %1400 = vmatprep.subr.bf16.mxu0 %v1624_v49  ;;  %v1658_v13 = vld [vmem:[%s2012_s14 + $0x64] ss:$16 sps:$4 sm:$0xff]   ;;  %v1660_v14 = vld [vmem:[%s2012_s14 + $0x6c] ss:$16 sps:$4 sm:$0xff]   ;;  %v1662_v15 = vld [vmem:[%s2012_s14 + $0x60] ss:$16 sps:$4 sm:$0xff]  }
  0x62   : > { %1464 = vmatprep.subr.bf16.mxu1 %v1625_v50  ;;  %v1663_v16 = vld [vmem:[%s2012_s14 + $0x68] ss:$16 sps:$4 sm:$0xff]   ;;  %v1664_v17 = vld [vmem:[%s2012_s14 + $0x84] ss:$16 sps:$4 sm:$0xff]   ;;  %v1666_v18 = vld [vmem:[%s2012_s14 + $0x8c] ss:$16 sps:$4 sm:$0xff]  }
  0x63   : > { %v1668_v19 = vld [vmem:[%s2012_s14 + $0x80] ss:$16 sps:$4 sm:$0xff]   ;;  %v1669_v20 = vld [vmem:[%s2012_s14 + $0x88] ss:$16 sps:$4 sm:$0xff]   ;;  %v1670_v21 = vld [vmem:[%s2012_s14 + $0xa4] ss:$16 sps:$4 sm:$0xff]  }
  0x64   : > { %1401 = vmatpush3.bf16.msra.mxu0 %v1626_v51  ;;  %v1672_v22 = vld [vmem:[%s2012_s14 + $0xac] ss:$16 sps:$4 sm:$0xff]   ;;  %v1674_v23 = vld [vmem:[%s2012_s14 + $0xa0] ss:$16 sps:$4 sm:$0xff]   ;;  %v1675_v24 = vld [vmem:[%s2012_s14 + $0xa8] ss:$16 sps:$4 sm:$0xff]  }
  0x65   : > { %1465 = vmatpush3.bf16.msra.mxu1 %v1627_v52  ;;  %1402 = vmatprep.subr.bf16.mxu0 %v1628_v53  ;;  %v1676_v25 = vld [vmem:[%s2012_s14 + $0xc4] ss:$16 sps:$4 sm:$0xff]   ;;  %v1678_v26 = vld [vmem:[%s2012_s14 + $0xcc] ss:$16 sps:$4 sm:$0xff]   ;;  %v1680_v27 = vld [vmem:[%s2012_s14 + $0xc0] ss:$16 sps:$4 sm:$0xff]  }
  0x66   : > { %1466 = vmatprep.subr.bf16.mxu1 %v1629_v54  ;;  %v1681_v28 = vld [vmem:[%s2012_s14 + $0xc8] ss:$16 sps:$4 sm:$0xff]   ;;  %v1682_v29 = vld [vmem:[%s2012_s14 + $0xe4] ss:$16 sps:$4 sm:$0xff]   ;;  %v1684_v30 = vld [vmem:[%s2012_s14 + $0xec] ss:$16 sps:$4 sm:$0xff]  }
  0x67   : > { %v1686_v31 = vld [vmem:[%s2012_s14 + $0xe0] ss:$16 sps:$4 sm:$0xff]   ;;  %v1687_v32 = vld [vmem:[%s2012_s14 + $0xe8] ss:$16 sps:$4 sm:$0xff]  }
  0x68   : > { %1403 = vmatpush3.bf16.msra.mxu0 %v1630_v55  ;;  %v355_v49 = vld [vmem:[#allocation2] sm:$0xff] }
  0x69   : > { %1467 = vmatpush3.bf16.msra.mxu1 %v1631_v56  ;;  %1404 = vmatprep.subr.bf16.mxu0 %v1632_v57 }
  0x6a   : > { %1468 = vmatprep.subr.bf16.mxu1 %v1633_v58  ;;  %v356_v58 = vld [vmem:[#allocation2 + $0x58] sm:$0xff] }
  0x6c   : > { %1405 = vmatpush3.bf16.msra.mxu0 %v1634_v59 }
  0x6d   : > { %1469 = vmatpush3.bf16.msra.mxu1 %v1635_v60  ;;  %1406 = vmatprep.subr.bf16.mxu0 %v1636_v61 }
  0x6e   : > { %1470 = vmatprep.subr.bf16.mxu1 %v1637_v62 }
  0x70   : > { %1407 = vmatpush3.bf16.msra.mxu0 %v1638_v63 }
  0x71   : > { %1471 = vmatpush3.bf16.msra.mxu1 %v1639_v0 }
  0x73   : > { %851 = vmatmul.mubr.bf16.vlgmr.msra.gmra.mxu0 %v1640_v1 }
  0x74   : > { %948 = vmatmul.mubr.bf16.vlgmr.msra.gmra.mxu1 %v1643_v3  ;;  %858 = vmatprep.mubr.bf16.mxu0 %v1646_v5  ;;  %v357_v3 = vld [vmem:[#allocation2 + $0x18] sm:$0xff] }
  0x75   : > { %955 = vmatprep.mubr.bf16.mxu1 %v1648_v6 }
  0x7b   : > { %859 = vmatmul.mubr.bf16.gmra.mxu0 %v1650_v7 }
  0x7c   : > { %956 = vmatmul.mubr.bf16.gmra.mxu1 %v1651_v8  ;;  %866 = vmatprep.mubr.bf16.mxu0 %v1652_v9 }
  0x7d   : > { %963 = vmatprep.mubr.bf16.mxu1 %v1654_v10 }
  0x83   : > { %867 = vmatmul.mubr.bf16.gmra.mxu0 %v1656_v11 }
  0x84   : > { %964 = vmatmul.mubr.bf16.gmra.mxu1 %v1657_v12  ;;  %874 = vmatprep.mubr.bf16.mxu0 %v1658_v13  ;;  %v358_v12 = vld [vmem:[#allocation2 + $0x50] sm:$0xff] }
  0x85   : > { %971 = vmatprep.mubr.bf16.mxu1 %v1660_v14 }
  0x8b   : > { %875 = vmatmul.mubr.bf16.gmra.mxu0 %v1662_v15 }
  0x8c   : > { %972 = vmatmul.mubr.bf16.gmra.mxu1 %v1663_v16  ;;  %882 = vmatprep.mubr.bf16.mxu0 %v1664_v17 }
  0x8d   : > { %979 = vmatprep.mubr.bf16.mxu1 %v1666_v18 }
  0x93   : > { %883 = vmatmul.mubr.bf16.gmra.mxu0 %v1668_v19 }
  0x94   : > { %980 = vmatmul.mubr.bf16.gmra.mxu1 %v1669_v20  ;;  %890 = vmatprep.mubr.bf16.mxu0 %v1670_v21  ;;  %v359_v21 = vld [vmem:[#allocation2 + $0x68] sm:$0xff] }
  0x95   : > { %987 = vmatprep.mubr.bf16.mxu1 %v1672_v22 }
  0x9b   : > { %891 = vmatmul.mubr.bf16.gmra.mxu0 %v1674_v23 }
  0x9c   : > { %988 = vmatmul.mubr.bf16.gmra.mxu1 %v1675_v24  ;;  %898 = vmatprep.mubr.bf16.mxu0 %v1676_v25 }
  0x9d   : > { %995 = vmatprep.mubr.bf16.mxu1 %v1678_v26 }
  0xa3   : > { %899 = vmatmul.mubr.bf16.gmra.mxu0 %v1680_v27 }
  0xa4   : > { %996 = vmatmul.mubr.bf16.gmra.mxu1 %v1681_v28  ;;  %906 = vmatprep.mubr.bf16.mxu0 %v1682_v29 }
  0xa5   : > { %1003 = vmatprep.mubr.bf16.mxu1 %v1684_v30  ;;  %v360_v30 = vld [vmem:[#allocation2 + $0x8] sm:$0xff] }
  0xab   : > { %907 = vmatmul.mubr.bf16.gmra.mxu0 %v1686_v31 }
  0xac   : > { %1004 = vmatmul.mubr.bf16.gmra.mxu1 %v1687_v32 }
 0x133   : > { %v1408_v33 = vpop.f32.mrf.mxu0 }
 0x134   : > { %v1472_v34 = vpop.f32.mrf.mxu1 }
 0x135   : > { %v1409_v35 = vpop.f32.mrf.mxu0 }
 0x136   : > { %v1410_v36 = vadd.f32 %v1409_v35, %v1408_v33  ;;  %v1473_v37 = vpop.f32.mrf.mxu1 }
 0x137   : > { %v1474_v38 = vadd.f32 %v1473_v37, %v1472_v34  ;;  %v1411_v39 = vpop.f32.mrf.mxu0 }
 0x138   : > { %v1475_v41 = vpop.f32.mrf.mxu1 }
 0x139   : > { %v950_v42 = vadd.f32 %v1474_v38, %v1410_v36  ;;  %v1412_v43 = vpop.f32.mrf.mxu0 }
 0x13a   : > { %v1413_v44 = vadd.f32 %v1412_v43, %v1411_v39  ;;  %v1476_v45 = vpop.f32.mrf.mxu1  ;;  %v361_v39 = vld [vmem:[#allocation2 + $0x48] sm:$0xff] }
 0x13b   : > { %v1012_v46 = vadd.f32 %v950_v42, %v354_v40  ;;  %v1477_v47 = vadd.f32 %v1476_v45, %v1475_v41  ;;  %v1414_v48 = vpop.f32.mrf.mxu0 }
 0x13c   : > { %v1478_v50 = vpop.f32.mrf.mxu1 }
 0x13d   : > { %1028 = vst [vmem:[#allocation2 + $0x30] sm:$0xff] %v1012_v46  ;;  %v953_v51 = vadd.f32 %v1477_v47, %v1413_v44  ;;  %v1415_v52 = vpop.f32.mrf.mxu0 }
 0x13e   : > { %v1416_v53 = vadd.f32 %v1415_v52, %v1414_v48  ;;  %v1479_v54 = vpop.f32.mrf.mxu1  ;;  %v362_v48 = vld [vmem:[#allocation2 + $0x40] sm:$0xff] }
 0x13f   : > { %v1013_v55 = vadd.f32 %v953_v51, %v355_v49  ;;  %v1480_v56 = vadd.f32 %v1479_v54, %v1478_v50  ;;  %v1417_v57 = vpop.f32.mrf.mxu0 }
 0x140   : > { %v1481_v59 = vpop.f32.mrf.mxu1 }
 0x141   : > { %1029 = vst [vmem:[#allocation2] sm:$0xff] %v1013_v55  ;;  %v958_v60 = vadd.f32 %v1480_v56, %v1416_v53  ;;  %v1418_v61 = vpop.f32.mrf.mxu0 }
 0x142   : > { %v1419_v62 = vadd.f32 %v1418_v61, %v1417_v57  ;;  %v1482_v63 = vpop.f32.mrf.mxu1  ;;  %v363_v57 = vld [vmem:[#allocation2 + $0x20] sm:$0xff] }
 0x143   : > { %v1014_v0 = vadd.f32 %v958_v60, %v356_v58  ;;  %v1483_v1 = vadd.f32 %v1482_v63, %v1481_v59  ;;  %v1420_v2 = vpop.f32.mrf.mxu0 }
 0x144   : > { %v1484_v4 = vpop.f32.mrf.mxu1 }
 0x145   : > { %1030 = vst [vmem:[#allocation2 + $0x58] sm:$0xff] %v1014_v0  ;;  %v961_v5 = vadd.f32 %v1483_v1, %v1419_v62  ;;  %v1421_v6 = vpop.f32.mrf.mxu0 }
 0x146   : > { %v1422_v7 = vadd.f32 %v1421_v6, %v1420_v2  ;;  %v1485_v8 = vpop.f32.mrf.mxu1  ;;  %v364_v2 = vld [vmem:[#allocation2 + $0x10] sm:$0xff] }
 0x147   : > { %v1015_v9 = vadd.f32 %v961_v5, %v357_v3  ;;  %v1486_v10 = vadd.f32 %v1485_v8, %v1484_v4  ;;  %v1423_v11 = vpop.f32.mrf.mxu0 }
 0x148   : > { %v1487_v13 = vpop.f32.mrf.mxu1 }
 0x149   : > { %1031 = vst [vmem:[#allocation2 + $0x18] sm:$0xff] %v1015_v9  ;;  %v966_v14 = vadd.f32 %v1486_v10, %v1422_v7  ;;  %v1424_v15 = vpop.f32.mrf.mxu0 }
 0x14a   : > { %v1425_v16 = vadd.f32 %v1424_v15, %v1423_v11  ;;  %v1488_v17 = vpop.f32.mrf.mxu1  ;;  %v365_v11 = vld [vmem:[#allocation2 + $0x38] sm:$0xff] }
 0x14b   : > { %v1016_v18 = vadd.f32 %v966_v14, %v358_v12  ;;  %v1489_v19 = vadd.f32 %v1488_v17, %v1487_v13  ;;  %v1426_v20 = vpop.f32.mrf.mxu0 }
 0x14c   : > { %v1490_v22 = vpop.f32.mrf.mxu1 }
 0x14d   : > { %1032 = vst [vmem:[#allocation2 + $0x50] sm:$0xff] %v1016_v18  ;;  %v969_v23 = vadd.f32 %v1489_v19, %v1425_v16  ;;  %v1427_v24 = vpop.f32.mrf.mxu0 }
 0x14e   : > { %v1428_v25 = vadd.f32 %v1427_v24, %v1426_v20  ;;  %v1491_v26 = vpop.f32.mrf.mxu1  ;;  %v366_v20 = vld [vmem:[#allocation2 + $0x60] sm:$0xff] }
 0x14f   : > { %v1017_v27 = vadd.f32 %v969_v23, %v359_v21  ;;  %v1492_v28 = vadd.f32 %v1491_v26, %v1490_v22  ;;  %v1429_v29 = vpop.f32.mrf.mxu0 }
 0x150   : > { %v1493_v31 = vpop.f32.mrf.mxu1 }
 0x151   : > { %1033 = vst [vmem:[#allocation2 + $0x68] sm:$0xff] %v1017_v27  ;;  %v974_v32 = vadd.f32 %v1492_v28, %v1428_v25  ;;  %v1430_v33 = vpop.f32.mrf.mxu0 }
 0x152   : > { %v1431_v34 = vadd.f32 %v1430_v33, %v1429_v29  ;;  %v1494_v35 = vpop.f32.mrf.mxu1  ;;  %v367_v29 = vld [vmem:[#allocation2 + $0x70] sm:$0xff] }
 0x153   : > { %v1018_v36 = vadd.f32 %v974_v32, %v360_v30  ;;  %v1495_v37 = vadd.f32 %v1494_v35, %v1493_v31  ;;  %v1432_v38 = vpop.f32.mrf.mxu0 }
 0x154   : > { %v1496_v40 = vpop.f32.mrf.mxu1 }
 0x155   : > { %1034 = vst [vmem:[#allocation2 + $0x8] sm:$0xff] %v1018_v36  ;;  %v977_v41 = vadd.f32 %v1495_v37, %v1431_v34  ;;  %v1433_v42 = vpop.f32.mrf.mxu0 }
 0x156   : > { %v1434_v43 = vadd.f32 %v1433_v42, %v1432_v38  ;;  %v1497_v44 = vpop.f32.mrf.mxu1  ;;  %v368_v38 = vld [vmem:[#allocation2 + $0x78] sm:$0xff] }
 0x157   : > { %v1019_v45 = vadd.f32 %v977_v41, %v361_v39  ;;  %v1498_v46 = vadd.f32 %v1497_v44, %v1496_v40  ;;  %v1435_v47 = vpop.f32.mrf.mxu0 }
 0x158   : > { %v1499_v49 = vpop.f32.mrf.mxu1 }
 0x159   : > { %1035 = vst [vmem:[#allocation2 + $0x48] sm:$0xff] %v1019_v45  ;;  %v982_v50 = vadd.f32 %v1498_v46, %v1434_v43  ;;  %v1436_v51 = vpop.f32.mrf.mxu0  ;;  %v369_v46 = vld [vmem:[#allocation2 + $0x28] sm:$0xff] }
 0x15a   : > { %v1437_v52 = vadd.f32 %v1436_v51, %v1435_v47  ;;  %v1500_v53 = vpop.f32.mrf.mxu1 }
 0x15b   : > { %v1020_v54 = vadd.f32 %v982_v50, %v362_v48  ;;  %v1501_v55 = vadd.f32 %v1500_v53, %v1499_v49  ;;  %v1438_v56 = vpop.f32.mrf.mxu0 }
 0x15c   : > { %v1502_v58 = vpop.f32.mrf.mxu1 }
 0x15d   : > { %1036 = vst [vmem:[#allocation2 + $0x40] sm:$0xff] %v1020_v54  ;;  %v985_v59 = vadd.f32 %v1501_v55, %v1437_v52  ;;  %v1439_v60 = vpop.f32.mrf.mxu0 }
 0x15e   : > { %v1440_v61 = vadd.f32 %v1439_v60, %v1438_v56  ;;  %v1503_v62 = vpop.f32.mrf.mxu1 }
 0x15f   : > { %v1021_v63 = vadd.f32 %v985_v59, %v363_v57  ;;  %v1504_v0 = vadd.f32 %v1503_v62, %v1502_v58  ;;  %v1441_v1 = vpop.f32.mrf.mxu0 }
 0x160   : > { %v1505_v3 = vpop.f32.mrf.mxu1 }
 0x161   : > { %1037 = vst [vmem:[#allocation2 + $0x20] sm:$0xff] %v1021_v63  ;;  %v990_v4 = vadd.f32 %v1504_v0, %v1440_v61  ;;  %v1442_v5 = vpop.f32.mrf.mxu0 }
 0x162   : > { %v1443_v6 = vadd.f32 %v1442_v5, %v1441_v1  ;;  %v1506_v7 = vpop.f32.mrf.mxu1 }
 0x163   : > { %v1022_v8 = vadd.f32 %v990_v4, %v364_v2  ;;  %v1507_v9 = vadd.f32 %v1506_v7, %v1505_v3  ;;  %v1444_v10 = vpop.f32.mrf.mxu0 }
 0x164   : > { %v1508_v12 = vpop.f32.mrf.mxu1 }
 0x165   : > { %1038 = vst [vmem:[#allocation2 + $0x10] sm:$0xff] %v1022_v8  ;;  %v993_v13 = vadd.f32 %v1507_v9, %v1443_v6  ;;  %v1445_v14 = vpop.f32.mrf.mxu0 }
 0x166   : > { %v1446_v15 = vadd.f32 %v1445_v14, %v1444_v10  ;;  %v1509_v16 = vpop.f32.mrf.mxu1 }
 0x167   : > { %v1023_v17 = vadd.f32 %v993_v13, %v365_v11  ;;  %v1510_v18 = vadd.f32 %v1509_v16, %v1508_v12  ;;  %v1447_v19 = vpop.f32.mrf.mxu0 }
 0x168   : > { %v1511_v21 = vpop.f32.mrf.mxu1 }
 0x169   : > { %1039 = vst [vmem:[#allocation2 + $0x38] sm:$0xff] %v1023_v17  ;;  %v998_v22 = vadd.f32 %v1510_v18, %v1446_v15  ;;  %v1448_v23 = vpop.f32.mrf.mxu0 }
 0x16a   : > { %v1449_v24 = vadd.f32 %v1448_v23, %v1447_v19  ;;  %v1512_v25 = vpop.f32.mrf.mxu1 }
 0x16b   : > { %v1024_v26 = vadd.f32 %v998_v22, %v366_v20  ;;  %v1513_v27 = vadd.f32 %v1512_v25, %v1511_v21  ;;  %v1450_v28 = vpop.f32.mrf.mxu0 }
 0x16c   : > { %v1514_v30 = vpop.f32.mrf.mxu1 }
 0x16d   : > { %1040 = vst [vmem:[#allocation2 + $0x60] sm:$0xff] %v1024_v26  ;;  %v1001_v31 = vadd.f32 %v1513_v27, %v1449_v24  ;;  %v1451_v32 = vpop.f32.mrf.mxu0 }
 0x16e   : > { %v1452_v33 = vadd.f32 %v1451_v32, %v1450_v28  ;;  %v1515_v34 = vpop.f32.mrf.mxu1 }
 0x16f   : > { %v1025_v35 = vadd.f32 %v1001_v31, %v367_v29  ;;  %v1516_v36 = vadd.f32 %v1515_v34, %v1514_v30  ;;  %v1453_v37 = vpop.f32.mrf.mxu0 }
 0x170   : > { %v1517_v39 = vpop.f32.mrf.mxu1 }
 0x171   : > { %1041 = vst [vmem:[#allocation2 + $0x70] sm:$0xff] %v1025_v35  ;;  %v1006_v40 = vadd.f32 %v1516_v36, %v1452_v33  ;;  %v1454_v41 = vpop.f32.mrf.mxu0 }
 0x172   : > { %v1455_v42 = vadd.f32 %v1454_v41, %v1453_v37  ;;  %v1518_v43 = vpop.f32.mrf.mxu1 }
 0x173   : > { %v1026_v44 = vadd.f32 %v1006_v40, %v368_v38  ;;  %v1519_v45 = vadd.f32 %v1518_v43, %v1517_v39 }
 0x175   : > { %1042 = vst [vmem:[#allocation2 + $0x78] sm:$0xff] %v1026_v44  ;;  %v1009_v47 = vadd.f32 %v1519_v45, %v1455_v42  ;;  %1047 = sbr.rel (%p1385_p6) target bundleno = 428 (0x1ac), region = 63 }
 0x177   : > { %v1027_v48 = vadd.f32 %v1009_v47, %v369_v46 }
 0x179   : > { %1043 = vst [vmem:[#allocation2 + $0x28] sm:$0xff] %v1027_v48 }
 0x17a   : > { %v1048_v49 = vld [vmem:[#allocation2 + $0x30] sm:$0xff]  ;;  %v1386_v50 = vld [vmem:[%s2174_s2] ss:$0 sm:$0xff]  ;;  %vm1087_vm0 = vcmask 7168   ;;  %v1050_v54 = vld [vmem:[#allocation2 + $0x58] sm:$0xff]  ;;  %vm1162_vm1 = vcmask 1040384  }
 0x17b   : > { %v1049_v51 = vld [vmem:[#allocation2] sm:$0xff]  ;;  %v1071_v52 = vadd.f32 %v1386_v50, %v1048_v49  ;;  %v1051_v55 = vld [vmem:[#allocation2 + $0x18] sm:$0xff]  ;;  %v1052_v56 = vld [vmem:[#allocation2 + $0x50] sm:$0xff]  ;;  %v1073_v57 = vadd.f32 %v1386_v50, %v1050_v54 }
 0x17c   : > { %v1072_v53 = vadd.f32 %v1386_v50, %v1049_v51  ;;  %v1074_v58 = vadd.f32 %v1386_v50, %v1051_v55  ;;  %v1075_v59 = vadd.f32 %v1386_v50, %v1052_v56  ;;  %v1053_v60 = vld [vmem:[#allocation2 + $0x68] sm:$0xff]  ;;  %v1056_v3 = vld [vmem:[#allocation2 + $0x40] sm:$0xff]  ;;  %v1058_v5 = vld [vmem:[#allocation2 + $0x10] sm:$0xff] }
 0x17d   : > { %v1054_v61 = vld [vmem:[#allocation2 + $0x8] sm:$0xff]  ;;  %1088 = vst.msk [vmem:[%s2010_s13] sm:$0xff] %vm1087_vm0, %v1071_v52  ;;  %v1125_v63 = vmul.f32 %v1071_v52, %v1071_v52  ;;  %v1076_v2 = vadd.f32 %v1386_v50, %v1053_v60  ;;  %v1057_v4 = vld [vmem:[#allocation2 + $0x20] sm:$0xff]  ;;  %1090 = vst.msk [vmem:[%s2010_s13 + $0x10] sm:$0xff] %vm1087_vm0, %v1073_v57  ;;  %v1127_v6 = vmul.f32 %v1073_v57, %v1073_v57 }
 0x17e   : > { %v1055_v62 = vld [vmem:[#allocation2 + $0x48] sm:$0xff]  ;;  %1089 = vst.msk [vmem:[%s2010_s13 + $0x8] sm:$0xff] %vm1087_vm0, %v1072_v53  ;;  %v1104_v0 = vadd.f32 %v1072_v53, %v1071_v52  ;;  %v1126_v1 = vmul.f32 %v1072_v53, %v1072_v53  ;;  %1091 = vst.msk [vmem:[%s2010_s13 + $0x18] sm:$0xff] %vm1087_vm0, %v1074_v58  ;;  %v1077_v7 = vadd.f32 %v1386_v50, %v1054_v61  ;;  %v1059_v8 = vld [vmem:[#allocation2 + $0x38] sm:$0xff] }
 0x17f   : > { %1092 = vst.msk [vmem:[%s2010_s13 + $0x20] sm:$0xff] %vm1087_vm0, %v1075_v59  ;;  %v1128_v11 = vmul.f32 %v1074_v58, %v1074_v58  ;;  %1093 = vst.msk [vmem:[%s2010_s13 + $0x28] sm:$0xff] %vm1087_vm0, %v1076_v2  ;;  %v1078_v12 = vadd.f32 %v1386_v50, %v1055_v62  ;;  %v1060_v13 = vld [vmem:[#allocation2 + $0x60] sm:$0xff]  ;;  %v1079_v14 = vadd.f32 %v1386_v50, %v1056_v3  ;;  %v1061_v17 = vld [vmem:[#allocation2 + $0x70] sm:$0xff] }
 0x180   : > { %v1141_v9 = vadd.f32 %v1126_v1, %v1125_v63  ;;  %v1105_v10 = vadd.f32 %v1104_v0, %v1073_v57  ;;  %1094 = vst.msk [vmem:[%s2010_s13 + $0x30] sm:$0xff] %vm1087_vm0, %v1077_v7  ;;  %v1080_v15 = vadd.f32 %v1386_v50, %v1057_v4  ;;  %v1081_v16 = vadd.f32 %v1386_v50, %v1058_v5  ;;  %v1062_v22 = vld [vmem:[#allocation2 + $0x78] sm:$0xff]  ;;  %v1063_v23 = vld [vmem:[#allocation2 + $0x28] sm:$0xff] }
 0x181   : > { %v1129_v20 = vmul.f32 %v1075_v59, %v1075_v59  ;;  %1095 = vst.msk [vmem:[%s2010_s13 + $0x38] sm:$0xff] %vm1087_vm0, %v1078_v12  ;;  %v1082_v21 = vadd.f32 %v1386_v50, %v1059_v8  ;;  %1096 = vst.msk [vmem:[%s2010_s13 + $0x40] sm:$0xff] %vm1087_vm0, %v1079_v14  ;;  %v1083_v24 = vadd.f32 %v1386_v50, %v1060_v13 }
 0x182   : > { %v1142_v18 = vadd.f32 %v1141_v9, %v1127_v6  ;;  %v1106_v19 = vadd.f32 %v1105_v10, %v1074_v58  ;;  %1097 = vst.msk [vmem:[%s2010_s13 + $0x48] sm:$0xff] %vm1087_vm0, %v1080_v15  ;;  %1098 = vst.msk [vmem:[%s2010_s13 + $0x50] sm:$0xff] %vm1087_vm0, %v1081_v16  ;;  %v1130_v27 = vmul.f32 %v1076_v2, %v1076_v2 }
 0x183   : > { %1099 = vst.msk [vmem:[%s2010_s13 + $0x58] sm:$0xff] %vm1087_vm0, %v1082_v21  ;;  %v1084_v28 = vadd.f32 %v1386_v50, %v1061_v17  ;;  %1100 = vst.msk [vmem:[%s2010_s13 + $0x60] sm:$0xff] %vm1087_vm0, %v1083_v24  ;;  %v1085_v29 = vadd.f32 %v1386_v50, %v1062_v22  ;;  %v1086_v30 = vadd.f32 %v1386_v50, %v1063_v23 }
 0x184   : > { %v1143_v25 = vadd.f32 %v1142_v18, %v1128_v11  ;;  %v1107_v26 = vadd.f32 %v1106_v19, %v1075_v59  ;;  %v1131_v33 = vmul.f32 %v1077_v7, %v1077_v7  ;;  %v1132_v36 = vmul.f32 %v1078_v12, %v1078_v12 }
 0x185   : > { %1101 = vst.msk [vmem:[%s2010_s13 + $0x68] sm:$0xff] %vm1087_vm0, %v1084_v28  ;;  %1102 = vst.msk [vmem:[%s2010_s13 + $0x70] sm:$0xff] %vm1087_vm0, %v1085_v29  ;;  %v1133_v39 = vmul.f32 %v1079_v14, %v1079_v14  ;;  %v1134_v42 = vmul.f32 %v1080_v15, %v1080_v15  ;;  %v1135_v45 = vmul.f32 %v1081_v16, %v1081_v16 }
 0x186   : > { %v1144_v31 = vadd.f32 %v1143_v25, %v1129_v20  ;;  %v1108_v32 = vadd.f32 %v1107_v26, %v1076_v2  ;;  %1103 = vst.msk [vmem:[%s2010_s13 + $0x78] sm:$0xff] %vm1087_vm0, %v1086_v30  ;;  %v1136_v48 = vmul.f32 %v1082_v21, %v1082_v21  ;;  %v1137_v51 = vmul.f32 %v1083_v24, %v1083_v24 }
 0x187   : > { %v1138_v54 = vmul.f32 %v1084_v28, %v1084_v28  ;;  %v1139_v57 = vmul.f32 %v1085_v29, %v1085_v29  ;;  %v1140_v60 = vmul.f32 %v1086_v30, %v1086_v30 }
 0x188   : > { %v1145_v34 = vadd.f32 %v1144_v31, %v1130_v27  ;;  %v1109_v35 = vadd.f32 %v1108_v32, %v1077_v7 }
 0x18a   : > { %v1146_v37 = vadd.f32 %v1145_v34, %v1131_v33  ;;  %v1110_v38 = vadd.f32 %v1109_v35, %v1078_v12 }
 0x18c   : > { %v1147_v40 = vadd.f32 %v1146_v37, %v1132_v36  ;;  %v1111_v41 = vadd.f32 %v1110_v38, %v1079_v14 }
 0x18e   : > { %v1148_v43 = vadd.f32 %v1147_v40, %v1133_v39  ;;  %v1112_v44 = vadd.f32 %v1111_v41, %v1080_v15 }
 0x190   : > { %v1149_v46 = vadd.f32 %v1148_v43, %v1134_v42  ;;  %v1113_v47 = vadd.f32 %v1112_v44, %v1081_v16 }
 0x192   : > { %v1150_v49 = vadd.f32 %v1149_v46, %v1135_v45  ;;  %v1114_v50 = vadd.f32 %v1113_v47, %v1082_v21 }
 0x194   : > { %v1151_v52 = vadd.f32 %v1150_v49, %v1136_v48  ;;  %v1115_v53 = vadd.f32 %v1114_v50, %v1083_v24 }
 0x196   : > { %v1152_v55 = vadd.f32 %v1151_v52, %v1137_v51  ;;  %v1116_v56 = vadd.f32 %v1115_v53, %v1084_v28 }
 0x198   : > { %v1153_v58 = vadd.f32 %v1152_v55, %v1138_v54  ;;  %v1117_v59 = vadd.f32 %v1116_v56, %v1085_v29 }
 0x19a   : > { %v1154_v61 = vadd.f32 %v1153_v58, %v1139_v57  ;;  %v1118_v62 = vadd.f32 %v1117_v59, %v1086_v30 }
 0x19c   : > { %v1119_v63 = vrot.slane %v1118_v62, 4  ;;  %v1155_v0 = vadd.f32 %v1154_v61, %v1140_v60 }
 0x19e   : > { %v1120_v1 = vadd.f32 %v1119_v63, %v1118_v62  ;;  %v1156_v2 = vrot.slane %v1155_v0, 4 }
 0x1a0   : > { %v1121_v3 = vrot.slane %v1120_v1, 2  ;;  %v1157_v4 = vadd.f32 %v1156_v2, %v1155_v0 }
 0x1a2   : > { %v1122_v5 = vadd.f32 %v1121_v3, %v1120_v1  ;;  %v1158_v6 = vrot.slane %v1157_v4, 2 }
 0x1a4   : > { %v1123_v7 = vrot.slane %v1122_v5, 1  ;;  %v1159_v8 = vadd.f32 %v1158_v6, %v1157_v4 }
 0x1a6   : > { %v1124_v9 = vadd.f32 %v1123_v7, %v1122_v5  ;;  %v1160_v10 = vrot.slane %v1159_v8, 1 }
 0x1a8   : > { %v1161_v11 = vadd.f32 %v1160_v10, %v1159_v8 }
 0x1aa   : > { %v1163_v12 = vsel %vm1162_vm1, %v1124_v9, %v1161_v11 }
 0x1ab   : > { %1164 = vst [vmem:[%s318_s27] sm:$0x3] %v1163_v12 }
 0x1ac PF: > { %s1388_s20 = sshll.u32 %s1784_s21, 5  ;;  %s1188_s8 = sshll.u32 %s318_s27, 4  ;;  %s1189_s8 = int_to_ptr.vmem [resolvable:$true] %s1188_s8 }
 0x1ad   : > { %s1186_s30 = scalar_lea.hbm %s2176_s4, %s1388_s20  ;;  %s2187_s9 = sand.u32 1, %s1764_s16  }
 0x1ae   : > { %s1171_s6 = scalar_lea.sflag [#allocation5], %s2187_s9  ;;  %s1688_s29 = scalar_lea.vmem %s1189_s8, 32 }
 0x1af   : > { %p1689_p8 = scmp.ne.s32.totalorder %s1189_s8, %s1688_s29  ;;  %s1799_s5 = smov [#allocation4]  }
 0x1b0   : > { %s1692_s18 = sshll.u32 %s1799_s5, 4  ;;  %s1693_s18 = int_to_ptr.vmem [resolvable:$false] %s1692_s18 }
 0x1b1   : > { %p1690_p9 = pnand %p1689_p8, %p1897_p7  ;;  %s1694_s13 = scalar_lea.vmem %s1693_s18, 64 }
 0x1b2   : > { %p1695_p11 = scmp.lt.s32.totalorder %s1189_s8, %s1693_s18  ;;  %p1696_p13 = scmp.lt.s32.totalorder %s1694_s13, %s1688_s29 }
 0x1b3   : > { %p1691_p10 = pneg %p1690_p9 }
 0x1b4   : > { %p1697_p0 = por %p1696_p13, %p1695_p11 }
 0x1b6   : > { %p1698_p1 = pnand %p1697_p0, %p1691_p10 }
 0x1b8   : > { %1701 = shalt.err (!%p1698_p1)
}
 0x1b9   : > { %s1702_s21 = scalar_lea.hbm %s1186_s30, 32  ;;  %s1706_s0 = scalar_lea.hbm %s2176_s4, 64 }
 0x1ba   : > { %p1703_p2 = scmp.ne.s32.totalorder %s1186_s30, %s1702_s21  ;;  %p1707_p5 = scmp.lt.s32.totalorder %s1186_s30, %s2176_s4 }
 0x1bb   : > { %p1708_p6 = scmp.lt.s32.totalorder %s1706_s0, %s1702_s21 }
 0x1bc   : > { %p1704_p3 = pnand %p1703_p2, %p1897_p7 }
 0x1bd   : > { %p1709_p8 = por %p1708_p6, %p1707_p5 }
 0x1be   : > { %p1705_p4 = pneg %p1704_p3 }
 0x1c0   : > { %p1710_p9 = pnand %p1709_p8, %p1705_p4 }
 0x1c2   : > { %1713 = shalt.err (!%p1710_p9)
}
 0x1c3   : > { %1520 = dma.vmem_to_hbm [thread:$0]  (%p1897_p7), %s1189_s8, 32, %s1186_s30, %s1171_s6  }
 0x1c4 PF: > { %p1526_p10 = scmp.ge.s32.totalorder %s1796_s24, 2  ;;  %s1208_s14 = sand.u32 1, %s1760_s15  }
 0x1c5   : > { %s1209_s25 = scalar_lea.sflag [#allocation5], %s1208_s14 }
 0x1c6   : > { %p1523_p11 = pnand %p1526_p10, %p1905_p12 }
 0x1c8   : > { %p1524_p13 = pneg %p1523_p11 }
 0x1ca   : > { %1755 = dma.done.wait (%p1524_p13), %s1209_s25, 32  }
 0x1cb   : > { %1757 = vsyncadd (%p1524_p13), %s1209_s25, 4294967264  ;;  %s18_s24 = sadd.s32 1, %s1796_s24   ;;  %s2188_s7 = sld [smem:[#allocation7_spill]] }
 0x1cc   : > { %p15_p0 = scmp.ge.s32.totalorder %s18_s24, 18   ;;  %s2189_s30 = sld [smem:[#allocation8_spill]] }
 0x1cd   : > { %s2190_s15 = smov %s1764_s16  ;;  %s2191_s16 = smov %s1768_s17 }
 0x1ce   : > { %s2192_s17 = smov %s1910_s11  ;;  %s2193_s18 = smov %s1776_s19 }
 0x1cf   : > { %s2194_s19 = smov %s1913_s12  ;;  %s2195_s20 = smov %s1788_s22 }
 0x1d0   : > { %s2196_s21 = smov %s1792_s23  ;;  %17 = sbr.rel (!%p15_p0) target bundleno = 8 (0x8), region = 118 }
 0x1d1   : > { %s2197_s22 = smov %s2188_s7 }
 0x1d2   : > { %s2198_s23 = smov %s2189_s30 }
 0x1d5   :  { %1214 = vsyncpa [#allocation5], 1 }
 0x1d6   :  { %1216 = vsyncpa [#allocation5 + $0x1], 1 }

</bundles_post_ra>
